<compile_context>
chip_gen: v7x
topology: tpu7x:2x2x1
jax: 0.10.0
libtpu: 0.0.40
codegen_flags: <defaults>
</compile_context>

<pallas_src>
import functools

import jax
import jax.numpy as jnp
from jax import lax
from jax.experimental import pallas as pl
from jax.experimental.pallas import tpu as pltpu


# ---------------------------------------------------------------------------
# Stage A kernel: conv1(3->64) + ReLU + conv2(64->64) + ReLU + 2x2 max-pool
# ---------------------------------------------------------------------------
def _stage_a_kernel(x1_ref, w1_ref, b1_ref, w2_ref, b2_ref, mask_ref,
                    o_ref, pad1, *, W, TA, RA):
    f32 = jnp.float32
    bf16 = jnp.bfloat16
    Wp = W + 2                      # flat row pitch (1 halo col each side)
    Wo = W // 2
    rows_ext = 2 * TA + 2           # conv1 rows produced (incl. conv2 halo)
    L1 = rows_ext * Wp              # conv1 output length in flat layout
    L2 = 2 * TA * Wp                # conv2 output length in flat layout
    rt = pl.program_id(1)

    # conv1: single im2col matmul (K = 9*Cin), bias, ReLU, garbage-col mask.
    a1 = jnp.dot(x1_ref[...], w1_ref[...], preferred_element_type=f32)
    a1 = jnp.maximum(a1 + b1_ref[...], 0.0) * mask_ref[...]

    # Flat store at column offset +1: valid cols land on 1..W, the masked
    # (zeroed) garbage cols land exactly on the halo columns of the next conv.
    pad1[pl.ds(1, L1), :] = a1
    pad1[0:1, :] = jnp.zeros((1, 64), f32)                          # first halo slot
    pad1[pl.ds(L1 + 1, Wp - 1), :] = jnp.zeros((Wp - 1, 64), f32)   # unwritten tail

    @pl.when(rt == 0)
    def _():    # conv1 row "-1" is conv2's zero padding at the image top
        pad1[pl.ds(0, Wp), :] = jnp.zeros((Wp, 64), f32)

    @pl.when(rt == RA - 1)
    def _():    # conv1 row "H" is conv2's zero padding at the image bottom
        pad1[pl.ds((rows_ext - 1) * Wp, Wp), :] = jnp.zeros((Wp, 64), f32)

    # conv2 + ReLU: 9 contiguous flat tap slices -> MXU (bf16 operands).
    acc2 = jnp.zeros((L2, 64), f32)
    for dy in range(3):
        for dx in range(3):
            tap = pad1[pl.ds(dy * Wp + dx, L2), :].astype(bf16)
            acc2 = acc2 + jnp.dot(tap, w2_ref[dy, dx],
                                  preferred_element_type=f32)
    a2 = jnp.maximum(acc2 + b2_ref[...], 0.0)

    # 2x2/2 max-pool, bulk (garbage cols dropped by the [:, :W] slice).
    a2r = a2.reshape(TA, 2, Wp, 64)
    vmax = jnp.maximum(a2r[:, 0], a2r[:, 1])                 # (TA, Wp, 64)
    hp = vmax[:, :W, :].reshape(TA, Wo, 2, 64)
    pooled = jnp.maximum(hp[:, :, 0], hp[:, :, 1])           # (TA, Wo, 64)
    o_ref[...] = pooled.astype(o_ref.dtype)


# ---------------------------------------------------------------------------
# Stage B kernel: conv3(64->128) + ReLU + conv4(128->128)   (no final ReLU)
# ---------------------------------------------------------------------------
def _stage_b_kernel(p_ref, w3_ref, b3_ref, w4_ref, b4_ref, mask_ref,
                    o_ref, pad3, *, Wo, TB, RB):
    f32 = jnp.float32
    bf16 = jnp.bfloat16
    Wp = Wo + 2
    rows_ext = TB + 2
    L3 = rows_ext * Wp
    L4 = TB * Wp
    rt = pl.program_id(1)

    # conv3 + ReLU
    acc3 = jnp.zeros((L3, 128), f32)
    for dy in range(3):
        for dx in range(3):
            tap = p_ref[pl.ds(dy * Wp + dx, L3), :]
            acc3 = acc3 + jnp.dot(tap, w3_ref[dy, dx],
                                  preferred_element_type=f32)
    a3 = jnp.maximum(acc3 + b3_ref[...], 0.0) * mask_ref[...]

    pad3[pl.ds(1, L3), :] = a3
    pad3[0:1, :] = jnp.zeros((1, 128), f32)
    pad3[pl.ds(L3 + 1, Wp - 1), :] = jnp.zeros((Wp - 1, 128), f32)

    @pl.when(rt == 0)
    def _():
        pad3[pl.ds(0, Wp), :] = jnp.zeros((Wp, 128), f32)

    @pl.when(rt == RB - 1)
    def _():
        pad3[pl.ds((rows_ext - 1) * Wp, Wp), :] = jnp.zeros((Wp, 128), f32)

    # conv4 (no ReLU); garbage columns are dropped by the wrapper.
    acc4 = jnp.zeros((L4, 128), f32)
    for dy in range(3):
        for dx in range(3):
            tap = pad3[pl.ds(dy * Wp + dx, L4), :].astype(bf16)
            acc4 = acc4 + jnp.dot(tap, w4_ref[dy, dx],
                                  preferred_element_type=f32)
    o_ref[...] = (acc4 + b4_ref[...]).astype(o_ref.dtype)


# ---------------------------------------------------------------------------
# Wrapper-side (XLA) data staging
# ---------------------------------------------------------------------------
def _conv1_patches(x_nhwc, T, R):
    """Host-side im2col for conv1 over the extended row range, row-tiled."""
    N, H, W, Cin = x_nhwc.shape
    xp = jnp.pad(x_nhwc, ((0, 0), (2, 2), (1, 1), (0, 0)))
    rows = H + 2                                         # conv1 rows -1 .. H
    taps = []
    for dy in range(3):
        for dx in range(3):
            taps.append(xp[:, dy:dy + rows, dx:dx + W, :])
    pat = jnp.concatenate(taps, axis=-1)                 # (N, H+2, W, 9*Cin)
    pat = jnp.pad(pat, ((0, 0), (0, 0), (0, 2), (0, 0)))   # 2 garbage cols
    win = 2 * T + 2
    idx = (jnp.arange(R) * (2 * T))[:, None] + jnp.arange(win)[None, :]
    pat = pat[:, idx]                                    # (N, R, win, W+2, 9Cin)
    return pat.reshape(N * R, win * (W + 2), 9 * Cin)


def _row_windows(pooled, T, R):
    """Pooled-activation row windows (with conv3/conv4 halos) for stage B."""
    N, Ho, Wo, C = pooled.shape
    pp = jnp.pad(pooled, ((0, 0), (2, 3), (1, 1), (0, 0)))
    win = T + 5
    idx = (jnp.arange(R) * T)[:, None] + jnp.arange(win)[None, :]
    w = pp[:, idx]                                       # (N, R, win, Wo+2, C)
    return w.reshape(N * R, win * (Wo + 2), C)


def _col_mask(rows, pitch, valid):
    col = jnp.arange(rows * pitch, dtype=jnp.int32) % pitch
    return (col < valid).astype(jnp.float32).reshape(rows * pitch, 1)


def _pick_row_tile(ho, w, budget=16 * 1024 * 1024, cap=64):
    """Largest divisor of Ho whose stage-A working set fits the budget."""
    wp = w + 2
    best = 1
    for t in range(1, min(ho, cap) + 1):
        if ho % t:
            continue
        l1 = (2 * t + 2) * wp
        l2 = 2 * t * wp
        est = 4 * 128 * (3 * l1 + 3 * l2 + (l1 + wp))
        if est <= budget:
            best = t
    return best


def _vmem_limit(l_big, l_small, flat):
    est = 4 * 128 * (3 * l_big + 3 * l_small + flat) + 2 * 1024 * 1024
    return int(min(max(2 * est, 32 * 1024 * 1024), 64 * 1024 * 1024))


# ---------------------------------------------------------------------------
# Forward pass (NCHW in, NCHW out - matches the torch module)
# ---------------------------------------------------------------------------
def vgg_features_forward(x_nchw, params, row_tile=None):
    """VGG19.features[:8]: Conv-ReLU-Conv-ReLU-MaxPool-Conv-ReLU-Conv."""
    N, Cin, H, W = x_nchw.shape
    assert H % 2 == 0 and W % 2 == 0
    Ho, Wo = H // 2, W // 2

    T = row_tile if row_tile is not None else _pick_row_tile(Ho, W)
    assert Ho % T == 0
    R = Ho // T

    bf16, f32 = jnp.bfloat16, jnp.float32
    x = jnp.transpose(x_nchw, (0, 2, 3, 1))              # NCHW -> NHWC

    # ---------------- stage A: conv1 + conv2 + pool -------------------------
    K1 = 9 * Cin
    Wp = W + 2
    L1 = (2 * T + 2) * Wp
    L2 = 2 * T * Wp
    FLAT1 = L1 + Wp

    x1 = _conv1_patches(x, T, R).astype(bf16)            # (N*R, L1, K1)
    w1 = params["w1"].reshape(K1, 64).astype(bf16)
    w2 = params["w2"].astype(bf16)
    b1 = params["b1"].reshape(1, 64).astype(f32)
    b2 = params["b2"].reshape(1, 64).astype(f32)
    mask_a = _col_mask(2 * T + 2, Wp, W)

    flops_a = 2 * N * R * (L1 * K1 * 64 + 9 * L2 * 64 * 64)
    bytes_a = int(x1.size * 2 + (w1.size + w2.size) * 2 + N * Ho * Wo * 64 * 2)

    pooled = pl.pallas_call(
        functools.partial(_stage_a_kernel, W=W, TA=T, RA=R),
        out_shape=jax.ShapeDtypeStruct((N * R, T, Wo, 64), bf16),
        grid=(N, R),
        in_specs=[
            pl.BlockSpec((None, L1, K1), lambda n, r: (n * R + r, 0, 0)),
            pl.BlockSpec((K1, 64), lambda n, r: (0, 0)),
            pl.BlockSpec((1, 64), lambda n, r: (0, 0)),
            pl.BlockSpec((3, 3, 64, 64), lambda n, r: (0, 0, 0, 0)),
            pl.BlockSpec((1, 64), lambda n, r: (0, 0)),
            pl.BlockSpec((L1, 1), lambda n, r: (0, 0)),
        ],
        out_specs=pl.BlockSpec((None, T, Wo, 64),
                               lambda n, r: (n * R + r, 0, 0, 0)),
        scratch_shapes=[pltpu.VMEM((FLAT1, 64), f32)],
        compiler_params=pltpu.CompilerParams(
            dimension_semantics=("parallel", "parallel"),
            vmem_limit_bytes=_vmem_limit(L1, L2, FLAT1)),
        cost_estimate=pl.CostEstimate(flops=flops_a, transcendentals=0,
                                      bytes_accessed=bytes_a),
    )(x1, w1, b1, w2, b2, mask_a)

    # ---------------- stage B: conv3 + conv4 --------------------------------
    WpB = Wo + 2
    L3 = (T + 2) * WpB
    L4 = T * WpB
    FLAT3 = L3 + WpB
    IN3 = (T + 5) * WpB

    pwin = _row_windows(pooled.reshape(N, Ho, Wo, 64), T, R)   # (N*R, IN3, 64)
    w3 = params["w3"].astype(bf16)
    w4 = params["w4"].astype(bf16)
    b3 = params["b3"].reshape(1, 128).astype(f32)
    b4 = params["b4"].reshape(1, 128).astype(f32)
    mask_b = _col_mask(T + 2, WpB, Wo)

    flops_b = 2 * N * R * (9 * L3 * 64 * 128 + 9 * L4 * 128 * 128)
    bytes_b = int(pwin.size * 2 + (w3.size + w4.size) * 2 + N * R * L4 * 128 * 4)

    out = pl.pallas_call(
        functools.partial(_stage_b_kernel, Wo=Wo, TB=T, RB=R),
        out_shape=jax.ShapeDtypeStruct((N * R, L4, 128), f32),
        grid=(N, R),
        in_specs=[
            pl.BlockSpec((None, IN3, 64), lambda n, r: (n * R + r, 0, 0)),
            pl.BlockSpec((3, 3, 64, 128), lambda n, r: (0, 0, 0, 0)),
            pl.BlockSpec((1, 128), lambda n, r: (0, 0)),
            pl.BlockSpec((3, 3, 128, 128), lambda n, r: (0, 0, 0, 0)),
            pl.BlockSpec((1, 128), lambda n, r: (0, 0)),
            pl.BlockSpec((L3, 1), lambda n, r: (0, 0)),
        ],
        out_specs=pl.BlockSpec((None, L4, 128),
                               lambda n, r: (n * R + r, 0, 0)),
        scratch_shapes=[pltpu.VMEM((FLAT3, 128), f32)],
        compiler_params=pltpu.CompilerParams(
            dimension_semantics=("parallel", "parallel"),
            vmem_limit_bytes=_vmem_limit(L3, L4, FLAT3)),
        cost_estimate=pl.CostEstimate(flops=flops_b, transcendentals=0,
                                      bytes_accessed=bytes_b),
    )(pwin, w3, b3, w4, b4, mask_b)

    # Drop the flat-layout garbage columns, back to NCHW.
    y = out.reshape(N, R, T, WpB, 128)[:, :, :, :Wo, :]
    y = y.reshape(N, Ho, Wo, 128)
    return jnp.transpose(y, (0, 3, 1, 2))


# ---------------------------------------------------------------------------
# Parameters (deterministic synthetic init; shapes = VGG19 features[:8])
# ---------------------------------------------------------------------------
def init_params(key):
    keys = jax.random.split(key, 8)

    def w(k, cin, cout):  # HWIO layout
        return jax.random.normal(k, (3, 3, cin, cout), jnp.float32) * 0.05

    def b(k, cout):
        return jax.random.normal(k, (cout,), jnp.float32) * 0.05

    return {
        "w1": w(keys[0], 3, 64),    "b1": b(keys[1], 64),
        "w2": w(keys[2], 64, 64),   "b2": b(keys[3], 64),
        "w3": w(keys[4], 64, 128),  "b3": b(keys[5], 128),
        "w4": w(keys[6], 128, 128), "b4": b(keys[7], 128),
    }


# ---------------------------------------------------------------------------
# Pure-JAX reference (correctness check only)
# ---------------------------------------------------------------------------
def _ref_conv(x, w, b, relu):
    y = lax.conv_general_dilated(
        x, w, (1, 1), "SAME",
        dimension_numbers=("NHWC", "HWIO", "NHWC"),
        precision=lax.Precision.HIGHEST) + b
    return jnp.maximum(y, 0.0) if relu else y


def ref_forward(x_nchw, params):
    x = jnp.transpose(x_nchw, (0, 2, 3, 1))
    h = _ref_conv(x, params["w1"], params["b1"], True)
    h = _ref_conv(h, params["w2"], params["b2"], True)
    h = lax.reduce_window(h, -jnp.inf, lax.max, (1, 2, 2, 1), (1, 2, 2, 1),
                          "VALID")
    h = _ref_conv(h, params["w3"], params["b3"], True)
    h = _ref_conv(h, params["w4"], params["b4"], False)
    return jnp.transpose(h, (0, 3, 1, 2))


if __name__ == "__main__":
    key = jax.random.PRNGKey(0)
    kx, kp = jax.random.split(key)
    x = jax.random.normal(kx, (2, 3, 16, 16), jnp.float32)   # NCHW, like PyTorch
    params = init_params(kp)

    ref = ref_forward(x, params)
    scale = float(jnp.max(jnp.abs(ref)))

    fwd_tiled = jax.jit(functools.partial(vgg_features_forward, row_tile=4))
    fwd_auto = jax.jit(vgg_features_forward)

    for fwd in (fwd_tiled, fwd_auto):
        out = jax.block_until_ready(fwd(x, params))
        assert out.shape == (2, 128, 8, 8), out.shape
        err = float(jnp.max(jnp.abs(out - ref)))
        # bf16 matmul operands vs. f32 HIGHEST reference -> relaxed tolerance.
        assert err <= 0.08 * scale + 5e-3, (err, scale)

    print("KERNEL_OK")
</pallas_src>

<mosaic_0001>
module attributes {stable_mosaic.version = 11 : i64} {
  func.func @_stage_a_kernel(%arg0: i32, %arg1: i32, %arg2: memref<1x180x27xbf16, #tpu.memory_space<vmem>>, %arg3: memref<27x64xbf16, #tpu.memory_space<vmem>>, %arg4: memref<1x64xf32, #tpu.memory_space<vmem>>, %arg5: memref<3x3x64x64xbf16, #tpu.memory_space<vmem>>, %arg6: memref<1x64xf32, #tpu.memory_space<vmem>>, %arg7: memref<180x1xf32, #tpu.memory_space<vmem>>, %arg8: memref<1x4x8x64xbf16, #tpu.memory_space<vmem>>, %arg9: memref<198x64xf32, #tpu.memory_space<vmem>>) attributes {dimension_semantics = [#tpu.dimension_semantics<parallel>, #tpu.dimension_semantics<parallel>], iteration_bounds = array<i64: 2, 2>, scalar_prefetch = 0 : i64, scratch_operands = 1 : i64, tpu.core_type = #tpu.core_type<tc>, window_params = [{transform_indices = @transform_0, window_bounds = array<i64: 1, 180, 27>}, {pipeline_mode = #tpu.pipeline_mode<synchronous>, transform_indices = @transform_1, window_bounds = array<i64: 27, 64>}, {pipeline_mode = #tpu.pipeline_mode<synchronous>, transform_indices = @transform_2, window_bounds = array<i64: 1, 64>}, {pipeline_mode = #tpu.pipeline_mode<synchronous>, transform_indices = @transform_3, window_bounds = array<i64: 3, 3, 64, 64>}, {pipeline_mode = #tpu.pipeline_mode<synchronous>, transform_indices = @transform_4, window_bounds = array<i64: 1, 64>}, {pipeline_mode = #tpu.pipeline_mode<synchronous>, transform_indices = @transform_5, window_bounds = array<i64: 180, 1>}, {transform_indices = @transform_6, window_bounds = array<i64: 1, 4, 8, 64>}]} {
    %c0 = arith.constant 0 : index
    %c0_0 = arith.constant 0 : index
    %c0_1 = arith.constant 0 : index
    %0 = vector.load %arg2[%c0, %c0_0, %c0_1] : memref<1x180x27xbf16, #tpu.memory_space<vmem>>, vector<1x180x27xbf16>
    %1 = vector.shape_cast %0 : vector<1x180x27xbf16> to vector<180x27xbf16>
    %c0_2 = arith.constant 0 : index
    %c0_3 = arith.constant 0 : index
    %2 = vector.load %arg3[%c0_2, %c0_3] : memref<27x64xbf16, #tpu.memory_space<vmem>>, vector<27x64xbf16>
    %cst = arith.constant dense<0.000000e+00> : vector<180x64xf32>
    %3 = tpu.matmul %1, %2, %cst {dimension_numbers = #tpu.dot_dimension_numbers<[1], [0], [0], [1], [0, 0, 1, 1], [], []>} : vector<180x27xbf16>, vector<27x64xbf16>, vector<180x64xf32> -> vector<180x64xf32>
    %c0_4 = arith.constant 0 : index
    %c0_5 = arith.constant 0 : index
    %4 = vector.load %arg4[%c0_4, %c0_5] : memref<1x64xf32, #tpu.memory_space<vmem>>, vector<1x64xf32>
    %5 = vector.broadcast %4 : vector<1x64xf32> to vector<180x64xf32>
    %6 = arith.addf %3, %5 : vector<180x64xf32>
    %cst_6 = arith.constant 0.000000e+00 : f32
    %7 = vector.broadcast %cst_6 : f32 to vector<180x64xf32>
    %8 = arith.maximumf %6, %7 : vector<180x64xf32>
    %c0_7 = arith.constant 0 : index
    %c0_8 = arith.constant 0 : index
    %9 = vector.load %arg7[%c0_7, %c0_8] : memref<180x1xf32, #tpu.memory_space<vmem>>, vector<180x1xf32>
    %10 = vector.broadcast %9 : vector<180x1xf32> to vector<180x64xf32>
    %11 = arith.mulf %8, %10 : vector<180x64xf32>
    %c1 = arith.constant 1 : index
    %c0_9 = arith.constant 0 : index
    %12 = vector.load %arg9[%c1, %c0_9] : memref<198x64xf32, #tpu.memory_space<vmem>>, vector<180x64xf32>
    tpu.vector_store %arg9[%c1, %c0_9], %11 {strides = array<i32>} : memref<198x64xf32, #tpu.memory_space<vmem>>, vector<180x64xf32>,
    %cst_10 = arith.constant 0.000000e+00 : f32
    %13 = vector.broadcast %cst_10 : f32 to vector<1x64xf32>
    %c0_11 = arith.constant 0 : index
    %c0_12 = arith.constant 0 : index
    %14 = vector.load %arg9[%c0_11, %c0_12] : memref<198x64xf32, #tpu.memory_space<vmem>>, vector<1x64xf32>
    tpu.vector_store %arg9[%c0_11, %c0_12], %13 {strides = array<i32>} : memref<198x64xf32, #tpu.memory_space<vmem>>, vector<1x64xf32>,
    %cst_13 = arith.constant 0.000000e+00 : f32
    %15 = vector.broadcast %cst_13 : f32 to vector<17x64xf32>
    %c181 = arith.constant 181 : index
    %c0_14 = arith.constant 0 : index
    %16 = vector.load %arg9[%c181, %c0_14] : memref<198x64xf32, #tpu.memory_space<vmem>>, vector<17x64xf32>
    tpu.vector_store %arg9[%c181, %c0_14], %15 {strides = array<i32>} : memref<198x64xf32, #tpu.memory_space<vmem>>, vector<17x64xf32>,
    %c0_i32 = arith.constant 0 : i32
    %17 = arith.cmpi eq, %arg1, %c0_i32 : i32
    %18 = arith.extui %17 : i1 to i32
    %c0_i32_15 = arith.constant 0 : i32
    %19 = arith.cmpi ne, %18, %c0_i32_15 : i32
    scf.if %19 {
      %cst_81 = arith.constant 0.000000e+00 : f32
      %100 = vector.broadcast %cst_81 : f32 to vector<18x64xf32>
      %c0_82 = arith.constant 0 : index
      %c0_83 = arith.constant 0 : index
      %101 = vector.load %arg9[%c0_82, %c0_83] : memref<198x64xf32, #tpu.memory_space<vmem>>, vector<18x64xf32>
      tpu.vector_store %arg9[%c0_82, %c0_83], %100 {strides = array<i32>} : memref<198x64xf32, #tpu.memory_space<vmem>>, vector<18x64xf32>,
    } else {
    }
    %c1_i32 = arith.constant 1 : i32
    %20 = arith.cmpi eq, %arg1, %c1_i32 : i32
    %21 = arith.extui %20 : i1 to i32
    %c0_i32_16 = arith.constant 0 : i32
    %22 = arith.cmpi ne, %21, %c0_i32_16 : i32
    scf.if %22 {
      %cst_81 = arith.constant 0.000000e+00 : f32
      %100 = vector.broadcast %cst_81 : f32 to vector<18x64xf32>
      %c162 = arith.constant 162 : index
      %c0_82 = arith.constant 0 : index
      %101 = vector.load %arg9[%c162, %c0_82] : memref<198x64xf32, #tpu.memory_space<vmem>>, vector<18x64xf32>
      tpu.vector_store %arg9[%c162, %c0_82], %100 {strides = array<i32>} : memref<198x64xf32, #tpu.memory_space<vmem>>, vector<18x64xf32>,
    } else {
    }
    %cst_17 = arith.constant 0.000000e+00 : f32
    %23 = vector.broadcast %cst_17 : f32 to vector<144x64xf32>
    %c0_18 = arith.constant 0 : index
    %c0_19 = arith.constant 0 : index
    %24 = vector.load %arg9[%c0_18, %c0_19] : memref<198x64xf32, #tpu.memory_space<vmem>>, vector<144x64xf32>
    %25 = arith.truncf %24 : vector<144x64xf32> to vector<144x64xbf16>
    %c0_20 = arith.constant 0 : index
    %c0_21 = arith.constant 0 : index
    %c0_22 = arith.constant 0 : index
    %c0_23 = arith.constant 0 : index
    %26 = vector.load %arg5[%c0_20, %c0_21, %c0_22, %c0_23] : memref<3x3x64x64xbf16, #tpu.memory_space<vmem>>, vector<1x1x64x64xbf16>
    %27 = vector.shape_cast %26 : vector<1x1x64x64xbf16> to vector<64x64xbf16>
    %cst_24 = arith.constant dense<0.000000e+00> : vector<144x64xf32>
    %28 = tpu.matmul %25, %27, %cst_24 {dimension_numbers = #tpu.dot_dimension_numbers<[1], [0], [0], [1], [0, 0, 1, 1], [], []>} : vector<144x64xbf16>, vector<64x64xbf16>, vector<144x64xf32> -> vector<144x64xf32>
    %29 = arith.addf %23, %28 : vector<144x64xf32>
    %c1_25 = arith.constant 1 : index
    %c0_26 = arith.constant 0 : index
    %30 = vector.load %arg9[%c1_25, %c0_26] : memref<198x64xf32, #tpu.memory_space<vmem>>, vector<144x64xf32>
    %31 = arith.truncf %30 : vector<144x64xf32> to vector<144x64xbf16>
    %c0_27 = arith.constant 0 : index
    %c1_28 = arith.constant 1 : index
    %c0_29 = arith.constant 0 : index
    %c0_30 = arith.constant 0 : index
    %32 = vector.load %arg5[%c0_27, %c1_28, %c0_29, %c0_30] : memref<3x3x64x64xbf16, #tpu.memory_space<vmem>>, vector<1x1x64x64xbf16>
    %33 = vector.shape_cast %32 : vector<1x1x64x64xbf16> to vector<64x64xbf16>
    %cst_31 = arith.constant dense<0.000000e+00> : vector<144x64xf32>
    %34 = tpu.matmul %31, %33, %cst_31 {dimension_numbers = #tpu.dot_dimension_numbers<[1], [0], [0], [1], [0, 0, 1, 1], [], []>} : vector<144x64xbf16>, vector<64x64xbf16>, vector<144x64xf32> -> vector<144x64xf32>
    %35 = arith.addf %29, %34 : vector<144x64xf32>
    %c2 = arith.constant 2 : index
    %c0_32 = arith.constant 0 : index
    %36 = vector.load %arg9[%c2, %c0_32] : memref<198x64xf32, #tpu.memory_space<vmem>>, vector<144x64xf32>
    %37 = arith.truncf %36 : vector<144x64xf32> to vector<144x64xbf16>
    %c0_33 = arith.constant 0 : index
    %c2_34 = arith.constant 2 : index
    %c0_35 = arith.constant 0 : index
    %c0_36 = arith.constant 0 : index
    %38 = vector.load %arg5[%c0_33, %c2_34, %c0_35, %c0_36] : memref<3x3x64x64xbf16, #tpu.memory_space<vmem>>, vector<1x1x64x64xbf16>
    %39 = vector.shape_cast %38 : vector<1x1x64x64xbf16> to vector<64x64xbf16>
    %cst_37 = arith.constant dense<0.000000e+00> : vector<144x64xf32>
    %40 = tpu.matmul %37, %39, %cst_37 {dimension_numbers = #tpu.dot_dimension_numbers<[1], [0], [0], [1], [0, 0, 1, 1], [], []>} : vector<144x64xbf16>, vector<64x64xbf16>, vector<144x64xf32> -> vector<144x64xf32>
    %41 = arith.addf %35, %40 : vector<144x64xf32>
    %c18 = arith.constant 18 : index
    %c0_38 = arith.constant 0 : index
    %42 = vector.load %arg9[%c18, %c0_38] : memref<198x64xf32, #tpu.memory_space<vmem>>, vector<144x64xf32>
    %43 = arith.truncf %42 : vector<144x64xf32> to vector<144x64xbf16>
    %c1_39 = arith.constant 1 : index
    %c0_40 = arith.constant 0 : index
    %c0_41 = arith.constant 0 : index
    %c0_42 = arith.constant 0 : index
    %44 = vector.load %arg5[%c1_39, %c0_40, %c0_41, %c0_42] : memref<3x3x64x64xbf16, #tpu.memory_space<vmem>>, vector<1x1x64x64xbf16>
    %45 = vector.shape_cast %44 : vector<1x1x64x64xbf16> to vector<64x64xbf16>
    %cst_43 = arith.constant dense<0.000000e+00> : vector<144x64xf32>
    %46 = tpu.matmul %43, %45, %cst_43 {dimension_numbers = #tpu.dot_dimension_numbers<[1], [0], [0], [1], [0, 0, 1, 1], [], []>} : vector<144x64xbf16>, vector<64x64xbf16>, vector<144x64xf32> -> vector<144x64xf32>
    %47 = arith.addf %41, %46 : vector<144x64xf32>
    %c19 = arith.constant 19 : index
    %c0_44 = arith.constant 0 : index
    %48 = vector.load %arg9[%c19, %c0_44] : memref<198x64xf32, #tpu.memory_space<vmem>>, vector<144x64xf32>
    %49 = arith.truncf %48 : vector<144x64xf32> to vector<144x64xbf16>
    %c1_45 = arith.constant 1 : index
    %c1_46 = arith.constant 1 : index
    %c0_47 = arith.constant 0 : index
    %c0_48 = arith.constant 0 : index
    %50 = vector.load %arg5[%c1_45, %c1_46, %c0_47, %c0_48] : memref<3x3x64x64xbf16, #tpu.memory_space<vmem>>, vector<1x1x64x64xbf16>
    %51 = vector.shape_cast %50 : vector<1x1x64x64xbf16> to vector<64x64xbf16>
    %cst_49 = arith.constant dense<0.000000e+00> : vector<144x64xf32>
    %52 = tpu.matmul %49, %51, %cst_49 {dimension_numbers = #tpu.dot_dimension_numbers<[1], [0], [0], [1], [0, 0, 1, 1], [], []>} : vector<144x64xbf16>, vector<64x64xbf16>, vector<144x64xf32> -> vector<144x64xf32>
    %53 = arith.addf %47, %52 : vector<144x64xf32>
    %c20 = arith.constant 20 : index
    %c0_50 = arith.constant 0 : index
    %54 = vector.load %arg9[%c20, %c0_50] : memref<198x64xf32, #tpu.memory_space<vmem>>, vector<144x64xf32>
    %55 = arith.truncf %54 : vector<144x64xf32> to vector<144x64xbf16>
    %c1_51 = arith.constant 1 : index
    %c2_52 = arith.constant 2 : index
    %c0_53 = arith.constant 0 : index
    %c0_54 = arith.constant 0 : index
    %56 = vector.load %arg5[%c1_51, %c2_52, %c0_53, %c0_54] : memref<3x3x64x64xbf16, #tpu.memory_space<vmem>>, vector<1x1x64x64xbf16>
    %57 = vector.shape_cast %56 : vector<1x1x64x64xbf16> to vector<64x64xbf16>
    %cst_55 = arith.constant dense<0.000000e+00> : vector<144x64xf32>
    %58 = tpu.matmul %55, %57, %cst_55 {dimension_numbers = #tpu.dot_dimension_numbers<[1], [0], [0], [1], [0, 0, 1, 1], [], []>} : vector<144x64xbf16>, vector<64x64xbf16>, vector<144x64xf32> -> vector<144x64xf32>
    %59 = arith.addf %53, %58 : vector<144x64xf32>
    %c36 = arith.constant 36 : index
    %c0_56 = arith.constant 0 : index
    %60 = vector.load %arg9[%c36, %c0_56] : memref<198x64xf32, #tpu.memory_space<vmem>>, vector<144x64xf32>
    %61 = arith.truncf %60 : vector<144x64xf32> to vector<144x64xbf16>
    %c2_57 = arith.constant 2 : index
    %c0_58 = arith.constant 0 : index
    %c0_59 = arith.constant 0 : index
    %c0_60 = arith.constant 0 : index
    %62 = vector.load %arg5[%c2_57, %c0_58, %c0_59, %c0_60] : memref<3x3x64x64xbf16, #tpu.memory_space<vmem>>, vector<1x1x64x64xbf16>
    %63 = vector.shape_cast %62 : vector<1x1x64x64xbf16> to vector<64x64xbf16>
    %cst_61 = arith.constant dense<0.000000e+00> : vector<144x64xf32>
    %64 = tpu.matmul %61, %63, %cst_61 {dimension_numbers = #tpu.dot_dimension_numbers<[1], [0], [0], [1], [0, 0, 1, 1], [], []>} : vector<144x64xbf16>, vector<64x64xbf16>, vector<144x64xf32> -> vector<144x64xf32>
    %65 = arith.addf %59, %64 : vector<144x64xf32>
    %c37 = arith.constant 37 : index
    %c0_62 = arith.constant 0 : index
    %66 = vector.load %arg9[%c37, %c0_62] : memref<198x64xf32, #tpu.memory_space<vmem>>, vector<144x64xf32>
    %67 = arith.truncf %66 : vector<144x64xf32> to vector<144x64xbf16>
    %c2_63 = arith.constant 2 : index
    %c1_64 = arith.constant 1 : index
    %c0_65 = arith.constant 0 : index
    %c0_66 = arith.constant 0 : index
    %68 = vector.load %arg5[%c2_63, %c1_64, %c0_65, %c0_66] : memref<3x3x64x64xbf16, #tpu.memory_space<vmem>>, vector<1x1x64x64xbf16>
    %69 = vector.shape_cast %68 : vector<1x1x64x64xbf16> to vector<64x64xbf16>
    %cst_67 = arith.constant dense<0.000000e+00> : vector<144x64xf32>
    %70 = tpu.matmul %67, %69, %cst_67 {dimension_numbers = #tpu.dot_dimension_numbers<[1], [0], [0], [1], [0, 0, 1, 1], [], []>} : vector<144x64xbf16>, vector<64x64xbf16>, vector<144x64xf32> -> vector<144x64xf32>
    %71 = arith.addf %65, %70 : vector<144x64xf32>
    %c38 = arith.constant 38 : index
    %c0_68 = arith.constant 0 : index
    %72 = vector.load %arg9[%c38, %c0_68] : memref<198x64xf32, #tpu.memory_space<vmem>>, vector<144x64xf32>
    %73 = arith.truncf %72 : vector<144x64xf32> to vector<144x64xbf16>
    %c2_69 = arith.constant 2 : index
    %c2_70 = arith.constant 2 : index
    %c0_71 = arith.constant 0 : index
    %c0_72 = arith.constant 0 : index
    %74 = vector.load %arg5[%c2_69, %c2_70, %c0_71, %c0_72] : memref<3x3x64x64xbf16, #tpu.memory_space<vmem>>, vector<1x1x64x64xbf16>
    %75 = vector.shape_cast %74 : vector<1x1x64x64xbf16> to vector<64x64xbf16>
    %cst_73 = arith.constant dense<0.000000e+00> : vector<144x64xf32>
    %76 = tpu.matmul %73, %75, %cst_73 {dimension_numbers = #tpu.dot_dimension_numbers<[1], [0], [0], [1], [0, 0, 1, 1], [], []>} : vector<144x64xbf16>, vector<64x64xbf16>, vector<144x64xf32> -> vector<144x64xf32>
    %77 = arith.addf %71, %76 : vector<144x64xf32>
    %c0_74 = arith.constant 0 : index
    %c0_75 = arith.constant 0 : index
    %78 = vector.load %arg6[%c0_74, %c0_75] : memref<1x64xf32, #tpu.memory_space<vmem>>, vector<1x64xf32>
    %79 = vector.broadcast %78 : vector<1x64xf32> to vector<144x64xf32>
    %80 = arith.addf %77, %79 : vector<144x64xf32>
    %cst_76 = arith.constant 0.000000e+00 : f32
    %81 = vector.broadcast %cst_76 : f32 to vector<144x64xf32>
    %82 = arith.maximumf %80, %81 : vector<144x64xf32>
    %83 = vector.shape_cast %82 : vector<144x64xf32> to vector<4x2x18x64xf32>
    %84 = vector.extract_strided_slice %83 {offsets = [0, 0, 0, 0], sizes = [4, 1, 18, 64], strides = [1, 1, 1, 1]} : vector<4x2x18x64xf32> to vector<4x1x18x64xf32>
    %85 = vector.shape_cast %84 : vector<4x1x18x64xf32> to vector<4x18x64xf32>
    %86 = vector.extract_strided_slice %83 {offsets = [0, 1, 0, 0], sizes = [4, 1, 18, 64], strides = [1, 1, 1, 1]} : vector<4x2x18x64xf32> to vector<4x1x18x64xf32>
    %87 = vector.shape_cast %86 : vector<4x1x18x64xf32> to vector<4x18x64xf32>
    %88 = arith.maximumf %85, %87 : vector<4x18x64xf32>
    %89 = vector.extract_strided_slice %88 {offsets = [0, 0, 0], sizes = [4, 16, 64], strides = [1, 1, 1]} : vector<4x18x64xf32> to vector<4x16x64xf32>
    %90 = vector.shape_cast %89 : vector<4x16x64xf32> to vector<4x8x2x64xf32>
    %91 = vector.extract_strided_slice %90 {offsets = [0, 0, 0, 0], sizes = [4, 8, 1, 64], strides = [1, 1, 1, 1]} : vector<4x8x2x64xf32> to vector<4x8x1x64xf32>
    %92 = vector.shape_cast %91 : vector<4x8x1x64xf32> to vector<4x8x64xf32>
    %93 = vector.extract_strided_slice %90 {offsets = [0, 0, 1, 0], sizes = [4, 8, 1, 64], strides = [1, 1, 1, 1]} : vector<4x8x2x64xf32> to vector<4x8x1x64xf32>
    %94 = vector.shape_cast %93 : vector<4x8x1x64xf32> to vector<4x8x64xf32>
    %95 = arith.maximumf %92, %94 : vector<4x8x64xf32>
    %96 = arith.truncf %95 : vector<4x8x64xf32> to vector<4x8x64xbf16>
    %c0_77 = arith.constant 0 : index
    %c0_78 = arith.constant 0 : index
    %c0_79 = arith.constant 0 : index
    %c0_80 = arith.constant 0 : index
    %97 = vector.load %arg8[%c0_77, %c0_78, %c0_79, %c0_80] : memref<1x4x8x64xbf16, #tpu.memory_space<vmem>>, vector<1x4x8x64xbf16>
    %98 = vector.shape_cast %97 : vector<1x4x8x64xbf16> to vector<4x8x64xbf16>
    %99 = vector.shape_cast %96 : vector<4x8x64xbf16> to vector<1x4x8x64xbf16>
    tpu.vector_store %arg8[%c0_77, %c0_78, %c0_79, %c0_80], %99 {strides = array<i32>} : memref<1x4x8x64xbf16, #tpu.memory_space<vmem>>, vector<1x4x8x64xbf16>,
    return
  }
  func.func @transform_0(%arg0: i32, %arg1: i32) -> (i32, i32, i32) {
    %c2_i32 = arith.constant 2 : i32
    %0 = arith.muli %arg0, %c2_i32 : i32
    %1 = arith.addi %0, %arg1 : i32
    %c0_i32 = arith.constant 0 : i32
    %c0_i32_0 = arith.constant 0 : i32
    %c0_i32_1 = arith.constant 0 : i32
    return %1, %c0_i32, %c0_i32_0 : i32, i32, i32
  }
  func.func @transform_1(%arg0: i32, %arg1: i32) -> (i32, i32) {
    %c0_i32 = arith.constant 0 : i32
    %c0_i32_0 = arith.constant 0 : i32
    %c0_i32_1 = arith.constant 0 : i32
    return %c0_i32, %c0_i32_0 : i32, i32
  }
  func.func @transform_2(%arg0: i32, %arg1: i32) -> (i32, i32) {
    %c0_i32 = arith.constant 0 : i32
    %c0_i32_0 = arith.constant 0 : i32
    %c0_i32_1 = arith.constant 0 : i32
    return %c0_i32, %c0_i32_0 : i32, i32
  }
  func.func @transform_3(%arg0: i32, %arg1: i32) -> (i32, i32, i32, i32) {
    %c0_i32 = arith.constant 0 : i32
    %c0_i32_0 = arith.constant 0 : i32
    %c0_i32_1 = arith.constant 0 : i32
    %c0_i32_2 = arith.constant 0 : i32
    %c0_i32_3 = arith.constant 0 : i32
    return %c0_i32, %c0_i32_0, %c0_i32_1, %c0_i32_2 : i32, i32, i32, i32
  }
  func.func @transform_4(%arg0: i32, %arg1: i32) -> (i32, i32) {
    %c0_i32 = arith.constant 0 : i32
    %c0_i32_0 = arith.constant 0 : i32
    %c0_i32_1 = arith.constant 0 : i32
    return %c0_i32, %c0_i32_0 : i32, i32
  }
  func.func @transform_5(%arg0: i32, %arg1: i32) -> (i32, i32) {
    %c0_i32 = arith.constant 0 : i32
    %c0_i32_0 = arith.constant 0 : i32
    %c0_i32_1 = arith.constant 0 : i32
    return %c0_i32, %c0_i32_0 : i32, i32
  }
  func.func @transform_6(%arg0: i32, %arg1: i32) -> (i32, i32, i32, i32) {
    %c2_i32 = arith.constant 2 : i32
    %0 = arith.muli %arg0, %c2_i32 : i32
    %1 = arith.addi %0, %arg1 : i32
    %c0_i32 = arith.constant 0 : i32
    %c0_i32_0 = arith.constant 0 : i32
    %c0_i32_1 = arith.constant 0 : i32
    %c0_i32_2 = arith.constant 0 : i32
    return %1, %c0_i32, %c0_i32_0, %c0_i32_1 : i32, i32, i32, i32
  }
}

module attributes {stable_mosaic.version = 11 : i64} {
  func.func @_stage_b_kernel(%arg0: i32, %arg1: i32, %arg2: memref<1x90x64xbf16, #tpu.memory_space<vmem>>, %arg3: memref<3x3x64x128xbf16, #tpu.memory_space<vmem>>, %arg4: memref<1x128xf32, #tpu.memory_space<vmem>>, %arg5: memref<3x3x128x128xbf16, #tpu.memory_space<vmem>>, %arg6: memref<1x128xf32, #tpu.memory_space<vmem>>, %arg7: memref<60x1xf32, #tpu.memory_space<vmem>>, %arg8: memref<1x40x128xf32, #tpu.memory_space<vmem>>, %arg9: memref<70x128xf32, #tpu.memory_space<vmem>>) attributes {dimension_semantics = [#tpu.dimension_semantics<parallel>, #tpu.dimension_semantics<parallel>], iteration_bounds = array<i64: 2, 2>, scalar_prefetch = 0 : i64, scratch_operands = 1 : i64, tpu.core_type = #tpu.core_type<tc>, window_params = [{transform_indices = @transform_0, window_bounds = array<i64: 1, 90, 64>}, {pipeline_mode = #tpu.pipeline_mode<synchronous>, transform_indices = @transform_1, window_bounds = array<i64: 3, 3, 64, 128>}, {pipeline_mode = #tpu.pipeline_mode<synchronous>, transform_indices = @transform_2, window_bounds = array<i64: 1, 128>}, {pipeline_mode = #tpu.pipeline_mode<synchronous>, transform_indices = @transform_3, window_bounds = array<i64: 3, 3, 128, 128>}, {pipeline_mode = #tpu.pipeline_mode<synchronous>, transform_indices = @transform_4, window_bounds = array<i64: 1, 128>}, {pipeline_mode = #tpu.pipeline_mode<synchronous>, transform_indices = @transform_5, window_bounds = array<i64: 60, 1>}, {transform_indices = @transform_6, window_bounds = array<i64: 1, 40, 128>}]} {
    %cst = arith.constant 0.000000e+00 : f32
    %0 = vector.broadcast %cst : f32 to vector<60x128xf32>
    %c0 = arith.constant 0 : index
    %c0_0 = arith.constant 0 : index
    %c0_1 = arith.constant 0 : index
    %1 = vector.load %arg2[%c0, %c0_0, %c0_1] : memref<1x90x64xbf16, #tpu.memory_space<vmem>>, vector<1x60x64xbf16>
    %2 = vector.shape_cast %1 : vector<1x60x64xbf16> to vector<60x64xbf16>
    %c0_2 = arith.constant 0 : index
    %c0_3 = arith.constant 0 : index
    %c0_4 = arith.constant 0 : index
    %c0_5 = arith.constant 0 : index
    %3 = vector.load %arg3[%c0_2, %c0_3, %c0_4, %c0_5] : memref<3x3x64x128xbf16, #tpu.memory_space<vmem>>, vector<1x1x64x128xbf16>
    %4 = vector.shape_cast %3 : vector<1x1x64x128xbf16> to vector<64x128xbf16>
    %cst_6 = arith.constant dense<0.000000e+00> : vector<60x128xf32>
    %5 = tpu.matmul %2, %4, %cst_6 {dimension_numbers = #tpu.dot_dimension_numbers<[1], [0], [0], [1], [0, 0, 1, 1], [], []>} : vector<60x64xbf16>, vector<64x128xbf16>, vector<60x128xf32> -> vector<60x128xf32>
    %6 = arith.addf %0, %5 : vector<60x128xf32>
    %c0_7 = arith.constant 0 : index
    %c1 = arith.constant 1 : index
    %c0_8 = arith.constant 0 : index
    %7 = vector.load %arg2[%c0_7, %c1, %c0_8] : memref<1x90x64xbf16, #tpu.memory_space<vmem>>, vector<1x60x64xbf16>
    %8 = vector.shape_cast %7 : vector<1x60x64xbf16> to vector<60x64xbf16>
    %c0_9 = arith.constant 0 : index
    %c1_10 = arith.constant 1 : index
    %c0_11 = arith.constant 0 : index
    %c0_12 = arith.constant 0 : index
    %9 = vector.load %arg3[%c0_9, %c1_10, %c0_11, %c0_12] : memref<3x3x64x128xbf16, #tpu.memory_space<vmem>>, vector<1x1x64x128xbf16>
    %10 = vector.shape_cast %9 : vector<1x1x64x128xbf16> to vector<64x128xbf16>
    %cst_13 = arith.constant dense<0.000000e+00> : vector<60x128xf32>
    %11 = tpu.matmul %8, %10, %cst_13 {dimension_numbers = #tpu.dot_dimension_numbers<[1], [0], [0], [1], [0, 0, 1, 1], [], []>} : vector<60x64xbf16>, vector<64x128xbf16>, vector<60x128xf32> -> vector<60x128xf32>
    %12 = arith.addf %6, %11 : vector<60x128xf32>
    %c0_14 = arith.constant 0 : index
    %c2 = arith.constant 2 : index
    %c0_15 = arith.constant 0 : index
    %13 = vector.load %arg2[%c0_14, %c2, %c0_15] : memref<1x90x64xbf16, #tpu.memory_space<vmem>>, vector<1x60x64xbf16>
    %14 = vector.shape_cast %13 : vector<1x60x64xbf16> to vector<60x64xbf16>
    %c0_16 = arith.constant 0 : index
    %c2_17 = arith.constant 2 : index
    %c0_18 = arith.constant 0 : index
    %c0_19 = arith.constant 0 : index
    %15 = vector.load %arg3[%c0_16, %c2_17, %c0_18, %c0_19] : memref<3x3x64x128xbf16, #tpu.memory_space<vmem>>, vector<1x1x64x128xbf16>
    %16 = vector.shape_cast %15 : vector<1x1x64x128xbf16> to vector<64x128xbf16>
    %cst_20 = arith.constant dense<0.000000e+00> : vector<60x128xf32>
    %17 = tpu.matmul %14, %16, %cst_20 {dimension_numbers = #tpu.dot_dimension_numbers<[1], [0], [0], [1], [0, 0, 1, 1], [], []>} : vector<60x64xbf16>, vector<64x128xbf16>, vector<60x128xf32> -> vector<60x128xf32>
    %18 = arith.addf %12, %17 : vector<60x128xf32>
    %c0_21 = arith.constant 0 : index
    %c10 = arith.constant 10 : index
    %c0_22 = arith.constant 0 : index
    %19 = vector.load %arg2[%c0_21, %c10, %c0_22] : memref<1x90x64xbf16, #tpu.memory_space<vmem>>, vector<1x60x64xbf16>
    %20 = vector.shape_cast %19 : vector<1x60x64xbf16> to vector<60x64xbf16>
    %c1_23 = arith.constant 1 : index
    %c0_24 = arith.constant 0 : index
    %c0_25 = arith.constant 0 : index
    %c0_26 = arith.constant 0 : index
    %21 = vector.load %arg3[%c1_23, %c0_24, %c0_25, %c0_26] : memref<3x3x64x128xbf16, #tpu.memory_space<vmem>>, vector<1x1x64x128xbf16>
    %22 = vector.shape_cast %21 : vector<1x1x64x128xbf16> to vector<64x128xbf16>
    %cst_27 = arith.constant dense<0.000000e+00> : vector<60x128xf32>
    %23 = tpu.matmul %20, %22, %cst_27 {dimension_numbers = #tpu.dot_dimension_numbers<[1], [0], [0], [1], [0, 0, 1, 1], [], []>} : vector<60x64xbf16>, vector<64x128xbf16>, vector<60x128xf32> -> vector<60x128xf32>
    %24 = arith.addf %18, %23 : vector<60x128xf32>
    %c0_28 = arith.constant 0 : index
    %c11 = arith.constant 11 : index
    %c0_29 = arith.constant 0 : index
    %25 = vector.load %arg2[%c0_28, %c11, %c0_29] : memref<1x90x64xbf16, #tpu.memory_space<vmem>>, vector<1x60x64xbf16>
    %26 = vector.shape_cast %25 : vector<1x60x64xbf16> to vector<60x64xbf16>
    %c1_30 = arith.constant 1 : index
    %c1_31 = arith.constant 1 : index
    %c0_32 = arith.constant 0 : index
    %c0_33 = arith.constant 0 : index
    %27 = vector.load %arg3[%c1_30, %c1_31, %c0_32, %c0_33] : memref<3x3x64x128xbf16, #tpu.memory_space<vmem>>, vector<1x1x64x128xbf16>
    %28 = vector.shape_cast %27 : vector<1x1x64x128xbf16> to vector<64x128xbf16>
    %cst_34 = arith.constant dense<0.000000e+00> : vector<60x128xf32>
    %29 = tpu.matmul %26, %28, %cst_34 {dimension_numbers = #tpu.dot_dimension_numbers<[1], [0], [0], [1], [0, 0, 1, 1], [], []>} : vector<60x64xbf16>, vector<64x128xbf16>, vector<60x128xf32> -> vector<60x128xf32>
    %30 = arith.addf %24, %29 : vector<60x128xf32>
    %c0_35 = arith.constant 0 : index
    %c12 = arith.constant 12 : index
    %c0_36 = arith.constant 0 : index
    %31 = vector.load %arg2[%c0_35, %c12, %c0_36] : memref<1x90x64xbf16, #tpu.memory_space<vmem>>, vector<1x60x64xbf16>
    %32 = vector.shape_cast %31 : vector<1x60x64xbf16> to vector<60x64xbf16>
    %c1_37 = arith.constant 1 : index
    %c2_38 = arith.constant 2 : index
    %c0_39 = arith.constant 0 : index
    %c0_40 = arith.constant 0 : index
    %33 = vector.load %arg3[%c1_37, %c2_38, %c0_39, %c0_40] : memref<3x3x64x128xbf16, #tpu.memory_space<vmem>>, vector<1x1x64x128xbf16>
    %34 = vector.shape_cast %33 : vector<1x1x64x128xbf16> to vector<64x128xbf16>
    %cst_41 = arith.constant dense<0.000000e+00> : vector<60x128xf32>
    %35 = tpu.matmul %32, %34, %cst_41 {dimension_numbers = #tpu.dot_dimension_numbers<[1], [0], [0], [1], [0, 0, 1, 1], [], []>} : vector<60x64xbf16>, vector<64x128xbf16>, vector<60x128xf32> -> vector<60x128xf32>
    %36 = arith.addf %30, %35 : vector<60x128xf32>
    %c0_42 = arith.constant 0 : index
    %c20 = arith.constant 20 : index
    %c0_43 = arith.constant 0 : index
    %37 = vector.load %arg2[%c0_42, %c20, %c0_43] : memref<1x90x64xbf16, #tpu.memory_space<vmem>>, vector<1x60x64xbf16>
    %38 = vector.shape_cast %37 : vector<1x60x64xbf16> to vector<60x64xbf16>
    %c2_44 = arith.constant 2 : index
    %c0_45 = arith.constant 0 : index
    %c0_46 = arith.constant 0 : index
    %c0_47 = arith.constant 0 : index
    %39 = vector.load %arg3[%c2_44, %c0_45, %c0_46, %c0_47] : memref<3x3x64x128xbf16, #tpu.memory_space<vmem>>, vector<1x1x64x128xbf16>
    %40 = vector.shape_cast %39 : vector<1x1x64x128xbf16> to vector<64x128xbf16>
    %cst_48 = arith.constant dense<0.000000e+00> : vector<60x128xf32>
    %41 = tpu.matmul %38, %40, %cst_48 {dimension_numbers = #tpu.dot_dimension_numbers<[1], [0], [0], [1], [0, 0, 1, 1], [], []>} : vector<60x64xbf16>, vector<64x128xbf16>, vector<60x128xf32> -> vector<60x128xf32>
    %42 = arith.addf %36, %41 : vector<60x128xf32>
    %c0_49 = arith.constant 0 : index
    %c21 = arith.constant 21 : index
    %c0_50 = arith.constant 0 : index
    %43 = vector.load %arg2[%c0_49, %c21, %c0_50] : memref<1x90x64xbf16, #tpu.memory_space<vmem>>, vector<1x60x64xbf16>
    %44 = vector.shape_cast %43 : vector<1x60x64xbf16> to vector<60x64xbf16>
    %c2_51 = arith.constant 2 : index
    %c1_52 = arith.constant 1 : index
    %c0_53 = arith.constant 0 : index
    %c0_54 = arith.constant 0 : index
    %45 = vector.load %arg3[%c2_51, %c1_52, %c0_53, %c0_54] : memref<3x3x64x128xbf16, #tpu.memory_space<vmem>>, vector<1x1x64x128xbf16>
    %46 = vector.shape_cast %45 : vector<1x1x64x128xbf16> to vector<64x128xbf16>
    %cst_55 = arith.constant dense<0.000000e+00> : vector<60x128xf32>
    %47 = tpu.matmul %44, %46, %cst_55 {dimension_numbers = #tpu.dot_dimension_numbers<[1], [0], [0], [1], [0, 0, 1, 1], [], []>} : vector<60x64xbf16>, vector<64x128xbf16>, vector<60x128xf32> -> vector<60x128xf32>
    %48 = arith.addf %42, %47 : vector<60x128xf32>
    %c0_56 = arith.constant 0 : index
    %c22 = arith.constant 22 : index
    %c0_57 = arith.constant 0 : index
    %49 = vector.load %arg2[%c0_56, %c22, %c0_57] : memref<1x90x64xbf16, #tpu.memory_space<vmem>>, vector<1x60x64xbf16>
    %50 = vector.shape_cast %49 : vector<1x60x64xbf16> to vector<60x64xbf16>
    %c2_58 = arith.constant 2 : index
    %c2_59 = arith.constant 2 : index
    %c0_60 = arith.constant 0 : index
    %c0_61 = arith.constant 0 : index
    %51 = vector.load %arg3[%c2_58, %c2_59, %c0_60, %c0_61] : memref<3x3x64x128xbf16, #tpu.memory_space<vmem>>, vector<1x1x64x128xbf16>
    %52 = vector.shape_cast %51 : vector<1x1x64x128xbf16> to vector<64x128xbf16>
    %cst_62 = arith.constant dense<0.000000e+00> : vector<60x128xf32>
    %53 = tpu.matmul %50, %52, %cst_62 {dimension_numbers = #tpu.dot_dimension_numbers<[1], [0], [0], [1], [0, 0, 1, 1], [], []>} : vector<60x64xbf16>, vector<64x128xbf16>, vector<60x128xf32> -> vector<60x128xf32>
    %54 = arith.addf %48, %53 : vector<60x128xf32>
    %c0_63 = arith.constant 0 : index
    %c0_64 = arith.constant 0 : index
    %55 = vector.load %arg4[%c0_63, %c0_64] : memref<1x128xf32, #tpu.memory_space<vmem>>, vector<1x128xf32>
    %56 = vector.broadcast %55 : vector<1x128xf32> to vector<60x128xf32>
    %57 = arith.addf %54, %56 : vector<60x128xf32>
    %cst_65 = arith.constant 0.000000e+00 : f32
    %58 = vector.broadcast %cst_65 : f32 to vector<60x128xf32>
    %59 = arith.maximumf %57, %58 : vector<60x128xf32>
    %c0_66 = arith.constant 0 : index
    %c0_67 = arith.constant 0 : index
    %60 = vector.load %arg7[%c0_66, %c0_67] : memref<60x1xf32, #tpu.memory_space<vmem>>, vector<60x1xf32>
    %61 = vector.broadcast %60 : vector<60x1xf32> to vector<60x128xf32>
    %62 = arith.mulf %59, %61 : vector<60x128xf32>
    %c1_68 = arith.constant 1 : index
    %c0_69 = arith.constant 0 : index
    %63 = vector.load %arg9[%c1_68, %c0_69] : memref<70x128xf32, #tpu.memory_space<vmem>>, vector<60x128xf32>
    tpu.vector_store %arg9[%c1_68, %c0_69], %62 {strides = array<i32>} : memref<70x128xf32, #tpu.memory_space<vmem>>, vector<60x128xf32>,
    %cst_70 = arith.constant 0.000000e+00 : f32
    %64 = vector.broadcast %cst_70 : f32 to vector<1x128xf32>
    %c0_71 = arith.constant 0 : index
    %c0_72 = arith.constant 0 : index
    %65 = vector.load %arg9[%c0_71, %c0_72] : memref<70x128xf32, #tpu.memory_space<vmem>>, vector<1x128xf32>
    tpu.vector_store %arg9[%c0_71, %c0_72], %64 {strides = array<i32>} : memref<70x128xf32, #tpu.memory_space<vmem>>, vector<1x128xf32>,
    %cst_73 = arith.constant 0.000000e+00 : f32
    %66 = vector.broadcast %cst_73 : f32 to vector<9x128xf32>
    %c61 = arith.constant 61 : index
    %c0_74 = arith.constant 0 : index
    %67 = vector.load %arg9[%c61, %c0_74] : memref<70x128xf32, #tpu.memory_space<vmem>>, vector<9x128xf32>
    tpu.vector_store %arg9[%c61, %c0_74], %66 {strides = array<i32>} : memref<70x128xf32, #tpu.memory_space<vmem>>, vector<9x128xf32>,
    %c0_i32 = arith.constant 0 : i32
    %68 = arith.cmpi eq, %arg1, %c0_i32 : i32
    %69 = arith.extui %68 : i1 to i32
    %c0_i32_75 = arith.constant 0 : i32
    %70 = arith.cmpi ne, %69, %c0_i32_75 : i32
    scf.if %70 {
      %cst_146 = arith.constant 0.000000e+00 : f32
      %135 = vector.broadcast %cst_146 : f32 to vector<10x128xf32>
      %c0_147 = arith.constant 0 : index
      %c0_148 = arith.constant 0 : index
      %136 = vector.load %arg9[%c0_147, %c0_148] : memref<70x128xf32, #tpu.memory_space<vmem>>, vector<10x128xf32>
      tpu.vector_store %arg9[%c0_147, %c0_148], %135 {strides = array<i32>} : memref<70x128xf32, #tpu.memory_space<vmem>>, vector<10x128xf32>,
    } else {
    }
    %c1_i32 = arith.constant 1 : i32
    %71 = arith.cmpi eq, %arg1, %c1_i32 : i32
    %72 = arith.extui %71 : i1 to i32
    %c0_i32_76 = arith.constant 0 : i32
    %73 = arith.cmpi ne, %72, %c0_i32_76 : i32
    scf.if %73 {
      %cst_146 = arith.constant 0.000000e+00 : f32
      %135 = vector.broadcast %cst_146 : f32 to vector<10x128xf32>
      %c50 = arith.constant 50 : index
      %c0_147 = arith.constant 0 : index
      %136 = vector.load %arg9[%c50, %c0_147] : memref<70x128xf32, #tpu.memory_space<vmem>>, vector<10x128xf32>
      tpu.vector_store %arg9[%c50, %c0_147], %135 {strides = array<i32>} : memref<70x128xf32, #tpu.memory_space<vmem>>, vector<10x128xf32>,
    } else {
    }
    %cst_77 = arith.constant 0.000000e+00 : f32
    %74 = vector.broadcast %cst_77 : f32 to vector<40x128xf32>
    %c0_78 = arith.constant 0 : index
    %c0_79 = arith.constant 0 : index
    %75 = vector.load %arg9[%c0_78, %c0_79] : memref<70x128xf32, #tpu.memory_space<vmem>>, vector<40x128xf32>
    %76 = arith.truncf %75 : vector<40x128xf32> to vector<40x128xbf16>
    %c0_80 = arith.constant 0 : index
    %c0_81 = arith.constant 0 : index
    %c0_82 = arith.constant 0 : index
    %c0_83 = arith.constant 0 : index
    %77 = vector.load %arg5[%c0_80, %c0_81, %c0_82, %c0_83] : memref<3x3x128x128xbf16, #tpu.memory_space<vmem>>, vector<1x1x128x128xbf16>
    %78 = vector.shape_cast %77 : vector<1x1x128x128xbf16> to vector<128x128xbf16>
    %cst_84 = arith.constant dense<0.000000e+00> : vector<40x128xf32>
    %79 = tpu.matmul %76, %78, %cst_84 {dimension_numbers = #tpu.dot_dimension_numbers<[1], [0], [0], [1], [0, 0, 1, 1], [], []>} : vector<40x128xbf16>, vector<128x128xbf16>, vector<40x128xf32> -> vector<40x128xf32>
    %80 = arith.addf %74, %79 : vector<40x128xf32>
    %c1_85 = arith.constant 1 : index
    %c0_86 = arith.constant 0 : index
    %81 = vector.load %arg9[%c1_85, %c0_86] : memref<70x128xf32, #tpu.memory_space<vmem>>, vector<40x128xf32>
    %82 = arith.truncf %81 : vector<40x128xf32> to vector<40x128xbf16>
    %c0_87 = arith.constant 0 : index
    %c1_88 = arith.constant 1 : index
    %c0_89 = arith.constant 0 : index
    %c0_90 = arith.constant 0 : index
    %83 = vector.load %arg5[%c0_87, %c1_88, %c0_89, %c0_90] : memref<3x3x128x128xbf16, #tpu.memory_space<vmem>>, vector<1x1x128x128xbf16>
    %84 = vector.shape_cast %83 : vector<1x1x128x128xbf16> to vector<128x128xbf16>
    %cst_91 = arith.constant dense<0.000000e+00> : vector<40x128xf32>
    %85 = tpu.matmul %82, %84, %cst_91 {dimension_numbers = #tpu.dot_dimension_numbers<[1], [0], [0], [1], [0, 0, 1, 1], [], []>} : vector<40x128xbf16>, vector<128x128xbf16>, vector<40x128xf32> -> vector<40x128xf32>
    %86 = arith.addf %80, %85 : vector<40x128xf32>
    %c2_92 = arith.constant 2 : index
    %c0_93 = arith.constant 0 : index
    %87 = vector.load %arg9[%c2_92, %c0_93] : memref<70x128xf32, #tpu.memory_space<vmem>>, vector<40x128xf32>
    %88 = arith.truncf %87 : vector<40x128xf32> to vector<40x128xbf16>
    %c0_94 = arith.constant 0 : index
    %c2_95 = arith.constant 2 : index
    %c0_96 = arith.constant 0 : index
    %c0_97 = arith.constant 0 : index
    %89 = vector.load %arg5[%c0_94, %c2_95, %c0_96, %c0_97] : memref<3x3x128x128xbf16, #tpu.memory_space<vmem>>, vector<1x1x128x128xbf16>
    %90 = vector.shape_cast %89 : vector<1x1x128x128xbf16> to vector<128x128xbf16>
    %cst_98 = arith.constant dense<0.000000e+00> : vector<40x128xf32>
    %91 = tpu.matmul %88, %90, %cst_98 {dimension_numbers = #tpu.dot_dimension_numbers<[1], [0], [0], [1], [0, 0, 1, 1], [], []>} : vector<40x128xbf16>, vector<128x128xbf16>, vector<40x128xf32> -> vector<40x128xf32>
    %92 = arith.addf %86, %91 : vector<40x128xf32>
    %c10_99 = arith.constant 10 : index
    %c0_100 = arith.constant 0 : index
    %93 = vector.load %arg9[%c10_99, %c0_100] : memref<70x128xf32, #tpu.memory_space<vmem>>, vector<40x128xf32>
    %94 = arith.truncf %93 : vector<40x128xf32> to vector<40x128xbf16>
    %c1_101 = arith.constant 1 : index
    %c0_102 = arith.constant 0 : index
    %c0_103 = arith.constant 0 : index
    %c0_104 = arith.constant 0 : index
    %95 = vector.load %arg5[%c1_101, %c0_102, %c0_103, %c0_104] : memref<3x3x128x128xbf16, #tpu.memory_space<vmem>>, vector<1x1x128x128xbf16>
    %96 = vector.shape_cast %95 : vector<1x1x128x128xbf16> to vector<128x128xbf16>
    %cst_105 = arith.constant dense<0.000000e+00> : vector<40x128xf32>
    %97 = tpu.matmul %94, %96, %cst_105 {dimension_numbers = #tpu.dot_dimension_numbers<[1], [0], [0], [1], [0, 0, 1, 1], [], []>} : vector<40x128xbf16>, vector<128x128xbf16>, vector<40x128xf32> -> vector<40x128xf32>
    %98 = arith.addf %92, %97 : vector<40x128xf32>
    %c11_106 = arith.constant 11 : index
    %c0_107 = arith.constant 0 : index
    %99 = vector.load %arg9[%c11_106, %c0_107] : memref<70x128xf32, #tpu.memory_space<vmem>>, vector<40x128xf32>
    %100 = arith.truncf %99 : vector<40x128xf32> to vector<40x128xbf16>
    %c1_108 = arith.constant 1 : index
    %c1_109 = arith.constant 1 : index
    %c0_110 = arith.constant 0 : index
    %c0_111 = arith.constant 0 : index
    %101 = vector.load %arg5[%c1_108, %c1_109, %c0_110, %c0_111] : memref<3x3x128x128xbf16, #tpu.memory_space<vmem>>, vector<1x1x128x128xbf16>
    %102 = vector.shape_cast %101 : vector<1x1x128x128xbf16> to vector<128x128xbf16>
    %cst_112 = arith.constant dense<0.000000e+00> : vector<40x128xf32>
    %103 = tpu.matmul %100, %102, %cst_112 {dimension_numbers = #tpu.dot_dimension_numbers<[1], [0], [0], [1], [0, 0, 1, 1], [], []>} : vector<40x128xbf16>, vector<128x128xbf16>, vector<40x128xf32> -> vector<40x128xf32>
    %104 = arith.addf %98, %103 : vector<40x128xf32>
    %c12_113 = arith.constant 12 : index
    %c0_114 = arith.constant 0 : index
    %105 = vector.load %arg9[%c12_113, %c0_114] : memref<70x128xf32, #tpu.memory_space<vmem>>, vector<40x128xf32>
    %106 = arith.truncf %105 : vector<40x128xf32> to vector<40x128xbf16>
    %c1_115 = arith.constant 1 : index
    %c2_116 = arith.constant 2 : index
    %c0_117 = arith.constant 0 : index
    %c0_118 = arith.constant 0 : index
    %107 = vector.load %arg5[%c1_115, %c2_116, %c0_117, %c0_118] : memref<3x3x128x128xbf16, #tpu.memory_space<vmem>>, vector<1x1x128x128xbf16>
    %108 = vector.shape_cast %107 : vector<1x1x128x128xbf16> to vector<128x128xbf16>
    %cst_119 = arith.constant dense<0.000000e+00> : vector<40x128xf32>
    %109 = tpu.matmul %106, %108, %cst_119 {dimension_numbers = #tpu.dot_dimension_numbers<[1], [0], [0], [1], [0, 0, 1, 1], [], []>} : vector<40x128xbf16>, vector<128x128xbf16>, vector<40x128xf32> -> vector<40x128xf32>
    %110 = arith.addf %104, %109 : vector<40x128xf32>
    %c20_120 = arith.constant 20 : index
    %c0_121 = arith.constant 0 : index
    %111 = vector.load %arg9[%c20_120, %c0_121] : memref<70x128xf32, #tpu.memory_space<vmem>>, vector<40x128xf32>
    %112 = arith.truncf %111 : vector<40x128xf32> to vector<40x128xbf16>
    %c2_122 = arith.constant 2 : index
    %c0_123 = arith.constant 0 : index
    %c0_124 = arith.constant 0 : index
    %c0_125 = arith.constant 0 : index
    %113 = vector.load %arg5[%c2_122, %c0_123, %c0_124, %c0_125] : memref<3x3x128x128xbf16, #tpu.memory_space<vmem>>, vector<1x1x128x128xbf16>
    %114 = vector.shape_cast %113 : vector<1x1x128x128xbf16> to vector<128x128xbf16>
    %cst_126 = arith.constant dense<0.000000e+00> : vector<40x128xf32>
    %115 = tpu.matmul %112, %114, %cst_126 {dimension_numbers = #tpu.dot_dimension_numbers<[1], [0], [0], [1], [0, 0, 1, 1], [], []>} : vector<40x128xbf16>, vector<128x128xbf16>, vector<40x128xf32> -> vector<40x128xf32>
    %116 = arith.addf %110, %115 : vector<40x128xf32>
    %c21_127 = arith.constant 21 : index
    %c0_128 = arith.constant 0 : index
    %117 = vector.load %arg9[%c21_127, %c0_128] : memref<70x128xf32, #tpu.memory_space<vmem>>, vector<40x128xf32>
    %118 = arith.truncf %117 : vector<40x128xf32> to vector<40x128xbf16>
    %c2_129 = arith.constant 2 : index
    %c1_130 = arith.constant 1 : index
    %c0_131 = arith.constant 0 : index
    %c0_132 = arith.constant 0 : index
    %119 = vector.load %arg5[%c2_129, %c1_130, %c0_131, %c0_132] : memref<3x3x128x128xbf16, #tpu.memory_space<vmem>>, vector<1x1x128x128xbf16>
    %120 = vector.shape_cast %119 : vector<1x1x128x128xbf16> to vector<128x128xbf16>
    %cst_133 = arith.constant dense<0.000000e+00> : vector<40x128xf32>
    %121 = tpu.matmul %118, %120, %cst_133 {dimension_numbers = #tpu.dot_dimension_numbers<[1], [0], [0], [1], [0, 0, 1, 1], [], []>} : vector<40x128xbf16>, vector<128x128xbf16>, vector<40x128xf32> -> vector<40x128xf32>
    %122 = arith.addf %116, %121 : vector<40x128xf32>
    %c22_134 = arith.constant 22 : index
    %c0_135 = arith.constant 0 : index
    %123 = vector.load %arg9[%c22_134, %c0_135] : memref<70x128xf32, #tpu.memory_space<vmem>>, vector<40x128xf32>
    %124 = arith.truncf %123 : vector<40x128xf32> to vector<40x128xbf16>
    %c2_136 = arith.constant 2 : index
    %c2_137 = arith.constant 2 : index
    %c0_138 = arith.constant 0 : index
    %c0_139 = arith.constant 0 : index
    %125 = vector.load %arg5[%c2_136, %c2_137, %c0_138, %c0_139] : memref<3x3x128x128xbf16, #tpu.memory_space<vmem>>, vector<1x1x128x128xbf16>
    %126 = vector.shape_cast %125 : vector<1x1x128x128xbf16> to vector<128x128xbf16>
    %cst_140 = arith.constant dense<0.000000e+00> : vector<40x128xf32>
    %127 = tpu.matmul %124, %126, %cst_140 {dimension_numbers = #tpu.dot_dimension_numbers<[1], [0], [0], [1], [0, 0, 1, 1], [], []>} : vector<40x128xbf16>, vector<128x128xbf16>, vector<40x128xf32> -> vector<40x128xf32>
    %128 = arith.addf %122, %127 : vector<40x128xf32>
    %c0_141 = arith.constant 0 : index
    %c0_142 = arith.constant 0 : index
    %129 = vector.load %arg6[%c0_141, %c0_142] : memref<1x128xf32, #tpu.memory_space<vmem>>, vector<1x128xf32>
    %130 = vector.broadcast %129 : vector<1x128xf32> to vector<40x128xf32>
    %131 = arith.addf %128, %130 : vector<40x128xf32>
    %c0_143 = arith.constant 0 : index
    %c0_144 = arith.constant 0 : index
    %c0_145 = arith.constant 0 : index
    %132 = vector.load %arg8[%c0_143, %c0_144, %c0_145] : memref<1x40x128xf32, #tpu.memory_space<vmem>>, vector<1x40x128xf32>
    %133 = vector.shape_cast %132 : vector<1x40x128xf32> to vector<40x128xf32>
    %134 = vector.shape_cast %131 : vector<40x128xf32> to vector<1x40x128xf32>
    tpu.vector_store %arg8[%c0_143, %c0_144, %c0_145], %134 {strides = array<i32>} : memref<1x40x128xf32, #tpu.memory_space<vmem>>, vector<1x40x128xf32>,
    return
  }
  func.func @transform_0(%arg0: i32, %arg1: i32) -> (i32, i32, i32) {
    %c2_i32 = arith.constant 2 : i32
    %0 = arith.muli %arg0, %c2_i32 : i32
    %1 = arith.addi %0, %arg1 : i32
    %c0_i32 = arith.constant 0 : i32
    %c0_i32_0 = arith.constant 0 : i32
    %c0_i32_1 = arith.constant 0 : i32
    return %1, %c0_i32, %c0_i32_0 : i32, i32, i32
  }
  func.func @transform_1(%arg0: i32, %arg1: i32) -> (i32, i32, i32, i32) {
    %c0_i32 = arith.constant 0 : i32
    %c0_i32_0 = arith.constant 0 : i32
    %c0_i32_1 = arith.constant 0 : i32
    %c0_i32_2 = arith.constant 0 : i32
    %c0_i32_3 = arith.constant 0 : i32
    return %c0_i32, %c0_i32_0, %c0_i32_1, %c0_i32_2 : i32, i32, i32, i32
  }
  func.func @transform_2(%arg0: i32, %arg1: i32) -> (i32, i32) {
    %c0_i32 = arith.constant 0 : i32
    %c0_i32_0 = arith.constant 0 : i32
    %c0_i32_1 = arith.constant 0 : i32
    return %c0_i32, %c0_i32_0 : i32, i32
  }
  func.func @transform_3(%arg0: i32, %arg1: i32) -> (i32, i32, i32, i32) {
    %c0_i32 = arith.constant 0 : i32
    %c0_i32_0 = arith.constant 0 : i32
    %c0_i32_1 = arith.constant 0 : i32
    %c0_i32_2 = arith.constant 0 : i32
    %c0_i32_3 = arith.constant 0 : i32
    return %c0_i32, %c0_i32_0, %c0_i32_1, %c0_i32_2 : i32, i32, i32, i32
  }
  func.func @transform_4(%arg0: i32, %arg1: i32) -> (i32, i32) {
    %c0_i32 = arith.constant 0 : i32
    %c0_i32_0 = arith.constant 0 : i32
    %c0_i32_1 = arith.constant 0 : i32
    return %c0_i32, %c0_i32_0 : i32, i32
  }
  func.func @transform_5(%arg0: i32, %arg1: i32) -> (i32, i32) {
    %c0_i32 = arith.constant 0 : i32
    %c0_i32_0 = arith.constant 0 : i32
    %c0_i32_1 = arith.constant 0 : i32
    return %c0_i32, %c0_i32_0 : i32, i32
  }
  func.func @transform_6(%arg0: i32, %arg1: i32) -> (i32, i32, i32) {
    %c2_i32 = arith.constant 2 : i32
    %0 = arith.muli %arg0, %c2_i32 : i32
    %1 = arith.addi %0, %arg1 : i32
    %c0_i32 = arith.constant 0 : i32
    %c0_i32_0 = arith.constant 0 : i32
    %c0_i32_1 = arith.constant 0 : i32
    return %1, %c0_i32, %c0_i32_0 : i32, i32, i32
  }
}

</mosaic_0001>

<bundles_post_ra>
// kernel: vgg_features_forward.2
= control target key start
LH: loop header
LB: loop body
LE: loop exit
PB: predicated region body
PF: predicated region fallthrough
CT: control target
= control target key end

     0   :  { %s4643_s21 = smov 0   ;;  %s4645_s22 = smov 0   ;;  %s5617_s0 = inlined_call_operand.vmem [shape: bf16[4,180,27], index: 0, kind: input, shape index: {}]   ;;  %s5618_s1 = inlined_call_operand.vmem [shape: bf16[27,64], index: 1, kind: input, shape index: {}]   ;;  %s5619_s2 = inlined_call_operand.vmem [shape: f32[1,64], index: 2, kind: input, shape index: {}]   ;;  %s5620_s3 = inlined_call_operand.vmem [shape: bf16[3,3,64,64], index: 3, kind: input, shape index: {}]   ;;  %s5621_s4 = inlined_call_operand.vmem [shape: f32[1,64], index: 4, kind: input, shape index: {}]   ;;  %s5622_s5 = inlined_call_operand.vmem [shape: f32[180,1], index: 5, kind: input, shape index: {}]   ;;  %s5623_s6 = inlined_call_operand.vmem [shape: bf16[4,4,8,64], index: 6, kind: output, shape index: {}]  }
   0x1   :  { %s4647_s23 = smov 0   ;;  %s4649_s24 = smov 0  }
   0x2   :  { %s4651_s25 = smov 0  }
   0x3 LB: > { %s25_s26 = sadd.s32 1, %s4591_s23  ;;  %s28_s27 = sadd.s32 1, %s4595_s24  ;;  %s4599_s25 = sphi %s4651_s25, %s16_s25   ;;  %s4595_s24 = sphi %s4649_s24, %s5627_s24   ;;  %s4591_s23 = sphi %s4647_s23, %s5626_s23   ;;  %s4587_s22 = sphi %s4645_s22, %s5625_s22   ;;  %s4583_s21 = sphi %s4643_s21, %s5624_s21  }
   0x4   : > { %p26_p0 = scmp.ge.s32.totalorder %s25_s26, 2  ;;  %p3582_p1 = scmp.ge.s32.totalorder %s4599_s25, 1 }
   0x5   : > { %p236_p2 = scmp.lt.s32.totalorder %s4599_s25, 5 }
   0x6   : > { %s5629_s26 = smov (%p26_p0, %s25_s26), 0  ;;  %s5631_s27 = smov (!%p26_p0, %s28_s27), %s4595_s24 }
   0x7   : > { %p237_p3 = pnand %p3582_p1, %p236_p2  ;;  %p30_p4 = scmp.ge.s32.totalorder %s5631_s27, 2 }
   0x8   : > { %v4511_v0 = vld [vmem:[%s5618_s1] sm:$0xff] (!%p237_p3)   ;;  %vm429_vm0 = vcmask (!%p237_p3), 1044480   ;;  %v4512_v1 = vld [vmem:[%s5618_s1 + $0x8] sm:$0x3f] (!%p237_p3)   ;;  %vm430_vm1 = vcmask (!%p237_p3), 1045504   ;;  %s3583_s8 = sshll.u32 (!%p237_p3), %s4587_s22, 1 }
   0x9   : > { %s5633_s27 = smov (%p30_p4, %s5631_s27), 0  ;;  %240 = sbr.rel (%p237_p3) target bundleno = 903 (0x387), region = 44 }
   0xa   : > { %4029 = vmatprep.subr.bf16.mxu0 (!%p237_p3), %v4511_v0  ;;  %v587_v2 = vld [vmem:[%s5622_s5] sm:$0xff] (!%p237_p3)  ;;  %v4601_v3 = vmov (!%p237_p3), 65535   ;;  %s271_s11 = sadd.s32 (!%p237_p3), %s4583_s21, %s3583_s8  ;;  %v4602_v5 = vmov (!%p237_p3), 0   ;;  %v589_v6 = vld [vmem:[%s5622_s5 + $0x10] sm:$0xff] (!%p237_p3)  ;;  %v588_v9 = vld [vmem:[%s5622_s5 + $0x8] sm:$0xff] (!%p237_p3)  ;;  %vm392_vm2 = vcmask (!%p237_p3), 220160  }
   0xb   : > { %4030 = vmatpush3.bf16.msra.mxu0 (!%p237_p3), %v4511_v0  ;;  %v431_v4 = vsel (!%p237_p3), %vm429_vm0, 4294967295, %v4601_v3  ;;  %4509 = vset.pattern.permute.xlu0 (!%p237_p3), %v4602_v5  ;;  %p272_p5 = scmp.lt.s32.totalorder (!%p237_p3), %s271_s11, 3  ;;  %v590_v10 = vld [vmem:[%s5622_s5 + $0x18] sm:$0xff] (!%p237_p3)  ;;  %v591_v11 = vld [vmem:[%s5622_s5 + $0x20] sm:$0xff] (!%p237_p3)  ;;  %v592_v12 = vld [vmem:[%s5622_s5 + $0x28] sm:$0xff] (!%p237_p3)  ;;  %vm748_vm3 = vcmask (!%p237_p3), 523264  }
   0xc   : > { %v432_v7 = vsel (!%p237_p3), %vm430_vm1, %v431_v4, 0  ;;  %612 = vperm.xlu0 (!%p237_p3), %4509, %v587_v2   ;;  %4510 = vset.pattern.permute.xlu1 (!%p237_p3), %v4602_v5  ;;  %v593_v14 = vld [vmem:[%s5622_s5 + $0x30] sm:$0xff] (!%p237_p3)  ;;  %v594_v17 = vld [vmem:[%s5622_s5 + $0x38] sm:$0xff] (!%p237_p3)  ;;  %v595_v18 = vld [vmem:[%s5622_s5 + $0x40] sm:$0xff] (!%p237_p3)  ;;  %vm773_vm4 = vcmask (!%p237_p3), 516096   ;;  %v4603_v42 = vmov (!%p237_p3), 0.0  }
   0xd   : > { %v434_v8 = vand.u32 (!%p237_p3), %v4512_v1, %v432_v7  ;;  %622 = vperm.xlu1 (!%p237_p3), %4510, %v589_v6   ;;  %v596_v19 = vld [vmem:[%s5622_s5 + $0x48] sm:$0xff] (!%p237_p3)  ;;  %v597_v22 = vld [vmem:[%s5622_s5 + $0x50] sm:$0xff] (!%p237_p3)  ;;  %v598_v23 = vld [vmem:[%s5622_s5 + $0x58] sm:$0xff] (!%p237_p3)  ;;  %774 = vst.msk [vmem:[#allocation2] sm:$0x1] (!%p237_p3), %vm773_vm4, %v4603_v42  ;;  %vm771_vm5 = vcmask (!%p237_p3), 519168  }
   0xe   : > { %v599_v24 = vld [vmem:[%s5622_s5 + $0x60] sm:$0xff] (!%p237_p3)  ;;  %v600_v26 = vld [vmem:[%s5622_s5 + $0x68] sm:$0xff] (!%p237_p3)  ;;  %v601_v28 = vld [vmem:[%s5622_s5 + $0x70] sm:$0xff] (!%p237_p3)  ;;  %775 = vst.msk [vmem:[#allocation2 + $0xb5] sm:$0xff] (!%p237_p3), %vm748_vm3, %v4603_v42  ;;  %p3615_p6 = scmp.ne.s32.totalorder (!%p237_p3), %s4583_s21, 0 }
   0xf   : > { %4031 = vmatprep.subr.bf16.mxu0 (!%p237_p3), %v434_v8  ;;  %v602_v29 = vld [vmem:[%s5622_s5 + $0x78] sm:$0xff] (!%p237_p3)  ;;  %v603_v30 = vld [vmem:[%s5622_s5 + $0x80] sm:$0xff] (!%p237_p3)  ;;  %v604_v32 = vld [vmem:[%s5622_s5 + $0x88] sm:$0xff] (!%p237_p3) }
  0x10   : > { %s5635_s11 = smov (!%p272_p5, %s271_s11), 3  ;;  %4032 = vmatpush3.bf16.msra.mxu0 %v434_v8  ;;  %617 = vperm.xlu0 %4509, %v588_v9   ;;  %v605_v34 = vld [vmem:[%s5622_s5 + $0x90] sm:$0xff]  ;;  %v606_v35 = vld [vmem:[%s5622_s5 + $0x98] sm:$0xff]  ;;  %v607_v36 = vld [vmem:[%s5622_s5 + $0xa0] sm:$0xff]  ;;  %vm784_vm6 = vcmask (!%p3615_p6), 517120  }
  0x11   : > { %s4461_s18 = smul.u32 92, %s5635_s11  ;;  %s3865_s19 = sshll.u32 %s5635_s11, 4  ;;  %627 = vperm.xlu1 %4510, %v590_v10   ;;  %v608_v38 = vld [vmem:[%s5622_s5 + $0xa8] sm:$0xff]  ;;  %v609_v40 = vld [vmem:[%s5622_s5 + $0xb0] sm:$0xf] }
  0x12   : > { %s4697_s28 = scalar_lea.vmem %s5623_s6, %s3865_s19  ;;  %v4791_v50 = vld [vmem:[%s5619_s2] ss:$0 sm:$0xff] }
  0x13   : > { %s4705_s9 = scalar_lea.vmem %s5617_s0, %s4461_s18 }
  0x14   : > { %v4513_v13 = vld [vmem:[%s4705_s9] sm:$0xff]   ;;  %v4514_v15 = vld [vmem:[%s4705_s9 + $0x8] sm:$0xff]   ;;  %632 = vperm.xlu0 %4509, %v591_v11   ;;  %v4515_v16 = vld [vmem:[%s4705_s9 + $0x10] sm:$0xff]  }
  0x15   : > { %4033 = vmatprep.mubr.msk.bf16.mxu0 %vm392_vm2, %v4513_v13  ;;  %637 = vperm.xlu1 %4510, %v592_v12   ;;  %v4516_v20 = vld [vmem:[%s4705_s9 + $0x18] sm:$0xff]   ;;  %v4517_v21 = vld [vmem:[%s4705_s9 + $0x20] sm:$0xff]   ;;  %v4518_v25 = vld [vmem:[%s4705_s9 + $0x28] sm:$0xff]  }
  0x16   : > { %4034 = vmatmul.mubr.msk.bf16.vlgmr.msra.gmra.mrb[0].mxu0 %vm392_vm2, %v4514_v15  ;;  %v4519_v27 = vld [vmem:[%s4705_s9 + $0x30] sm:$0xff]   ;;  %v4520_v31 = vld [vmem:[%s4705_s9 + $0x38] sm:$0xff]   ;;  %v4521_v33 = vld [vmem:[%s4705_s9 + $0x40] sm:$0xff]  }
  0x17   : > { %4037 = vmatprep.mubr.msk.bf16.mxu0 %vm392_vm2, %v4515_v16  ;;  %v4522_v37 = vld [vmem:[%s4705_s9 + $0x48] sm:$0xff]   ;;  %v4523_v39 = vld [vmem:[%s4705_s9 + $0x50] sm:$0xff]   ;;  %v4524_v41 = vld [vmem:[%s4705_s9 + $0x58] ss:$0 sps:$4 sm:$0x33]  }
  0x18   : > { %642 = vperm.xlu0 %4509, %v593_v14  }
  0x19   : > { %647 = vperm.xlu1 %4510, %v594_v17  }
  0x1c   : > { %652 = vperm.xlu0 %4509, %v595_v18  }
  0x1d   : > { %657 = vperm.xlu1 %4510, %v596_v19  }
  0x1e   : > { %4038 = vmatmul.mubr.msk.bf16.gmra.mrb[4].mxu0 %vm392_vm2, %v4516_v20 }
  0x1f   : > { %4041 = vmatprep.mubr.msk.bf16.mxu0 %vm392_vm2, %v4517_v21 }
  0x20   : > { %662 = vperm.xlu0 %4509, %v597_v22  }
  0x21   : > { %667 = vperm.xlu1 %4510, %v598_v23  }
  0x24   : > { %672 = vperm.xlu0 %4509, %v599_v24  }
  0x25   : > { %677 = vperm.xlu1 %4510, %v600_v26  }
  0x26   : > { %4042 = vmatmul.mubr.msk.bf16.gmra.mrb[8].mxu0 %vm392_vm2, %v4518_v25 }
  0x27   : > { %4045 = vmatprep.mubr.msk.bf16.mxu0 %vm392_vm2, %v4519_v27 }
  0x28   : > { %682 = vperm.xlu0 %4509, %v601_v28  }
  0x29   : > { %687 = vperm.xlu1 %4510, %v602_v29  }
  0x2c   : > { %692 = vperm.xlu0 %4509, %v603_v30  }
  0x2d   : > { %697 = vperm.xlu1 %4510, %v604_v32  }
  0x2e   : > { %4046 = vmatmul.mubr.msk.bf16.gmra.mrb[12].mxu0 %vm392_vm2, %v4520_v31 }
  0x2f   : > { %4049 = vmatprep.mubr.msk.bf16.mxu0 %vm392_vm2, %v4521_v33 }
  0x30   : > { %702 = vperm.xlu0 %4509, %v605_v34  }
  0x31   : > { %707 = vperm.xlu1 %4510, %v606_v35  }
  0x34   : > { %712 = vperm.xlu0 %4509, %v607_v36  }
  0x35   : > { %717 = vperm.xlu1 %4510, %v608_v38  }
  0x36   : > { %4050 = vmatmul.mubr.msk.bf16.gmra.mrb[16].mxu0 %vm392_vm2, %v4522_v37 }
  0x37   : > { %4053 = vmatprep.mubr.msk.bf16.mxu0 %vm392_vm2, %v4523_v39 }
  0x38   : > { %722 = vperm.xlu0 %4509, %v609_v40  }
  0x3e   : > { %4054 = vmatmul.mubr.msk.bf16.gmra.mrb[20].mxu0 %vm392_vm2, %v4524_v41 }
  0x8b   : > { %v613_v43 = vpop.permute.xlu0 %612 }
  0x8c   : > { %v623_v44 = vpop.permute.xlu1 %622 }
  0x8f   : > { %v618_v45 = vpop.permute.xlu0 %617 }
  0x90   : > { %v628_v46 = vpop.permute.xlu1 %627 }
  0x93   : > { %v633_v47 = vpop.permute.xlu0 %632 }
  0x94   : > { %v638_v48 = vpop.permute.xlu1 %637 }
  0x97   : > { %v643_v49 = vpop.permute.xlu0 %642 }
  0x98   : > { %v648_v52 = vpop.permute.xlu1 %647 }
  0x9b   : > { %v653_v55 = vpop.permute.xlu0 %652 }
  0x9c   : > { %v658_v3 = vpop.permute.xlu1 %657 }
  0x9f   : > { %v663_v5 = vpop.permute.xlu0 %662 }
  0xa0   : > { %v668_v17 = vpop.permute.xlu1 %667 }
  0xa3   : > { %v673_v20 = vpop.permute.xlu0 %672 }
  0xa4   : > { %v678_v30 = vpop.permute.xlu1 %677 }
  0xa7   : > { %v683_v34 = vpop.permute.xlu0 %682 }
  0xe9   : > { %v4035_v51 = vpop.f32.mrb[0].mxu0 }
  0xea   : > { %v479_v53 = vadd.f32 %v4035_v51, %v4791_v50  ;;  %v470_v54 = vpop.f32.mrb[1].mxu0 }
  0xeb   : > { %v471_v56 = vadd.f32 %v4791_v50, %v470_v54  ;;  %v4036_v57 = vpop.f32.mrb[2].mxu0 }
  0xec   : > { %v566_v58 = vmax.f32 %v479_v53, 0.0  ;;  %v482_v59 = vadd.f32 %v4036_v57, %v4791_v50  ;;  %v473_v60 = vpop.f32.mrb[3].mxu0 }
  0xed   : > { %v564_v61 = vmax.f32 %v471_v56, 0.0  ;;  %v474_v62 = vadd.f32 %v4791_v50, %v473_v60 }
  0xee   : > { %v727_v63 = vmul.f32 %v623_v44, %v566_v58  ;;  %v567_v0 = vmax.f32 %v482_v59, 0.0 }
  0xef   : > { %v725_v1 = vmul.f32 %v613_v43, %v564_v61  ;;  %v565_v2 = vmax.f32 %v474_v62, 0.0 }
  0xf0   : > { %751 = vst.msk [vmem:[#allocation2 + $0x11] sm:$0xff] %vm748_vm3, %v727_v63  ;;  %v728_v4 = vmul.f32 %v628_v46, %v567_v0 }
  0xf1   : > { %749 = vst.msk [vmem:[#allocation2 + $0x1] sm:$0xff] %vm748_vm3, %v725_v1  ;;  %v726_v6 = vmul.f32 %v618_v45, %v565_v2  ;;  %v4039_v7 = vpop.f32.mrb[4].mxu0  ;;  %v688_v45 = vpop.permute.xlu1 %687 }
  0xf2   : > { %752 = vst.msk [vmem:[#allocation2 + $0x19] sm:$0xff] %vm748_vm3, %v728_v4  ;;  %v495_v8 = vadd.f32 %v4039_v7, %v4791_v50  ;;  %v486_v9 = vpop.f32.mrb[5].mxu0 }
  0xf3   : > { %750 = vst.msk [vmem:[#allocation2 + $0x9] sm:$0xff] %vm748_vm3, %v726_v6  ;;  %v487_v10 = vadd.f32 %v4791_v50, %v486_v9  ;;  %v4040_v11 = vpop.f32.mrb[6].mxu0 }
  0xf4   : > { %v570_v12 = vmax.f32 %v495_v8, 0.0  ;;  %v498_v13 = vadd.f32 %v4040_v11, %v4791_v50  ;;  %v489_v14 = vpop.f32.mrb[7].mxu0 }
  0xf5   : > { %v568_v15 = vmax.f32 %v487_v10, 0.0  ;;  %v490_v16 = vadd.f32 %v4791_v50, %v489_v14  ;;  %v698_v61 = vpop.permute.xlu1 %697 }
  0xf6   : > { %v731_v18 = vmul.f32 %v643_v49, %v570_v12  ;;  %v571_v19 = vmax.f32 %v498_v13, 0.0 }
  0xf7   : > { %v729_v21 = vmul.f32 %v633_v47, %v568_v15  ;;  %v569_v22 = vmax.f32 %v490_v16, 0.0 }
  0xf8   : > { %755 = vst.msk [vmem:[#allocation2 + $0x31] sm:$0xff] %vm748_vm3, %v731_v18  ;;  %v732_v23 = vmul.f32 %v648_v52, %v571_v19 }
  0xf9   : > { %753 = vst.msk [vmem:[#allocation2 + $0x21] sm:$0xff] %vm748_vm3, %v729_v21  ;;  %v730_v24 = vmul.f32 %v638_v48, %v569_v22  ;;  %v4043_v25 = vpop.f32.mrb[8].mxu0  ;;  %v693_v48 = vpop.permute.xlu0 %692 }
  0xfa   : > { %756 = vst.msk [vmem:[#allocation2 + $0x39] sm:$0xff] %vm748_vm3, %v732_v23  ;;  %v511_v26 = vadd.f32 %v4043_v25, %v4791_v50  ;;  %v502_v27 = vpop.f32.mrb[9].mxu0  ;;  %v708_v14 = vpop.permute.xlu1 %707 }
  0xfb   : > { %754 = vst.msk [vmem:[#allocation2 + $0x29] sm:$0xff] %vm748_vm3, %v730_v24  ;;  %v503_v28 = vadd.f32 %v4791_v50, %v502_v27  ;;  %v4044_v29 = vpop.f32.mrb[10].mxu0 }
  0xfc   : > { %v574_v31 = vmax.f32 %v511_v26, 0.0  ;;  %v514_v32 = vadd.f32 %v4044_v29, %v4791_v50  ;;  %v505_v33 = vpop.f32.mrb[11].mxu0 }
  0xfd   : > { %v572_v35 = vmax.f32 %v503_v28, 0.0  ;;  %v506_v36 = vadd.f32 %v4791_v50, %v505_v33  ;;  %v703_v63 = vpop.permute.xlu0 %702 }
  0xfe   : > { %v735_v37 = vmul.f32 %v663_v5, %v574_v31  ;;  %v575_v38 = vmax.f32 %v514_v32, 0.0  ;;  %v718_v32 = vpop.permute.xlu1 %717 }
  0xff   : > { %v733_v39 = vmul.f32 %v653_v55, %v572_v35  ;;  %v573_v40 = vmax.f32 %v506_v36, 0.0 }
 0x100   : > { %759 = vst.msk [vmem:[#allocation2 + $0x51] sm:$0xff] %vm748_vm3, %v735_v37  ;;  %v736_v41 = vmul.f32 %v668_v17, %v575_v38 }
 0x101   : > { %757 = vst.msk [vmem:[#allocation2 + $0x41] sm:$0xff] %vm748_vm3, %v733_v39  ;;  %v734_v43 = vmul.f32 %v658_v3, %v573_v40  ;;  %v4047_v44 = vpop.f32.mrb[12].mxu0  ;;  %v713_v13 = vpop.permute.xlu0 %712 }
 0x102   : > { %760 = vst.msk [vmem:[#allocation2 + $0x59] sm:$0xff] %vm748_vm3, %v736_v41  ;;  %v527_v46 = vadd.f32 %v4047_v44, %v4791_v50  ;;  %v518_v47 = vpop.f32.mrb[13].mxu0 }
 0x103   : > { %758 = vst.msk [vmem:[#allocation2 + $0x49] sm:$0xff] %vm748_vm3, %v734_v43  ;;  %v519_v49 = vadd.f32 %v4791_v50, %v518_v47  ;;  %v4048_v51 = vpop.f32.mrb[14].mxu0 }
 0x104   : > { %v578_v52 = vmax.f32 %v527_v46, 0.0  ;;  %v530_v53 = vadd.f32 %v4048_v51, %v4791_v50  ;;  %v521_v54 = vpop.f32.mrb[15].mxu0 }
 0x105   : > { %v576_v55 = vmax.f32 %v519_v49, 0.0  ;;  %v522_v56 = vadd.f32 %v4791_v50, %v521_v54  ;;  %v723_v26 = vpop.permute.xlu0 %722 }
 0x106   : > { %v739_v57 = vmul.f32 %v683_v34, %v578_v52  ;;  %v579_v58 = vmax.f32 %v530_v53, 0.0  ;;  %v4604_v34 = vmov (!%p3615_p6), 0.0  }
 0x107   : > { %v737_v59 = vmul.f32 %v673_v20, %v576_v55  ;;  %v577_v60 = vmax.f32 %v522_v56, 0.0  ;;  %782 = vst.msk [vmem:[#allocation2] sm:$0xff] (!%p3615_p6), %vm748_vm3, %v4604_v34  ;;  %783 = vst.msk [vmem:[#allocation2 + $0x8] sm:$0xff] (!%p3615_p6), %vm748_vm3, %v4604_v34 }
 0x108   : > { %763 = vst.msk [vmem:[#allocation2 + $0x71] sm:$0xff] %vm748_vm3, %v739_v57  ;;  %v740_v62 = vmul.f32 %v688_v45, %v579_v58 }
 0x109   : > { %761 = vst.msk [vmem:[#allocation2 + $0x61] sm:$0xff] %vm748_vm3, %v737_v59  ;;  %v738_v0 = vmul.f32 %v678_v30, %v577_v60  ;;  %v4051_v1 = vpop.f32.mrb[16].mxu0 }
 0x10a   : > { %764 = vst.msk [vmem:[#allocation2 + $0x79] sm:$0xff] %vm748_vm3, %v740_v62  ;;  %v543_v2 = vadd.f32 %v4051_v1, %v4791_v50  ;;  %v534_v3 = vpop.f32.mrb[17].mxu0 }
 0x10b   : > { %762 = vst.msk [vmem:[#allocation2 + $0x69] sm:$0xff] %vm748_vm3, %v738_v0  ;;  %v535_v4 = vadd.f32 %v4791_v50, %v534_v3  ;;  %v4052_v5 = vpop.f32.mrb[18].mxu0 }
 0x10c   : > { %v582_v6 = vmax.f32 %v543_v2, 0.0  ;;  %v546_v7 = vadd.f32 %v4052_v5, %v4791_v50  ;;  %v537_v8 = vpop.f32.mrb[19].mxu0  ;;  %785 = vst.msk [vmem:[#allocation2 + $0x10] sm:$0x3] (!%p3615_p6), %vm784_vm6, %v4604_v34 }
 0x10d   : > { %v580_v9 = vmax.f32 %v535_v4, 0.0  ;;  %v538_v10 = vadd.f32 %v4791_v50, %v537_v8 }
 0x10e   : > { %v743_v11 = vmul.f32 %v703_v63, %v582_v6  ;;  %v583_v12 = vmax.f32 %v546_v7, 0.0 }
 0x10f   : > { %v741_v15 = vmul.f32 %v693_v48, %v580_v9  ;;  %v581_v16 = vmax.f32 %v538_v10, 0.0 }
 0x110   : > { %767 = vst.msk [vmem:[#allocation2 + $0x91] sm:$0xff] %vm748_vm3, %v743_v11  ;;  %v744_v17 = vmul.f32 %v708_v14, %v583_v12 }
 0x111   : > { %765 = vst.msk [vmem:[#allocation2 + $0x81] sm:$0xff] %vm748_vm3, %v741_v15  ;;  %v742_v18 = vmul.f32 %v698_v61, %v581_v16  ;;  %v4055_v19 = vpop.f32.mrb[20].mxu0 }
 0x112   : > { %768 = vst.msk [vmem:[#allocation2 + $0x99] sm:$0xff] %vm748_vm3, %v744_v17  ;;  %v559_v20 = vadd.f32 %v4055_v19, %v4791_v50  ;;  %v550_v21 = vpop.f32.mrb[21].mxu0 }
 0x113   : > { %766 = vst.msk [vmem:[#allocation2 + $0x89] sm:$0xff] %vm748_vm3, %v742_v18  ;;  %v551_v22 = vadd.f32 %v4791_v50, %v550_v21  ;;  %v4056_v23 = vpop.f32.mrb[22].mxu0 }
 0x114   : > { %v586_v24 = vmax.f32 %v559_v20, 0.0  ;;  %v553_v25 = vpop.f32.mrb[23].mxu0 }
 0x115   : > { %v584_v27 = vmax.f32 %v551_v22, 0.0  ;;  %v554_v28 = vadd.f32 %v4791_v50, %v553_v25  ;;  %781 = sbr.rel (%p3615_p6) target bundleno = 284 (0x11c), region = 48 }
 0x116   : > { %v747_v29 = vmul.f32 %v723_v26, %v586_v24 }
 0x117   : > { %v745_v30 = vmul.f32 %v713_v13, %v584_v27  ;;  %v585_v31 = vmax.f32 %v554_v28, 0.0 }
 0x118   : > { %772 = vst.msk [vmem:[#allocation2 + $0xb1] sm:$0xf] %vm771_vm5, %v747_v29 }
 0x119   : > { %769 = vst.msk [vmem:[#allocation2 + $0xa1] sm:$0xff] %vm748_vm3, %v745_v30  ;;  %v746_v33 = vmul.f32 %v718_v32, %v585_v31 }
 0x11b   : > { %770 = vst.msk [vmem:[#allocation2 + $0xa9] sm:$0xff] %vm748_vm3, %v746_v33 }
 0x11c PF: > { %p3616_p7 = scmp.ne.s32.totalorder %s4583_s21, 1 }
 0x11d   : > { %vm792_vm7 = vcmask (!%p3616_p7), 517120   ;;  %v4605_v50 = vmov (!%p3616_p7), 0.0  }
 0x11e   : > { %789 = sbr.rel (%p3616_p7) target bundleno = 293 (0x125), region = 52  ;;  %790 = vst.msk [vmem:[#allocation2 + $0xa2] sm:$0xff] (!%p3616_p7), %vm748_vm3, %v4605_v50  ;;  %791 = vst.msk [vmem:[#allocation2 + $0xaa] sm:$0xff] (!%p3616_p7), %vm748_vm3, %v4605_v50 }
 0x11f   : > { %793 = vst.msk [vmem:[#allocation2 + $0xb2] sm:$0x3] (!%p3616_p7), %vm792_vm7, %v4605_v50 }
 0x125 PF: > { %4057 = vmatprep.subr.bf16.mxu0 %v4603_v42  ;;  %4453 = vmatprep.subr.bf16.mxu1 %v4603_v42  ;;  %v4525_v35 = vld [vmem:[%s5620_s3 + $0x20] sm:$0xff]   ;;  %vm4606_vm8 = vmmov 0   ;;  %v4526_v36 = vld [vmem:[%s5620_s3 + $0x28] sm:$0xff]   ;;  %v4527_v37 = vld [vmem:[%s5620_s3 + $0x30] sm:$0xff]   ;;  %vm3427_vm9 = vcmask 1041409   ;;  %vm3430_vm10 = vcmask 1042434  }
 0x126   : > { %4065 = vmatprep.mubr.msk.bf16.mxu0 %vm4606_vm8, %v4603_v42  ;;  %4073 = vmatprep.mubr.msk.bf16.mxu1 %vm4606_vm8, %v4603_v42  ;;  %v4528_v38 = vld [vmem:[%s5620_s3 + $0x38] sm:$0xff]   ;;  %v829_v39 = vld [vmem:[#allocation2 + $0x1] sm:$0xff]  ;;  %v830_v40 = vld [vmem:[#allocation2 + $0x9] sm:$0xff]  ;;  %vm3433_vm11 = vcmask 1043459   ;;  %vm3436_vm12 = vcmask 1044484   ;;  %vm3439_vm13 = vcmask 1045509  }
 0x127   : > { %4058 = vmatpush3.bf16.msra.mxu0 %v4525_v35  ;;  %4457 = vmatpush3.bf16.msra.mxu1 %v4525_v35  ;;  %v833_v41 = vld [vmem:[#allocation2 + $0x21] sm:$0xff]  ;;  %v834_v43 = vld [vmem:[#allocation2 + $0x29] sm:$0xff]  ;;  %v847_v44 = vpack.c.bf16 %v830_v40, %v829_v39  ;;  %v831_v49 = vld [vmem:[#allocation2 + $0x11] sm:$0xff]  ;;  %vm3442_vm14 = vcmask 1046534   ;;  %vm3445_vm15 = vcmask 1047559  }
 0x128   : > { %4059 = vmatprep.subr.bf16.mxu0 %v4603_v42  ;;  %4454 = vmatprep.subr.bf16.mxu1 %v4603_v42  ;;  %v849_v45 = vpack.c.bf16 %v834_v43, %v833_v41  ;;  %v4529_v46 = vld [vmem:[%s5620_s3] sm:$0xff]   ;;  %v4531_v48 = vld [vmem:[%s5620_s3 + $0x8] sm:$0xff]   ;;  %v835_v52 = vld [vmem:[#allocation2 + $0x31] sm:$0xff] }
 0x129   : > { %v4530_v47 = vld [vmem:[%s5620_s3 + $0x40] sm:$0xff]   ;;  %v4534_v54 = vld [vmem:[%s5620_s3 + $0x48] sm:$0xff]   ;;  %v4532_v57 = vld [vmem:[%s5620_s3 + $0x10] sm:$0xff]  }
 0x12a   : > { %v832_v51 = vld [vmem:[#allocation2 + $0x19] sm:$0xff]  ;;  %v4535_v58 = vld [vmem:[%s5620_s3 + $0x50] sm:$0xff]   ;;  %v837_v60 = vld [vmem:[#allocation2 + $0x41] sm:$0xff] }
 0x12b   : > { %4060 = vmatpush3.bf16.msra.mxu0 %v4526_v36  ;;  %4458 = vmatpush3.bf16.msra.mxu1 %v4526_v36  ;;  %v836_v53 = vld [vmem:[#allocation2 + $0x39] sm:$0xff]  ;;  %v848_v55 = vpack.c.bf16 %v832_v51, %v831_v49  ;;  %v838_v61 = vld [vmem:[#allocation2 + $0x49] sm:$0xff]  ;;  %v839_v4 = vld [vmem:[#allocation2 + $0x51] sm:$0xff] }
 0x12c   : > { %4061 = vmatprep.subr.bf16.mxu0 %v4603_v42  ;;  %4455 = vmatprep.subr.bf16.mxu1 %v4603_v42  ;;  %v850_v56 = vpack.c.bf16 %v836_v53, %v835_v52  ;;  %v4533_v59 = vld [vmem:[%s5620_s3 + $0x18] sm:$0xff]   ;;  %v794_v62 = vld [vmem:[#allocation2] sm:$0xff]  ;;  %v795_v63 = vld [vmem:[#allocation2 + $0x8] sm:$0xff]  ;;  %v851_v1 = vpack.c.bf16 %v838_v61, %v837_v60 }
 0x12d   : > { %v4536_v0 = vld [vmem:[%s5620_s3 + $0x58] sm:$0xff]   ;;  %v812_v2 = vpack.c.bf16 %v795_v63, %v794_v62  ;;  %v4537_v3 = vld [vmem:[%s5620_s3 + $0x60] sm:$0xff]   ;;  %v796_v6 = vld [vmem:[#allocation2 + $0x10] sm:$0xff] }
 0x12e   : > { %v840_v5 = vld [vmem:[#allocation2 + $0x59] sm:$0xff]  ;;  %v4539_v8 = vld [vmem:[%s5620_s3 + $0x68] sm:$0xff]   ;;  %v4541_v11 = vld [vmem:[%s5620_s3 + $0x70] sm:$0xff]  }
 0x12f   : > { %4062 = vmatpush3.bf16.msra.mxu0 %v4527_v37  ;;  %4459 = vmatpush3.bf16.msra.mxu1 %v4527_v37  ;;  %v797_v7 = vld [vmem:[#allocation2 + $0x18] sm:$0xff]  ;;  %v852_v9 = vpack.c.bf16 %v840_v5, %v839_v4  ;;  %v841_v12 = vld [vmem:[#allocation2 + $0x61] sm:$0xff]  ;;  %v842_v13 = vld [vmem:[#allocation2 + $0x69] sm:$0xff] }
 0x130   : > { %4063 = vmatprep.subr.bf16.mxu0 %v4603_v42  ;;  %4456 = vmatprep.subr.bf16.mxu1 %v4603_v42  ;;  %v813_v10 = vpack.c.bf16 %v797_v7, %v796_v6  ;;  %v798_v14 = vld [vmem:[#allocation2 + $0x20] sm:$0xff]  ;;  %v799_v15 = vld [vmem:[#allocation2 + $0x28] sm:$0xff]  ;;  %v4542_v16 = vld [vmem:[%s5620_s3 + $0x78] sm:$0xff]   ;;  %v853_v17 = vpack.c.bf16 %v842_v13, %v841_v12 }
 0x131   : > { %v814_v18 = vpack.c.bf16 %v799_v15, %v798_v14  ;;  %v843_v19 = vld [vmem:[#allocation2 + $0x71] sm:$0xff]  ;;  %v844_v20 = vld [vmem:[#allocation2 + $0x79] sm:$0xff]  ;;  %v845_v25 = vld [vmem:[#allocation2 + $0x81] sm:$0xff] }
 0x132   : > { %v800_v21 = vld [vmem:[#allocation2 + $0x30] sm:$0xff]  ;;  %v801_v22 = vld [vmem:[#allocation2 + $0x38] sm:$0xff]  ;;  %v854_v23 = vpack.c.bf16 %v844_v20, %v843_v19  ;;  %v802_v27 = vld [vmem:[#allocation2 + $0x40] sm:$0xff] }
 0x133   : > { %4064 = vmatpush3.bf16.msra.mxu0 %v4528_v38  ;;  %4460 = vmatpush3.bf16.msra.mxu1 %v4528_v38  ;;  %v815_v24 = vpack.c.bf16 %v801_v22, %v800_v21  ;;  %v846_v26 = vld [vmem:[#allocation2 + $0x89] sm:$0xff]  ;;  %v805_v32 = vld [vmem:[#allocation2 + $0x58] sm:$0xff]  ;;  %v4538_v36 = vld [vmem:[%s5620_s3 + $0x80] sm:$0xff]  }
 0x134   : > { %4101 = vmatprep.subr.bf16.mxu0 %v4603_v42  ;;  %4145 = vmatprep.subr.bf16.mxu1 %v4603_v42  ;;  %v803_v28 = vld [vmem:[#allocation2 + $0x48] sm:$0xff]  ;;  %v855_v29 = vpack.c.bf16 %v846_v26, %v845_v25  ;;  %v804_v31 = vld [vmem:[#allocation2 + $0x50] sm:$0xff]  ;;  %v806_v37 = vld [vmem:[#allocation2 + $0x60] sm:$0xff] }
 0x135   : > { %v816_v30 = vpack.c.bf16 %v803_v28, %v802_v27  ;;  %v1177_v33 = vld [vmem:[#allocation2 + $0x2] sm:$0xff]  ;;  %v1178_v34 = vld [vmem:[#allocation2 + $0xa] sm:$0xff]  ;;  %v817_v50 = vpack.c.bf16 %v805_v32, %v804_v31  ;;  %v1179_v39 = vld [vmem:[#allocation2 + $0x12] sm:$0xff] }
 0x136   : > { %4066 = vmatmul.mubr.msk.bf16.vlgmr.msra.gmra.mrb[24].mxu0 %vm748_vm3, %v847_v44  ;;  %4074 = vmatmul.mubr.msk.bf16.vlgmr.msra.gmra.mrb[0].mxu1 %vm748_vm3, %v849_v45  ;;  %v1195_v35 = vpack.c.bf16 %v1178_v34, %v1177_v33  ;;  %v807_v38 = vld [vmem:[#allocation2 + $0x68] sm:$0xff]  ;;  %v1180_v40 = vld [vmem:[#allocation2 + $0x1a] sm:$0xff]  ;;  %v4543_v45 = vld [vmem:[%s5620_s3 + $0x90] sm:$0xff]  }
 0x137   : > { %4102 = vmatpush3.bf16.msra.mxu0 %v4529_v46  ;;  %4146 = vmatpush3.bf16.msra.mxu1 %v4530_v47  ;;  %v4540_v41 = vld [vmem:[%s5620_s3 + $0x88] sm:$0xff]   ;;  %v818_v43 = vpack.c.bf16 %v807_v38, %v806_v37  ;;  %v1196_v44 = vpack.c.bf16 %v1180_v40, %v1179_v39  ;;  %v808_v46 = vld [vmem:[#allocation2 + $0x70] sm:$0xff]  ;;  %v809_v47 = vld [vmem:[#allocation2 + $0x78] sm:$0xff] }
 0x138   : > { %4103 = vmatprep.subr.bf16.mxu0 %v4603_v42  ;;  %4069 = vmatprep.mubr.msk.bf16.mxu0 %vm4606_vm8, %v4603_v42  ;;  %v1182_v49 = vld [vmem:[#allocation2 + $0x2a] sm:$0xff]  ;;  %v4544_v51 = vld [vmem:[%s5620_s3 + $0x98] sm:$0xff]   ;;  %v819_v52 = vpack.c.bf16 %v809_v47, %v808_v46  ;;  %v1185_v60 = vld [vmem:[#allocation2 + $0x42] sm:$0xff] }
 0x139   : > { %4077 = vmatprep.mubr.msk.bf16.mxu1 %vm4606_vm8, %v4603_v42  ;;  %4147 = vmatprep.subr.bf16.mxu1 %v4603_v42  ;;  %v1186_v61 = vld [vmem:[#allocation2 + $0x4a] sm:$0xff]  ;;  %v4545_v63 = vld [vmem:[%s5620_s3 + $0xa0] sm:$0xff]   ;;  %v4550_v7 = vld [vmem:[%s5620_s3 + $0xb8] sm:$0xff]  }
 0x13a   : > { %v1199_v62 = vpack.c.bf16 %v1186_v61, %v1185_v60  ;;  %v4549_v4 = vld [vmem:[%s5620_s3 + $0xb0] sm:$0xff]   ;;  %v1189_v5 = vld [vmem:[#allocation2 + $0x62] sm:$0xff]  ;;  %v4552_v26 = vld [vmem:[%s5620_s3 + $0xd8] sm:$0xff]  }
 0x13b   : > { %4104 = vmatpush3.bf16.msra.mxu0 %v4531_v48  ;;  %4148 = vmatpush3.bf16.msra.mxu1 %v4534_v54  ;;  %v1181_v48 = vld [vmem:[#allocation2 + $0x22] sm:$0xff]  ;;  %v1190_v6 = vld [vmem:[#allocation2 + $0x6a] sm:$0xff]  ;;  %v1597_v15 = vld [vmem:[#allocation2 + $0x13] sm:$0xff] }
 0x13c   : > { %4105 = vmatprep.subr.bf16.mxu0 %v4603_v42  ;;  %4149 = vmatprep.subr.bf16.mxu1 %v4603_v42  ;;  %v1197_v53 = vpack.c.bf16 %v1182_v49, %v1181_v48  ;;  %v810_v54 = vld [vmem:[#allocation2 + $0x80] sm:$0xff]  ;;  %v1194_v13 = vld [vmem:[#allocation2 + $0x8a] sm:$0xff]  ;;  %v1403_v28 = vld [vmem:[#allocation2 + $0x92] sm:$0xff] }
 0x13d   : > { %v1193_v12 = vld [vmem:[#allocation2 + $0x82] sm:$0xff]  ;;  %v1600_v20 = vld [vmem:[#allocation2 + $0x2b] sm:$0xff]  ;;  %v1605_v34 = vld [vmem:[#allocation2 + $0x53] sm:$0xff] }
 0x13e   : > { %4070 = vmatmul.mubr.msk.bf16.gmra.mrb[28].mxu0 %vm748_vm3, %v848_v55  ;;  %4078 = vmatmul.mubr.msk.bf16.gmra.mrb[4].mxu1 %vm748_vm3, %v850_v56  ;;  %v811_v55 = vld [vmem:[#allocation2 + $0x88] sm:$0xff]  ;;  %v1183_v56 = vld [vmem:[#allocation2 + $0x32] sm:$0xff]  ;;  %v1203_v14 = vpack.c.bf16 %v1194_v13, %v1193_v12  ;;  %v1602_v25 = vld [vmem:[#allocation2 + $0x3b] sm:$0xff] }
 0x13f   : > { %4106 = vmatpush3.bf16.msra.mxu0 %v4532_v57  ;;  %4081 = vmatprep.mubr.msk.bf16.mxu1 %vm4606_vm8, %v4603_v42  ;;  %v1184_v57 = vld [vmem:[#allocation2 + $0x3a] sm:$0xff]  ;;  %v1599_v19 = vld [vmem:[#allocation2 + $0x23] sm:$0xff]  ;;  %v1604_v31 = vld [vmem:[#allocation2 + $0x4b] sm:$0xff] }
 0x140   : > { %4107 = vmatprep.subr.bf16.mxu0 %v4603_v42  ;;  %4109 = vmatprep.mubr.msk.bf16.mxu0 %vm4606_vm8, %v4603_v42  ;;  %v4548_v21 = vld [vmem:[%s5620_s3 + $0xc8] sm:$0xff]   ;;  %v1616_v22 = vpack.c.bf16 %v1600_v20, %v1599_v19  ;;  %v4553_v39 = vld [vmem:[%s5620_s3 + $0xe0] sm:$0xff]   ;;  %v4557_v48 = vld [vmem:[%s5620_s3 + $0xf0] sm:$0xff]  }
 0x141   : > { %4150 = vmatpush3.bf16.msra.mxu1 %v4535_v58  ;;  %v820_v58 = vpack.c.bf16 %v811_v55, %v810_v54  ;;  %v1607_v40 = vld [vmem:[#allocation2 + $0x63] sm:$0xff]  ;;  %v1609_v49 = vld [vmem:[#allocation2 + $0x73] sm:$0xff] }
 0x142   : > { %4151 = vmatprep.subr.bf16.mxu1 %v4603_v42  ;;  %v4558_v54 = vld [vmem:[%s5620_s3 + $0xf8] sm:$0xff]   ;;  %v1814_v60 = vld [vmem:[#allocation2 + $0x4c] sm:$0xff] }
 0x143   : > { %4108 = vmatpush3.bf16.msra.mxu0 %v4533_v59  ;;  %v1198_v59 = vpack.c.bf16 %v1184_v57, %v1183_v56  ;;  %v1611_v57 = vld [vmem:[#allocation2 + $0x83] sm:$0xff]  ;;  %v4559_v13 = vld [vmem:[%s5620_s3 + $0x110] sm:$0xff]  }
 0x144   : > { %4189 = vmatprep.subr.bf16.mxu0 %v4603_v42 }
 0x145   : > { %4152 = vmatpush3.bf16.msra.mxu1 %v4536_v0  ;;  %v1187_v0 = vld [vmem:[#allocation2 + $0x52] sm:$0xff] }
 0x146   : > { %4082 = vmatmul.mubr.msk.bf16.gmra.mrb[8].mxu1 %vm748_vm3, %v851_v1  ;;  %4110 = vmatmul.mubr.msk.bf16.vlgmr.msra.gmra.mrb[32].mxu0 %vm748_vm3, %v812_v2  ;;  %v1188_v1 = vld [vmem:[#allocation2 + $0x5a] sm:$0xff]  ;;  %v4547_v2 = vld [vmem:[%s5620_s3 + $0xa8] sm:$0xff]  }
 0x147   : > { %4085 = vmatprep.mubr.msk.bf16.mxu1 %vm4606_vm8, %v4603_v42  ;;  %4113 = vmatprep.mubr.msk.bf16.mxu0 %vm4606_vm8, %v4603_v42 }
 0x148   : > { %4190 = vmatpush3.bf16.msra.mxu0 %v4537_v3  ;;  %4233 = vmatprep.subr.bf16.mxu1 %v4603_v42  ;;  %v1200_v3 = vpack.c.bf16 %v1188_v1, %v1187_v0  ;;  %v1614_v0 = vld [vmem:[#allocation2 + $0x9b] sm:$0xff] }
 0x149   : > { %4191 = vmatprep.subr.bf16.mxu0 %v4603_v42  ;;  %v1815_v1 = vld [vmem:[#allocation2 + $0x54] sm:$0xff] }
 0x14c   : > { %4192 = vmatpush3.bf16.msra.mxu0 %v4539_v8  ;;  %v1201_v8 = vpack.c.bf16 %v1190_v6, %v1189_v5  ;;  %v1817_v5 = vld [vmem:[#allocation2 + $0x64] sm:$0xff]  ;;  %v1818_v6 = vld [vmem:[#allocation2 + $0x6c] sm:$0xff] }
 0x14d   : > { %4193 = vmatprep.subr.bf16.mxu0 %v4603_v42 }
 0x14e   : > { %4086 = vmatmul.mubr.msk.bf16.gmra.mrb[12].mxu1 %vm748_vm3, %v852_v9  ;;  %4114 = vmatmul.mubr.msk.bf16.gmra.mrb[36].mxu0 %vm748_vm3, %v813_v10  ;;  %v1191_v9 = vld [vmem:[#allocation2 + $0x72] sm:$0xff]  ;;  %v1192_v10 = vld [vmem:[#allocation2 + $0x7a] sm:$0xff] }
 0x14f   : > { %4089 = vmatprep.mubr.msk.bf16.mxu1 %vm4606_vm8, %v4603_v42  ;;  %4117 = vmatprep.mubr.msk.bf16.mxu0 %vm4606_vm8, %v4603_v42 }
 0x150   : > { %4194 = vmatpush3.bf16.msra.mxu0 %v4541_v11  ;;  %v1202_v11 = vpack.c.bf16 %v1192_v10, %v1191_v9  ;;  %v1819_v9 = vld [vmem:[#allocation2 + $0x74] sm:$0xff]  ;;  %v1820_v10 = vld [vmem:[#allocation2 + $0x7c] sm:$0xff] }
 0x151   : > { %4195 = vmatprep.subr.bf16.mxu0 %v4603_v42  ;;  %v5148_v12 = vpack.c.bf16 %v1820_v10, %v1819_v9 }
 0x154   : > { %4196 = vmatpush3.bf16.msra.mxu0 %v4542_v16  ;;  %v1598_v16 = vld [vmem:[#allocation2 + $0x1b] sm:$0xff] }
 0x155   : > { %4277 = vmatprep.subr.bf16.mxu0 %v4603_v42 }
 0x156   : > { %4090 = vmatmul.mubr.msk.bf16.gmra.mrb[16].mxu1 %vm748_vm3, %v853_v17  ;;  %4118 = vmatmul.mubr.msk.bf16.gmra.mrb[40].mxu0 %vm748_vm3, %v814_v18  ;;  %v1615_v17 = vpack.c.bf16 %v1598_v16, %v1597_v15  ;;  %v4546_v18 = vld [vmem:[%s5620_s3 + $0xc0] sm:$0xff]   ;;  %v1822_v15 = vld [vmem:[#allocation2 + $0x8c] sm:$0xff]  ;;  %v4560_v16 = vld [vmem:[%s5620_s3 + $0x118] sm:$0xff]  }
 0x157   : > { %4093 = vmatprep.mubr.msk.bf16.mxu1 %vm4606_vm8, %v4603_v42  ;;  %4121 = vmatprep.mubr.msk.bf16.mxu0 %vm4606_vm8, %v4603_v42 }
 0x15e   : > { %4094 = vmatmul.mubr.msk.bf16.gmra.mrb[20].mxu1 %vm748_vm3, %v854_v23  ;;  %4122 = vmatmul.mubr.msk.bf16.gmra.mrb[44].mxu0 %vm748_vm3, %v815_v24  ;;  %v4551_v23 = vld [vmem:[%s5620_s3 + $0xd0] sm:$0xff]  }
 0x15f   : > { %4097 = vmatprep.mubr.msk.bf16.mxu1 %vm4606_vm8, %v4603_v42  ;;  %4125 = vmatprep.mubr.msk.bf16.mxu0 %vm4606_vm8, %v4603_v42  ;;  %v1601_v24 = vld [vmem:[#allocation2 + $0x33] sm:$0xff] }
 0x160   : > { %v1617_v27 = vpack.c.bf16 %v1602_v25, %v1601_v24 }
 0x166   : > { %4098 = vmatmul.mubr.msk.bf16.gmra.mrb[24].mxu1 %vm748_vm3, %v855_v29  ;;  %4126 = vmatmul.mubr.msk.bf16.gmra.mrb[48].mxu0 %vm748_vm3, %v816_v30  ;;  %v1404_v29 = vld [vmem:[#allocation2 + $0x9a] sm:$0xff]  ;;  %v1603_v30 = vld [vmem:[#allocation2 + $0x43] sm:$0xff] }
 0x167   : > { %4129 = vmatprep.mubr.msk.bf16.mxu0 %vm4606_vm8, %v4603_v42  ;;  %4153 = vmatprep.mubr.msk.bf16.mxu1 %vm4606_vm8, %v4603_v42  ;;  %v1413_v32 = vpack.c.bf16 %v1404_v29, %v1403_v28  ;;  %v1618_v33 = vpack.c.bf16 %v1604_v31, %v1603_v30 }
 0x16e   : > { %4130 = vmatmul.mubr.msk.bf16.gmra.mrb[52].mxu0 %vm748_vm3, %v817_v50  ;;  %4154 = vmatmul.mubr.msk.bf16.vlgmr.msra.gmra.mrb[28].mxu1 %vm748_vm3, %v1195_v35  ;;  %v1606_v50 = vld [vmem:[#allocation2 + $0x5b] sm:$0xff] }
 0x16f   : > { %4234 = vmatpush3.bf16.msra.mxu1 %v4538_v36  ;;  %4133 = vmatprep.mubr.msk.bf16.mxu0 %vm4606_vm8, %v4603_v42  ;;  %v1807_v35 = vld [vmem:[#allocation2 + $0x14] sm:$0xff]  ;;  %v1808_v36 = vld [vmem:[#allocation2 + $0x1c] sm:$0xff]  ;;  %v1619_v37 = vpack.c.bf16 %v1606_v50, %v1605_v34 }
 0x170   : > { %4157 = vmatprep.mubr.msk.bf16.mxu1 %vm4606_vm8, %v4603_v42  ;;  %4235 = vmatprep.subr.bf16.mxu1 %v4603_v42  ;;  %v1825_v38 = vpack.c.bf16 %v1808_v36, %v1807_v35  ;;  %v2227_v36 = vld [vmem:[#allocation2 + $0x25] sm:$0xff] }
 0x173   : > { %4236 = vmatpush3.bf16.msra.mxu1 %v4540_v41  ;;  %v1608_v41 = vld [vmem:[#allocation2 + $0x6b] sm:$0xff] }
 0x174   : > { %4237 = vmatprep.subr.bf16.mxu1 %v4603_v42  ;;  %v1620_v46 = vpack.c.bf16 %v1608_v41, %v1607_v40 }
 0x176   : > { %4134 = vmatmul.mubr.msk.bf16.gmra.mrb[56].mxu0 %vm748_vm3, %v818_v43  ;;  %4158 = vmatmul.mubr.msk.bf16.gmra.mrb[32].mxu1 %vm748_vm3, %v1196_v44  ;;  %v1809_v43 = vld [vmem:[#allocation2 + $0x24] sm:$0xff] }
 0x177   : > { %4137 = vmatprep.mubr.msk.bf16.mxu0 %vm4606_vm8, %v4603_v42  ;;  %4161 = vmatprep.mubr.msk.bf16.mxu1 %vm4606_vm8, %v4603_v42 }
 0x178   : > { %4238 = vmatpush3.bf16.msra.mxu1 %v4543_v45  ;;  %v4555_v45 = vld [vmem:[%s5620_s3 + $0xe8] sm:$0xff]  }
 0x179   : > { %4239 = vmatprep.subr.bf16.mxu1 %v4603_v42 }
 0x17c   : > { %4240 = vmatpush3.bf16.msra.mxu1 %v4544_v51  ;;  %v1610_v51 = vld [vmem:[#allocation2 + $0x7b] sm:$0xff] }
 0x17d   : > { %4321 = vmatprep.subr.bf16.mxu1 %v4603_v42  ;;  %v1621_v55 = vpack.c.bf16 %v1610_v51, %v1609_v49  ;;  %v2229_v51 = vld [vmem:[#allocation2 + $0x35] sm:$0xff] }
 0x17e   : > { %4138 = vmatmul.mubr.msk.bf16.gmra.mrb[60].mxu0 %vm748_vm3, %v819_v52  ;;  %4162 = vmatmul.mubr.msk.bf16.gmra.mrb[36].mxu1 %vm748_vm3, %v1197_v53  ;;  %v1811_v52 = vld [vmem:[#allocation2 + $0x34] sm:$0xff] }
 0x17f   : > { %4141 = vmatprep.mubr.msk.bf16.mxu0 %vm4606_vm8, %v4603_v42  ;;  %4165 = vmatprep.mubr.msk.bf16.mxu1 %vm4606_vm8, %v4603_v42 }
 0x186   : > { %4142 = vmatmul.mubr.msk.bf16.gmra.mrb[64].mxu0 %vm748_vm3, %v820_v58  ;;  %4166 = vmatmul.mubr.msk.bf16.gmra.mrb[40].mxu1 %vm748_vm3, %v1198_v59  ;;  %v1612_v58 = vld [vmem:[#allocation2 + $0x8b] sm:$0xff] }
 0x187   : > { %4169 = vmatprep.mubr.msk.bf16.mxu1 %vm4606_vm8, %v4603_v42  ;;  %4197 = vmatprep.mubr.msk.bf16.mxu0 %vm4606_vm8, %v4603_v42  ;;  %v1622_v61 = vpack.c.bf16 %v1612_v58, %v1611_v57 }
 0x18e   : > { %4170 = vmatmul.mubr.msk.bf16.gmra.mrb[44].mxu1 %vm748_vm3, %v1199_v62  ;;  %4198 = vmatmul.mubr.msk.bf16.vlgmr.msra.gmra.mrb[68].mxu0 %vm748_vm3, %v1196_v44  ;;  %v1810_v44 = vld [vmem:[#allocation2 + $0x2c] sm:$0xff] }
 0x18f   : > { %4173 = vmatprep.mubr.msk.bf16.mxu1 %vm4606_vm8, %v4603_v42  ;;  %4201 = vmatprep.mubr.msk.bf16.mxu0 %vm4606_vm8, %v4603_v42  ;;  %v1826_v47 = vpack.c.bf16 %v1810_v44, %v1809_v43 }
 0x190   : > { %4278 = vmatpush3.bf16.msra.mxu0 %v4545_v63  ;;  %v1613_v63 = vld [vmem:[#allocation2 + $0x93] sm:$0xff] }
 0x191   : > { %4279 = vmatprep.subr.bf16.mxu0 %v4603_v42 }
 0x194   : > { %4280 = vmatpush3.bf16.msra.mxu0 %v4547_v2  ;;  %v1816_v2 = vld [vmem:[#allocation2 + $0x5c] sm:$0xff] }
 0x195   : > { %4281 = vmatprep.subr.bf16.mxu0 %v4603_v42 }
 0x196   : > { %4174 = vmatmul.mubr.msk.bf16.gmra.mrb[48].mxu1 %vm748_vm3, %v1200_v3  ;;  %4202 = vmatmul.mubr.msk.bf16.gmra.mrb[72].mxu0 %vm748_vm3, %v1197_v53  ;;  %v1812_v53 = vld [vmem:[#allocation2 + $0x3c] sm:$0xff] }
 0x197   : > { %4177 = vmatprep.mubr.msk.bf16.mxu1 %vm4606_vm8, %v4603_v42  ;;  %4205 = vmatprep.mubr.msk.bf16.mxu0 %vm4606_vm8, %v4603_v42  ;;  %v1827_v56 = vpack.c.bf16 %v1812_v53, %v1811_v52  ;;  %v2230_v52 = vld [vmem:[#allocation2 + $0x3d] sm:$0xff] }
 0x198   : > { %4282 = vmatpush3.bf16.msra.mxu0 %v4549_v4  ;;  %v1829_v4 = vpack.c.bf16 %v1816_v2, %v1815_v1  ;;  %v2246_v58 = vpack.c.bf16 %v2230_v52, %v2229_v51  ;;  %v2232_v1 = vld [vmem:[#allocation2 + $0x4d] sm:$0xff] }
 0x199   : > { %4283 = vmatprep.subr.bf16.mxu0 %v4603_v42 }
 0x19c   : > { %4284 = vmatpush3.bf16.msra.mxu0 %v4550_v7  ;;  %v5132_v7 = vpack.c.bf16 %v1818_v6, %v1817_v5 }
 0x19d   : > { %4365 = vmatprep.subr.bf16.mxu0 %v4603_v42 }
 0x19e   : > { %4178 = vmatmul.mubr.msk.bf16.gmra.mrb[52].mxu1 %vm748_vm3, %v1201_v8  ;;  %4206 = vmatmul.mubr.msk.bf16.gmra.mrb[76].mxu0 %vm748_vm3, %v1198_v59  ;;  %v1813_v59 = vld [vmem:[#allocation2 + $0x44] sm:$0xff] }
 0x19f   : > { %4181 = vmatprep.mubr.msk.bf16.mxu1 %vm4606_vm8, %v4603_v42  ;;  %4209 = vmatprep.mubr.msk.bf16.mxu0 %vm4606_vm8, %v4603_v42 }
 0x1a6   : > { %4182 = vmatmul.mubr.msk.bf16.gmra.mrb[56].mxu1 %vm748_vm3, %v1202_v11  ;;  %4210 = vmatmul.mubr.msk.bf16.gmra.mrb[80].mxu0 %vm748_vm3, %v1199_v62  ;;  %v1828_v62 = vpack.c.bf16 %v1814_v60, %v1813_v59 }
 0x1a7   : > { %4185 = vmatprep.mubr.msk.bf16.mxu1 %vm4606_vm8, %v4603_v42  ;;  %4213 = vmatprep.mubr.msk.bf16.mxu0 %vm4606_vm8, %v4603_v42 }
 0x1ae   : > { %4186 = vmatmul.mubr.msk.bf16.gmra.mrb[60].mxu1 %vm748_vm3, %v1203_v14  ;;  %4214 = vmatmul.mubr.msk.bf16.gmra.mrb[84].mxu0 %vm748_vm3, %v1200_v3  ;;  %v1623_v3 = vpack.c.bf16 %v1614_v0, %v1613_v63  ;;  %v2231_v0 = vld [vmem:[#allocation2 + $0x45] sm:$0xff] }
 0x1af   : > { %4217 = vmatprep.mubr.msk.bf16.mxu0 %vm4606_vm8, %v4603_v42  ;;  %4241 = vmatprep.mubr.msk.bf16.mxu1 %vm4606_vm8, %v4603_v42 }
 0x1b6   : > { %4218 = vmatmul.mubr.msk.bf16.gmra.mrb[88].mxu0 %vm748_vm3, %v1201_v8  ;;  %4242 = vmatmul.mubr.msk.bf16.vlgmr.msra.gmra.mrb[64].mxu1 %vm748_vm3, %v1615_v17  ;;  %v4554_v8 = vld [vmem:[%s5620_s3 + $0x100] sm:$0xff]  }
 0x1b7   : > { %4322 = vmatpush3.bf16.msra.mxu1 %v4546_v18  ;;  %4221 = vmatprep.mubr.msk.bf16.mxu0 %vm4606_vm8, %v4603_v42 }
 0x1b8   : > { %4245 = vmatprep.mubr.msk.bf16.mxu1 %vm4606_vm8, %v4603_v42  ;;  %4323 = vmatprep.subr.bf16.mxu1 %v4603_v42 }
 0x1bb   : > { %4324 = vmatpush3.bf16.msra.mxu1 %v4548_v21 }
 0x1bc   : > { %4325 = vmatprep.subr.bf16.mxu1 %v4603_v42 }
 0x1be   : > { %4222 = vmatmul.mubr.msk.bf16.gmra.mrb[92].mxu0 %vm748_vm3, %v1202_v11  ;;  %4246 = vmatmul.mubr.msk.bf16.gmra.mrb[68].mxu1 %vm748_vm3, %v1616_v22  ;;  %v4556_v11 = vld [vmem:[%s5620_s3 + $0x108] sm:$0xff]  }
 0x1bf   : > { %4225 = vmatprep.mubr.msk.bf16.mxu0 %vm4606_vm8, %v4603_v42  ;;  %4249 = vmatprep.mubr.msk.bf16.mxu1 %vm4606_vm8, %v4603_v42 }
 0x1c0   : > { %4326 = vmatpush3.bf16.msra.mxu1 %v4551_v23 }
 0x1c1   : > { %4327 = vmatprep.subr.bf16.mxu1 %v4603_v42 }
 0x1c4   : > { %4328 = vmatpush3.bf16.msra.mxu1 %v4552_v26  ;;  %v1823_v26 = vld [vmem:[#allocation2 + $0x94] sm:$0xff] }
 0x1c5   : > { %4409 = vmatprep.subr.bf16.mxu1 %v4603_v42 }
 0x1c6   : > { %4226 = vmatmul.mubr.msk.bf16.gmra.mrb[96].mxu0 %vm748_vm3, %v1203_v14  ;;  %4250 = vmatmul.mubr.msk.bf16.gmra.mrb[72].mxu1 %vm748_vm3, %v1617_v27  ;;  %v1821_v14 = vld [vmem:[#allocation2 + $0x84] sm:$0xff]  ;;  %v1824_v27 = vld [vmem:[#allocation2 + $0x9c] sm:$0xff] }
 0x1c7   : > { %4229 = vmatprep.mubr.msk.bf16.mxu0 %vm4606_vm8, %v4603_v42  ;;  %4253 = vmatprep.mubr.msk.bf16.mxu1 %vm4606_vm8, %v4603_v42  ;;  %v5167_v20 = vpack.c.bf16 %v1822_v15, %v1821_v14  ;;  %v5180_v31 = vpack.c.bf16 %v1824_v27, %v1823_v26  ;;  %v2234_v14 = vld [vmem:[#allocation2 + $0x5d] sm:$0xff]  ;;  %v2034_v27 = vld [vmem:[#allocation2 + $0xac] sm:$0xff] }
 0x1c8   : > { %v2033_v26 = vld [vmem:[#allocation2 + $0xa4] sm:$0xff] }
 0x1ce   : > { %4230 = vmatmul.mubr.msk.bf16.gmra.mrb[100].mxu0 %vm748_vm3, %v1413_v32  ;;  %4254 = vmatmul.mubr.msk.bf16.gmra.mrb[76].mxu1 %vm748_vm3, %v1618_v33 }
 0x1cf   : > { %4257 = vmatprep.mubr.msk.bf16.mxu1 %vm4606_vm8, %v4603_v42  ;;  %4285 = vmatprep.mubr.msk.bf16.mxu0 %vm4606_vm8, %v4603_v42 }
 0x1d6   : > { %4258 = vmatmul.mubr.msk.bf16.gmra.mrb[80].mxu1 %vm748_vm3, %v1619_v37  ;;  %4286 = vmatmul.mubr.msk.bf16.vlgmr.msra.gmra.mrb[104].mxu0 %vm748_vm3, %v1825_v38  ;;  %v2228_v37 = vld [vmem:[#allocation2 + $0x2d] sm:$0xff] }
 0x1d7   : > { %4261 = vmatprep.mubr.msk.bf16.mxu1 %vm4606_vm8, %v4603_v42  ;;  %4289 = vmatprep.mubr.msk.bf16.mxu0 %vm4606_vm8, %v4603_v42  ;;  %v2245_v41 = vpack.c.bf16 %v2228_v37, %v2227_v36 }
 0x1d8   : > { %4366 = vmatpush3.bf16.msra.mxu0 %v4553_v39 }
 0x1d9   : > { %4367 = vmatprep.subr.bf16.mxu0 %v4603_v42 }
 0x1dc   : > { %4368 = vmatpush3.bf16.msra.mxu0 %v4555_v45 }
 0x1dd   : > { %4369 = vmatprep.subr.bf16.mxu0 %v4603_v42 }
 0x1de   : > { %4262 = vmatmul.mubr.msk.bf16.gmra.mrb[84].mxu1 %vm748_vm3, %v1620_v46  ;;  %4290 = vmatmul.mubr.msk.bf16.gmra.mrb[108].mxu0 %vm748_vm3, %v1826_v47 }
 0x1df   : > { %4265 = vmatprep.mubr.msk.bf16.mxu1 %vm4606_vm8, %v4603_v42  ;;  %4293 = vmatprep.mubr.msk.bf16.mxu0 %vm4606_vm8, %v4603_v42 }
 0x1e0   : > { %4370 = vmatpush3.bf16.msra.mxu0 %v4557_v48 }
 0x1e1   : > { %4371 = vmatprep.subr.bf16.mxu0 %v4603_v42 }
 0x1e4   : > { %4372 = vmatpush3.bf16.msra.mxu0 %v4558_v54 }
 0x1e6   : > { %4266 = vmatmul.mubr.msk.bf16.gmra.mrb[88].mxu1 %vm748_vm3, %v1621_v55  ;;  %4294 = vmatmul.mubr.msk.bf16.gmra.mrb[112].mxu0 %vm748_vm3, %v1827_v56 }
 0x1e7   : > { %4269 = vmatprep.mubr.msk.bf16.mxu1 %vm4606_vm8, %v4603_v42  ;;  %4297 = vmatprep.mubr.msk.bf16.mxu0 %vm4606_vm8, %v4603_v42 }
 0x1ee   : > { %4270 = vmatmul.mubr.msk.bf16.gmra.mrb[92].mxu1 %vm748_vm3, %v1622_v61  ;;  %4298 = vmatmul.mubr.msk.bf16.gmra.mrb[116].mxu0 %vm748_vm3, %v1828_v62 }
 0x1ef   : > { %4273 = vmatprep.mubr.msk.bf16.mxu1 %vm4606_vm8, %v4603_v42  ;;  %4301 = vmatprep.mubr.msk.bf16.mxu0 %vm4606_vm8, %v4603_v42 }
 0x1f6   : > { %4274 = vmatmul.mubr.msk.bf16.gmra.mrb[96].mxu1 %vm748_vm3, %v1623_v3  ;;  %4302 = vmatmul.mubr.msk.bf16.gmra.mrb[120].mxu0 %vm748_vm3, %v1829_v4 }
 0x1f7   : > { %4305 = vmatprep.mubr.msk.bf16.mxu0 %vm4606_vm8, %v4603_v42  ;;  %4329 = vmatprep.mubr.msk.bf16.mxu1 %vm4606_vm8, %v4603_v42 }
 0x1fe   : > { %4306 = vmatmul.mubr.msk.bf16.gmra.mrb[124].mxu0 %vm748_vm3, %v5132_v7  ;;  %4330 = vmatmul.mubr.msk.bf16.vlgmr.msra.gmra.mrb[100].mxu1 %vm748_vm3, %v1826_v47 }
 0x1ff   : > { %4410 = vmatpush3.bf16.msra.mxu1 %v4554_v8  ;;  %4309 = vmatprep.mubr.msk.bf16.mxu0 %vm4606_vm8, %v4603_v42 }
 0x200   : > { %4333 = vmatprep.mubr.msk.bf16.mxu1 %vm4606_vm8, %v4603_v42  ;;  %4411 = vmatprep.subr.bf16.mxu1 %v4603_v42 }
 0x203   : > { %4412 = vmatpush3.bf16.msra.mxu1 %v4556_v11 }
 0x204   : > { %4413 = vmatprep.subr.bf16.mxu1 %v4603_v42 }
 0x206   : > { %4310 = vmatmul.mubr.msk.bf16.gmra.mrb[128].mxu0 %vm748_vm3, %v5148_v12  ;;  %4334 = vmatmul.mubr.msk.bf16.gmra.mrb[104].mxu1 %vm748_vm3, %v1827_v56 }
 0x207   : > { %4313 = vmatprep.mubr.msk.bf16.mxu0 %vm4606_vm8, %v4603_v42  ;;  %4337 = vmatprep.mubr.msk.bf16.mxu1 %vm4606_vm8, %v4603_v42 }
 0x208   : > { %4414 = vmatpush3.bf16.msra.mxu1 %v4559_v13  ;;  %v2233_v13 = vld [vmem:[#allocation2 + $0x55] sm:$0xff] }
 0x209   : > { %v5164_v17 = vpop.f32.mrb[0].mxu1  ;;  %v950_v18 = vpop.f32.mrb[24].mxu0  ;;  %4415 = vmatprep.subr.bf16.mxu1 %v4603_v42 }
 0x20a   : > { %v4075_v19 = vpop.f32.mrb[1].mxu1  ;;  %v4067_v21 = vpop.f32.mrb[25].mxu0 }
 0x20b   : > { %v5169_v22 = vpop.f32.mrb[2].mxu1  ;;  %v953_v23 = vpop.f32.mrb[26].mxu0  ;;  %v2248_v21 = vpack.c.bf16 %v2234_v14, %v2233_v13 }
 0x20c   : > { %v4076_v24 = vpop.f32.mrb[3].mxu1  ;;  %v4068_v25 = vpop.f32.mrb[27].mxu0  ;;  %4416 = vmatpush3.bf16.msra.mxu1 %v4560_v16 }
 0x20e   : > { %4314 = vmatmul.mubr.msk.bf16.gmra.mrb[132].mxu0 %vm748_vm3, %v5167_v20  ;;  %4338 = vmatmul.mubr.msk.bf16.gmra.mrb[108].mxu1 %vm748_vm3, %v1828_v62 }
 0x20f   : > { %4317 = vmatprep.mubr.msk.bf16.mxu0 %vm4606_vm8, %v4603_v42  ;;  %4341 = vmatprep.mubr.msk.bf16.mxu1 %vm4606_vm8, %v4603_v42 }
 0x211   : > { %v5178_v28 = vpop.f32.mrb[4].mxu1  ;;  %v958_v29 = vpop.f32.mrb[28].mxu0 }
 0x212   : > { %v4079_v30 = vpop.f32.mrb[5].mxu1  ;;  %v4071_v32 = vpop.f32.mrb[29].mxu0 }
 0x213   : > { %v5182_v33 = vpop.f32.mrb[6].mxu1  ;;  %v961_v34 = vpop.f32.mrb[30].mxu0 }
 0x214   : > { %v4080_v50 = vpop.f32.mrb[7].mxu1  ;;  %v4072_v35 = vpop.f32.mrb[31].mxu0 }
 0x215   : > { %v2043_v50 = vpack.c.bf16 %v2034_v27, %v2033_v26 }
 0x216   : > { %4318 = vmatmul.mubr.msk.bf16.gmra.mrb[136].mxu0 %vm748_vm3, %v5180_v31  ;;  %4342 = vmatmul.mubr.msk.bf16.gmra.mrb[112].mxu1 %vm748_vm3, %v1829_v4 }
 0x217   : > { %4345 = vmatprep.mubr.msk.bf16.mxu1 %vm4606_vm8, %v4603_v42  ;;  %4373 = vmatprep.mubr.msk.bf16.mxu0 %vm4606_vm8, %v4603_v42 }
 0x219   : > { %v5191_v38 = vpop.f32.mrb[8].mxu1  ;;  %v1106_v39 = vpop.f32.mrb[32].mxu0 }
 0x21a   : > { %v4083_v40 = vpop.f32.mrb[9].mxu1  ;;  %v5193_v43 = vadd.f32 %v1106_v39, %v950_v18  ;;  %v4111_v44 = vpop.f32.mrb[33].mxu0 }
 0x21b   : > { %v5195_v45 = vpop.f32.mrb[10].mxu1  ;;  %v1109_v46 = vpop.f32.mrb[34].mxu0  ;;  %v2237_v44 = vld [vmem:[#allocation2 + $0x75] sm:$0xff] }
 0x21c   : > { %v4084_v47 = vpop.f32.mrb[11].mxu1  ;;  %v5197_v48 = vadd.f32 %v1109_v46, %v953_v23  ;;  %v4112_v49 = vpop.f32.mrb[35].mxu0  ;;  %v2437_v46 = vld [vmem:[#allocation2 + $0x26] sm:$0xff] }
 0x21d   : > { %v2438_v47 = vld [vmem:[#allocation2 + $0x2e] sm:$0xff] }
 0x21e   : > { %4346 = vmatmul.mubr.msk.bf16.gmra.mrb[116].mxu1 %vm748_vm3, %v5132_v7  ;;  %4374 = vmatmul.mubr.msk.bf16.vlgmr.msra.gmra.mrb[140].mxu0 %vm748_vm3, %v2245_v41  ;;  %v2247_v7 = vpack.c.bf16 %v2232_v1, %v2231_v0 }
 0x21f   : > { %4349 = vmatprep.mubr.msk.bf16.mxu1 %vm4606_vm8, %v4603_v42  ;;  %4377 = vmatprep.mubr.msk.bf16.mxu0 %vm4606_vm8, %v4603_v42 }
 0x221   : > { %v5206_v53 = vpop.f32.mrb[12].mxu1  ;;  %v1114_v54 = vpop.f32.mrb[36].mxu0 }
 0x222   : > { %v4087_v55 = vpop.f32.mrb[13].mxu1  ;;  %v5208_v56 = vadd.f32 %v1114_v54, %v958_v29  ;;  %v4115_v57 = vpop.f32.mrb[37].mxu0  ;;  %v2236_v29 = vld [vmem:[#allocation2 + $0x6d] sm:$0xff] }
 0x223   : > { %v5210_v59 = vpop.f32.mrb[14].mxu1  ;;  %v1117_v60 = vpop.f32.mrb[38].mxu0 }
 0x224   : > { %v4088_v61 = vpop.f32.mrb[15].mxu1  ;;  %v5212_v62 = vadd.f32 %v1117_v60, %v961_v34  ;;  %v4116_v63 = vpop.f32.mrb[39].mxu0 }
 0x226   : > { %4350 = vmatmul.mubr.msk.bf16.gmra.mrb[120].mxu1 %vm748_vm3, %v5148_v12  ;;  %4378 = vmatmul.mubr.msk.bf16.gmra.mrb[144].mxu0 %vm748_vm3, %v2246_v58  ;;  %v2455_v58 = vpack.c.bf16 %v2438_v47, %v2437_v46 }
 0x227   : > { %4353 = vmatprep.mubr.msk.bf16.mxu1 %vm4606_vm8, %v4603_v42  ;;  %4381 = vmatprep.mubr.msk.bf16.mxu0 %vm4606_vm8, %v4603_v42 }
 0x229   : > { %v5221_v2 = vpop.f32.mrb[16].mxu1  ;;  %v1122_v3 = vpop.f32.mrb[40].mxu0 }
 0x22a   : > { %v5224_v4 = vadd.f32 %v1122_v3, %v5164_v17  ;;  %v4091_v5 = vpop.f32.mrb[17].mxu1  ;;  %v4119_v6 = vpop.f32.mrb[41].mxu0 }
 0x22b   : > { %v5226_v8 = vpop.f32.mrb[18].mxu1  ;;  %v1125_v9 = vpop.f32.mrb[42].mxu0  ;;  %v2439_v5 = vld [vmem:[#allocation2 + $0x36] sm:$0xff] }
 0x22c   : > { %v5229_v10 = vadd.f32 %v1125_v9, %v5169_v22  ;;  %v4092_v11 = vpop.f32.mrb[19].mxu1  ;;  %v4120_v12 = vpop.f32.mrb[43].mxu0 }
 0x22e   : > { %4354 = vmatmul.mubr.msk.bf16.gmra.mrb[124].mxu1 %vm748_vm3, %v5167_v20  ;;  %4382 = vmatmul.mubr.msk.bf16.gmra.mrb[148].mxu0 %vm748_vm3, %v2247_v7 }
 0x22f   : > { %4357 = vmatprep.mubr.msk.bf16.mxu1 %vm4606_vm8, %v4603_v42  ;;  %4385 = vmatprep.mubr.msk.bf16.mxu0 %vm4606_vm8, %v4603_v42 }
 0x231   : > { %v5238_v15 = vpop.f32.mrb[20].mxu1  ;;  %v1130_v16 = vpop.f32.mrb[44].mxu0 }
 0x232   : > { %v5241_v17 = vadd.f32 %v1130_v16, %v5178_v28  ;;  %v4095_v18 = vpop.f32.mrb[21].mxu1  ;;  %v4123_v19 = vpop.f32.mrb[45].mxu0  ;;  %v2235_v28 = vld [vmem:[#allocation2 + $0x65] sm:$0xff] }
 0x233   : > { %v5243_v20 = vpop.f32.mrb[22].mxu1  ;;  %v1133_v22 = vpop.f32.mrb[46].mxu0  ;;  %v2249_v35 = vpack.c.bf16 %v2236_v29, %v2235_v28 }
 0x234   : > { %v5246_v23 = vadd.f32 %v1133_v22, %v5182_v33  ;;  %v4096_v24 = vpop.f32.mrb[23].mxu1  ;;  %v4124_v25 = vpop.f32.mrb[47].mxu0 }
 0x235   : > { %v2441_v25 = vld [vmem:[#allocation2 + $0x46] sm:$0xff] }
 0x236   : > { %4358 = vmatmul.mubr.msk.bf16.gmra.mrb[128].mxu1 %vm748_vm3, %v5180_v31  ;;  %4386 = vmatmul.mubr.msk.bf16.gmra.mrb[152].mxu0 %vm748_vm3, %v2248_v21 }
 0x237   : > { %4361 = vmatprep.mubr.msk.bf16.mxu1 %vm4606_vm8, %v4603_v42  ;;  %4389 = vmatprep.mubr.msk.bf16.mxu0 %vm4606_vm8, %v4603_v42 }
 0x239   : > { %v5255_v30 = vpop.f32.mrb[24].mxu1  ;;  %v1138_v32 = vpop.f32.mrb[48].mxu0 }
 0x23a   : > { %v5258_v33 = vadd.f32 %v1138_v32, %v5191_v38  ;;  %v4099_v34 = vpop.f32.mrb[25].mxu1  ;;  %v4127_v31 = vpop.f32.mrb[49].mxu0  ;;  %v2238_v38 = vld [vmem:[#allocation2 + $0x7d] sm:$0xff] }
 0x23b   : > { %v5260_v36 = vpop.f32.mrb[26].mxu1  ;;  %v1141_v37 = vpop.f32.mrb[50].mxu0  ;;  %v2250_v57 = vpack.c.bf16 %v2238_v38, %v2237_v44  ;;  %v2443_v38 = vld [vmem:[#allocation2 + $0x56] sm:$0xff] }
 0x23c   : > { %v5263_v39 = vadd.f32 %v1141_v37, %v5195_v45  ;;  %v4100_v40 = vpop.f32.mrb[27].mxu1  ;;  %v4128_v41 = vpop.f32.mrb[51].mxu0 }
 0x23e   : > { %4362 = vmatmul.mubr.msk.bf16.gmra.mrb[132].mxu1 %vm748_vm3, %v2043_v50  ;;  %4390 = vmatmul.mubr.msk.bf16.gmra.mrb[156].mxu0 %vm748_vm3, %v2249_v35 }
 0x23f   : > { %4393 = vmatprep.mubr.msk.bf16.mxu0 %vm4606_vm8, %v4603_v42  ;;  %4417 = vmatprep.mubr.msk.bf16.mxu1 %vm4606_vm8, %v4603_v42 }
 0x241   : > { %v1146_v49 = vpop.f32.mrb[52].mxu0  ;;  %v1298_v51 = vpop.f32.mrb[28].mxu1 }
 0x242   : > { %v5272_v45 = vadd.f32 %v1146_v49, %v5206_v53  ;;  %v5275_v52 = vadd.f32 %v1298_v51, %v5193_v43  ;;  %v4131_v54 = vpop.f32.mrb[53].mxu0  ;;  %v4155_v55 = vpop.f32.mrb[29].mxu1  ;;  %v2239_v43 = vld [vmem:[#allocation2 + $0x85] sm:$0xff]  ;;  %v2240_v53 = vld [vmem:[#allocation2 + $0x8d] sm:$0xff] }
 0x243   : > { %v1149_v60 = vpop.f32.mrb[54].mxu0  ;;  %v1301_v61 = vpop.f32.mrb[30].mxu1  ;;  %v2251_v13 = vpack.c.bf16 %v2240_v53, %v2239_v43 }
 0x244   : > { %v5278_v63 = vadd.f32 %v1149_v60, %v5210_v59  ;;  %v5281_v0 = vadd.f32 %v1301_v61, %v5197_v48  ;;  %v4156_v1 = vpop.f32.mrb[31].mxu1  ;;  %v4132_v3 = vpop.f32.mrb[55].mxu0  ;;  %v2440_v59 = vld [vmem:[#allocation2 + $0x3e] sm:$0xff] }
 0x245   : > { %v2456_v14 = vpack.c.bf16 %v2440_v59, %v2439_v5 }
 0x246   : > { %4394 = vmatmul.mubr.msk.bf16.gmra.mrb[160].mxu0 %vm748_vm3, %v2250_v57  ;;  %4418 = vmatmul.mubr.msk.bf16.vlgmr.msra.gmra.mrb[136].mxu1 %vm748_vm3, %v2455_v58 }
 0x247   : > { %4397 = vmatprep.mubr.msk.bf16.mxu0 %vm4606_vm8, %v4603_v42  ;;  %4421 = vmatprep.mubr.msk.bf16.mxu1 %vm4606_vm8, %v4603_v42 }
 0x249   : > { %v1154_v6 = vpop.f32.mrb[56].mxu0  ;;  %v1306_v7 = vpop.f32.mrb[32].mxu1 }
 0x24a   : > { %v5290_v48 = vadd.f32 %v1154_v6, %v5221_v2  ;;  %v5293_v9 = vadd.f32 %v1306_v7, %v5208_v56  ;;  %v4135_v11 = vpop.f32.mrb[57].mxu0  ;;  %v4159_v12 = vpop.f32.mrb[33].mxu1  ;;  %v2241_v56 = vld [vmem:[#allocation2 + $0x95] sm:$0xff]  ;;  %v2242_v2 = vld [vmem:[#allocation2 + $0x9d] sm:$0xff] }
 0x24b   : > { %v1157_v16 = vpop.f32.mrb[58].mxu0  ;;  %v1309_v18 = vpop.f32.mrb[34].mxu1  ;;  %v2252_v34 = vpack.c.bf16 %v2242_v2, %v2241_v56 }
 0x24c   : > { %v5296_v19 = vadd.f32 %v1157_v16, %v5226_v8  ;;  %v5299_v21 = vadd.f32 %v1309_v18, %v5212_v62  ;;  %v4160_v22 = vpop.f32.mrb[35].mxu1  ;;  %v4136_v24 = vpop.f32.mrb[59].mxu0  ;;  %v2442_v8 = vld [vmem:[#allocation2 + $0x4e] sm:$0xff] }
 0x24d   : > { %v2457_v31 = vpack.c.bf16 %v2442_v8, %v2441_v25 }
 0x24e   : > { %4398 = vmatmul.mubr.msk.bf16.gmra.mrb[164].mxu0 %vm748_vm3, %v2251_v13  ;;  %4422 = vmatmul.mubr.msk.bf16.gmra.mrb[140].mxu1 %vm748_vm3, %v2456_v14 }
 0x24f   : > { %4401 = vmatprep.mubr.msk.bf16.mxu0 %vm4606_vm8, %v4603_v42  ;;  %4425 = vmatprep.mubr.msk.bf16.mxu1 %vm4606_vm8, %v4603_v42 }
 0x251   : > { %v1162_v26 = vpop.f32.mrb[60].mxu0  ;;  %v1314_v27 = vpop.f32.mrb[36].mxu1 }
 0x252   : > { %v5308_v62 = vadd.f32 %v1162_v26, %v5238_v15  ;;  %v5311_v28 = vadd.f32 %v1314_v27, %v5224_v4  ;;  %v4139_v29 = vpop.f32.mrb[61].mxu0  ;;  %v4163_v32 = vpop.f32.mrb[37].mxu1  ;;  %v2243_v4 = vld [vmem:[#allocation2 + $0xa5] sm:$0xff]  ;;  %v2244_v15 = vld [vmem:[#allocation2 + $0xad] sm:$0xff] }
 0x253   : > { %v1165_v50 = vpop.f32.mrb[62].mxu0  ;;  %v1317_v35 = vpop.f32.mrb[38].mxu1  ;;  %v2253_v55 = vpack.c.bf16 %v2244_v15, %v2243_v4 }
 0x254   : > { %v5314_v37 = vadd.f32 %v1165_v50, %v5243_v20  ;;  %v5317_v40 = vadd.f32 %v1317_v35, %v5229_v10  ;;  %v4164_v41 = vpop.f32.mrb[39].mxu1  ;;  %v4140_v44 = vpop.f32.mrb[63].mxu0  ;;  %v2444_v20 = vld [vmem:[#allocation2 + $0x5e] sm:$0xff] }
 0x255   : > { %v2458_v57 = vpack.c.bf16 %v2444_v20, %v2443_v38 }
 0x256   : > { %4402 = vmatmul.mubr.msk.bf16.gmra.mrb[168].mxu0 %vm748_vm3, %v2252_v34  ;;  %4426 = vmatmul.mubr.msk.bf16.gmra.mrb[144].mxu1 %vm748_vm3, %v2457_v31 }
 0x257   : > { %4405 = vmatprep.mubr.msk.bf16.mxu0 %vm4606_vm8, %v4603_v42  ;;  %4429 = vmatprep.mubr.msk.bf16.mxu1 %vm4606_vm8, %v4603_v42 }
 0x259   : > { %v1170_v46 = vpop.f32.mrb[64].mxu0  ;;  %v1322_v47 = vpop.f32.mrb[40].mxu1 }
 0x25a   : > { %v5326_v10 = vadd.f32 %v1170_v46, %v5255_v30  ;;  %v5329_v49 = vadd.f32 %v1322_v47, %v5241_v17  ;;  %v4143_v51 = vpop.f32.mrb[65].mxu0  ;;  %v4167_v54 = vpop.f32.mrb[41].mxu1  ;;  %v2445_v17 = vld [vmem:[#allocation2 + $0x66] sm:$0xff]  ;;  %v2446_v30 = vld [vmem:[#allocation2 + $0x6e] sm:$0xff] }
 0x25b   : > { %v1173_v58 = vpop.f32.mrb[66].mxu0  ;;  %v1325_v60 = vpop.f32.mrb[42].mxu1  ;;  %v2459_v7 = vpack.c.bf16 %v2446_v30, %v2445_v17 }
 0x25c   : > { %v5332_v61 = vadd.f32 %v1173_v58, %v5260_v36  ;;  %v5335_v1 = vadd.f32 %v1325_v60, %v5246_v23  ;;  %v4168_v3 = vpop.f32.mrb[43].mxu1  ;;  %v4144_v43 = vpop.f32.mrb[67].mxu0 }
 0x25e   : > { %4406 = vmatmul.mubr.msk.bf16.gmra.mrb[172].mxu0 %vm748_vm3, %v2253_v55  ;;  %4430 = vmatmul.mubr.msk.bf16.gmra.mrb[148].mxu1 %vm748_vm3, %v2458_v57 }
 0x25f   : > { %4433 = vmatprep.mubr.msk.bf16.mxu1 %vm4606_vm8, %v4603_v42 }
 0x261   : > { %v1330_v53 = vpop.f32.mrb[44].mxu1  ;;  %v1508_v5 = vpop.f32.mrb[68].mxu0 }
 0x262   : > { %v5342_v59 = vadd.f32 %v1330_v53, %v5258_v33  ;;  %v5345_v36 = vadd.f32 %v1508_v5, %v5275_v52  ;;  %v4171_v23 = vpop.f32.mrb[45].mxu1  ;;  %v4199_v6 = vpop.f32.mrb[69].mxu0  ;;  %v2447_v33 = vld [vmem:[#allocation2 + $0x76] sm:$0xff]  ;;  %v2448_v52 = vld [vmem:[#allocation2 + $0x7e] sm:$0xff] }
 0x263   : > { %v1333_v11 = vpop.f32.mrb[46].mxu1  ;;  %v1511_v12 = vpop.f32.mrb[70].mxu0  ;;  %v2460_v25 = vpack.c.bf16 %v2448_v52, %v2447_v33 }
 0x264   : > { %v5348_v13 = vadd.f32 %v1333_v11, %v5263_v39  ;;  %v5351_v14 = vadd.f32 %v1511_v12, %v5281_v0  ;;  %v4172_v16 = vpop.f32.mrb[47].mxu1  ;;  %v4200_v18 = vpop.f32.mrb[71].mxu0 }
 0x266   : > { %4434 = vmatmul.mubr.msk.bf16.gmra.mrb[152].mxu1 %vm748_vm3, %v2459_v7 }
 0x267   : > { %4437 = vmatprep.mubr.msk.bf16.mxu1 %vm4606_vm8, %v4603_v42 }
 0x269   : > { %v1338_v22 = vpop.f32.mrb[48].mxu1  ;;  %v1516_v24 = vpop.f32.mrb[72].mxu0 }
 0x26a   : > { %v5357_v56 = vadd.f32 %v1338_v22, %v5272_v45  ;;  %v5360_v39 = vadd.f32 %v1516_v24, %v5293_v9  ;;  %v4175_v2 = vpop.f32.mrb[49].mxu1  ;;  %v4203_v0 = vpop.f32.mrb[73].mxu0  ;;  %v2449_v45 = vld [vmem:[#allocation2 + $0x86] sm:$0xff]  ;;  %v2450_v9 = vld [vmem:[#allocation2 + $0x8e] sm:$0xff] }
 0x26b   : > { %v1341_v8 = vpop.f32.mrb[50].mxu1  ;;  %v1519_v26 = vpop.f32.mrb[74].mxu0 }
 0x26c   : > { %v5363_v27 = vadd.f32 %v1341_v8, %v5278_v63  ;;  %v5366_v29 = vadd.f32 %v1519_v26, %v5299_v21  ;;  %v4176_v32 = vpop.f32.mrb[51].mxu1  ;;  %v4204_v34 = vpop.f32.mrb[75].mxu0  ;;  %v2461_v21 = vpack.c.bf16 %v2450_v9, %v2449_v45 }
 0x26e   : > { %4438 = vmatmul.mubr.msk.bf16.gmra.mrb[156].mxu1 %vm748_vm3, %v2460_v25 }
 0x26f   : > { %4441 = vmatprep.mubr.msk.bf16.mxu1 %vm4606_vm8, %v4603_v42 }
 0x271   : > { %v1346_v31 = vpop.f32.mrb[52].mxu1  ;;  %v1524_v50 = vpop.f32.mrb[76].mxu0 }
 0x272   : > { %v1381_v35 = vadd.f32 %v1346_v31, %v5290_v48  ;;  %v5373_v41 = vadd.f32 %v1524_v50, %v5311_v28  ;;  %v4179_v63 = vpop.f32.mrb[53].mxu1  ;;  %v4207_v44 = vpop.f32.mrb[77].mxu0  ;;  %v2451_v48 = vld [vmem:[#allocation2 + $0x96] sm:$0xff]  ;;  %v2452_v28 = vld [vmem:[#allocation2 + $0x9e] sm:$0xff] }
 0x273   : > { %v1349_v4 = vpop.f32.mrb[54].mxu1  ;;  %v1527_v15 = vpop.f32.mrb[78].mxu0 }
 0x274   : > { %v1382_v38 = vadd.f32 %v1349_v4, %v5296_v19  ;;  %v5377_v20 = vadd.f32 %v1527_v15, %v5317_v40  ;;  %v4180_v46 = vpop.f32.mrb[55].mxu1  ;;  %v4208_v47 = vpop.f32.mrb[79].mxu0  ;;  %v2462_v40 = vpack.c.bf16 %v2452_v28, %v2451_v48 }
 0x276   : > { %4442 = vmatmul.mubr.msk.bf16.gmra.mrb[160].mxu1 %vm748_vm3, %v2461_v21 }
 0x277   : > { %4445 = vmatprep.mubr.msk.bf16.mxu1 %vm4606_vm8, %v4603_v42 }
 0x279   : > { %v1354_v51 = vpop.f32.mrb[56].mxu1  ;;  %v1532_v54 = vpop.f32.mrb[80].mxu0 }
 0x27a   : > { %v1383_v55 = vadd.f32 %v1354_v51, %v5308_v62  ;;  %v5384_v57 = vadd.f32 %v1532_v54, %v5329_v49  ;;  %v4183_v19 = vpop.f32.mrb[57].mxu1  ;;  %v4211_v58 = vpop.f32.mrb[81].mxu0  ;;  %v2453_v62 = vld [vmem:[#allocation2 + $0xa6] sm:$0xff]  ;;  %v2454_v49 = vld [vmem:[#allocation2 + $0xae] sm:$0xff] }
 0x27b   : > { %v1357_v60 = vpop.f32.mrb[58].mxu1  ;;  %v1535_v3 = vpop.f32.mrb[82].mxu0  ;;  %v2463_v12 = vpack.c.bf16 %v2454_v49, %v2453_v62 }
 0x27c   : > { %v1384_v43 = vadd.f32 %v1357_v60, %v5314_v37  ;;  %v5388_v17 = vadd.f32 %v1535_v3, %v5335_v1  ;;  %v4184_v30 = vpop.f32.mrb[59].mxu1  ;;  %v4212_v53 = vpop.f32.mrb[83].mxu0 }
 0x27e   : > { %4446 = vmatmul.mubr.msk.bf16.gmra.mrb[164].mxu1 %vm748_vm3, %v2462_v40 }
 0x27f   : > { %4449 = vmatprep.mubr.msk.bf16.mxu1 %vm4606_vm8, %v4603_v42 }
 0x281   : > { %v1362_v5 = vpop.f32.mrb[60].mxu1  ;;  %v1540_v23 = vpop.f32.mrb[84].mxu0 }
 0x282   : > { %v1385_v6 = vadd.f32 %v1362_v5, %v5326_v10  ;;  %v1587_v7 = vadd.f32 %v1540_v23, %v5342_v59  ;;  %v4187_v11 = vpop.f32.mrb[61].mxu1  ;;  %v4215_v37 = vpop.f32.mrb[85].mxu0 }
 0x283   : > { %v1365_v1 = vpop.f32.mrb[62].mxu1  ;;  %v1543_v16 = vpop.f32.mrb[86].mxu0 }
 0x284   : > { %v1386_v18 = vadd.f32 %v1365_v1, %v5332_v61  ;;  %v1588_v33 = vadd.f32 %v1543_v16, %v5348_v13  ;;  %v4188_v52 = vpop.f32.mrb[63].mxu1  ;;  %v4216_v22 = vpop.f32.mrb[87].mxu0 }
 0x286   : > { %4450 = vmatmul.mubr.msk.bf16.gmra.mrb[168].mxu1 %vm748_vm3, %v2463_v12 }
 0x289   : > { %v1548_v42 = vpop.f32.mrb[88].mxu0  ;;  %v1718_v24 = vpop.f32.mrb[64].mxu1 }
 0x28a   : > { %v1589_v2 = vadd.f32 %v1548_v42, %v5357_v56  ;;  %v1789_v10 = vadd.f32 %v1718_v24, %v5345_v36  ;;  %v4219_v59 = vpop.f32.mrb[89].mxu0  ;;  %v4243_v0 = vpop.f32.mrb[65].mxu1 }
 0x28b   : > { %v1551_v25 = vpop.f32.mrb[90].mxu0  ;;  %v1721_v8 = vpop.f32.mrb[66].mxu1 }
 0x28c   : > { %v1590_v26 = vadd.f32 %v1551_v25, %v5363_v27  ;;  %v1790_v61 = vadd.f32 %v1721_v8, %v5351_v14  ;;  %v4244_v32 = vpop.f32.mrb[67].mxu1  ;;  %v4220_v13 = vpop.f32.mrb[91].mxu0 }
 0x291   : > { %v1556_v34 = vpop.f32.mrb[92].mxu0  ;;  %v1726_v45 = vpop.f32.mrb[68].mxu1 }
 0x292   : > { %v1591_v9 = vadd.f32 %v1556_v34, %v1381_v35  ;;  %v1791_v31 = vadd.f32 %v1726_v45, %v5360_v39  ;;  %v4223_v50 = vpop.f32.mrb[93].mxu0  ;;  %v4247_v63 = vpop.f32.mrb[69].mxu1 }
 0x293   : > { %v1559_v56 = vpop.f32.mrb[94].mxu0  ;;  %v1729_v44 = vpop.f32.mrb[70].mxu1 }
 0x294   : > { %v1592_v36 = vadd.f32 %v1559_v56, %v1382_v38  ;;  %v1792_v21 = vadd.f32 %v1729_v44, %v5366_v29  ;;  %v4248_v4 = vpop.f32.mrb[71].mxu1  ;;  %v4224_v15 = vpop.f32.mrb[95].mxu0 }
 0x299   : > { %v1564_v46 = vpop.f32.mrb[96].mxu0  ;;  %v1734_v27 = vpop.f32.mrb[72].mxu1 }
 0x29a   : > { %v1593_v47 = vadd.f32 %v1564_v46, %v1383_v55  ;;  %v1793_v14 = vadd.f32 %v1734_v27, %v5373_v41  ;;  %v4227_v48 = vpop.f32.mrb[97].mxu0  ;;  %v4251_v28 = vpop.f32.mrb[73].mxu1 }
 0x29b   : > { %v1567_v51 = vpop.f32.mrb[98].mxu0  ;;  %v1737_v35 = vpop.f32.mrb[74].mxu1 }
 0x29c   : > { %v1594_v54 = vadd.f32 %v1567_v51, %v1384_v43  ;;  %v1794_v39 = vadd.f32 %v1737_v35, %v5377_v20  ;;  %v4252_v19 = vpop.f32.mrb[75].mxu1  ;;  %v4228_v58 = vpop.f32.mrb[99].mxu0 }
 0x2a1   : > { %v1572_v40 = vpop.f32.mrb[100].mxu0  ;;  %v1742_v38 = vpop.f32.mrb[76].mxu1 }
 0x2a2   : > { %v1595_v60 = vadd.f32 %v1572_v40, %v1385_v6  ;;  %v1795_v29 = vadd.f32 %v1742_v38, %v5384_v57  ;;  %v4231_v3 = vpop.f32.mrb[101].mxu0  ;;  %v4255_v30 = vpop.f32.mrb[77].mxu1 }
 0x2a3   : > { %v1575_v53 = vpop.f32.mrb[102].mxu0  ;;  %v1745_v55 = vpop.f32.mrb[78].mxu1 }
 0x2a4   : > { %v1596_v62 = vadd.f32 %v1575_v53, %v1386_v18  ;;  %v1796_v41 = vadd.f32 %v1745_v55, %v5388_v17  ;;  %v4256_v49 = vpop.f32.mrb[79].mxu1  ;;  %v4232_v5 = vpop.f32.mrb[103].mxu0 }
 0x2a9   : > { %v1750_v23 = vpop.f32.mrb[80].mxu1  ;;  %v1928_v43 = vpop.f32.mrb[104].mxu0 }
 0x2aa   : > { %v1797_v11 = vadd.f32 %v1750_v23, %v1587_v7  ;;  %v1999_v20 = vadd.f32 %v1928_v43, %v1789_v10  ;;  %v4259_v37 = vpop.f32.mrb[81].mxu1  ;;  %v4287_v12 = vpop.f32.mrb[105].mxu0 }
 0x2ab   : > { %v1753_v1 = vpop.f32.mrb[82].mxu1  ;;  %v1931_v16 = vpop.f32.mrb[106].mxu0 }
 0x2ac   : > { %v1798_v6 = vadd.f32 %v1753_v1, %v1588_v33  ;;  %v2000_v52 = vadd.f32 %v1931_v16, %v1790_v61  ;;  %v4260_v57 = vpop.f32.mrb[83].mxu1  ;;  %v4288_v22 = vpop.f32.mrb[107].mxu0 }
 0x2b1   : > { %v1758_v42 = vpop.f32.mrb[84].mxu1  ;;  %v1936_v24 = vpop.f32.mrb[108].mxu0 }
 0x2b2   : > { %v1799_v59 = vadd.f32 %v1758_v42, %v1589_v2  ;;  %v2001_v18 = vadd.f32 %v1936_v24, %v1791_v31  ;;  %v4263_v0 = vpop.f32.mrb[85].mxu1  ;;  %v4291_v17 = vpop.f32.mrb[109].mxu0 }
 0x2b3   : > { %v1761_v25 = vpop.f32.mrb[86].mxu1  ;;  %v1939_v8 = vpop.f32.mrb[110].mxu0 }
 0x2b4   : > { %v1800_v32 = vadd.f32 %v1761_v25, %v1590_v26  ;;  %v2002_v13 = vadd.f32 %v1939_v8, %v1792_v21  ;;  %v4264_v7 = vpop.f32.mrb[87].mxu1  ;;  %v4292_v10 = vpop.f32.mrb[111].mxu0 }
 0x2b9   : > { %v1766_v34 = vpop.f32.mrb[88].mxu1  ;;  %v1944_v45 = vpop.f32.mrb[112].mxu0 }
 0x2ba   : > { %v1801_v50 = vadd.f32 %v1766_v34, %v1591_v9  ;;  %v2003_v63 = vadd.f32 %v1944_v45, %v1793_v14  ;;  %v4267_v33 = vpop.f32.mrb[89].mxu1  ;;  %v4295_v61 = vpop.f32.mrb[113].mxu0 }
 0x2bb   : > { %v1769_v56 = vpop.f32.mrb[90].mxu1  ;;  %v1947_v44 = vpop.f32.mrb[114].mxu0 }
 0x2bc   : > { %v1802_v4 = vadd.f32 %v1769_v56, %v1592_v36  ;;  %v2004_v15 = vadd.f32 %v1947_v44, %v1794_v39  ;;  %v4268_v2 = vpop.f32.mrb[91].mxu1  ;;  %v4296_v31 = vpop.f32.mrb[115].mxu0 }
 0x2c1   : > { %v1774_v46 = vpop.f32.mrb[92].mxu1  ;;  %v1952_v27 = vpop.f32.mrb[116].mxu0 }
 0x2c2   : > { %v1803_v48 = vadd.f32 %v1774_v46, %v1593_v47  ;;  %v2005_v28 = vadd.f32 %v1952_v27, %v1795_v29  ;;  %v4271_v26 = vpop.f32.mrb[93].mxu1  ;;  %v4299_v21 = vpop.f32.mrb[117].mxu0 }
 0x2c3   : > { %v1777_v51 = vpop.f32.mrb[94].mxu1  ;;  %v1955_v35 = vpop.f32.mrb[118].mxu0 }
 0x2c4   : > { %v1804_v19 = vadd.f32 %v1777_v51, %v1594_v54  ;;  %v2006_v58 = vadd.f32 %v1955_v35, %v1796_v41  ;;  %v4272_v9 = vpop.f32.mrb[95].mxu1  ;;  %v4300_v14 = vpop.f32.mrb[119].mxu0 }
 0x2c9   : > { %v1782_v40 = vpop.f32.mrb[96].mxu1  ;;  %v1960_v38 = vpop.f32.mrb[120].mxu0 }
 0x2ca   : > { %v1805_v3 = vadd.f32 %v1782_v40, %v1595_v60  ;;  %v2007_v30 = vadd.f32 %v1960_v38, %v1797_v11  ;;  %v4275_v36 = vpop.f32.mrb[97].mxu1  ;;  %v4303_v39 = vpop.f32.mrb[121].mxu0 }
 0x2cb   : > { %v1785_v53 = vpop.f32.mrb[98].mxu1  ;;  %v1963_v55 = vpop.f32.mrb[122].mxu0 }
 0x2cc   : > { %v1806_v49 = vadd.f32 %v1785_v53, %v1596_v62  ;;  %v2008_v5 = vadd.f32 %v1963_v55, %v1798_v6  ;;  %v4276_v47 = vpop.f32.mrb[99].mxu1  ;;  %v4304_v29 = vpop.f32.mrb[123].mxu0 }
 0x2d1   : > { %v1968_v23 = vpop.f32.mrb[124].mxu0  ;;  %v2138_v43 = vpop.f32.mrb[100].mxu1 }
 0x2d2   : > { %v2009_v37 = vadd.f32 %v1968_v23, %v1799_v59  ;;  %v2209_v12 = vadd.f32 %v2138_v43, %v1999_v20  ;;  %v4307_v54 = vpop.f32.mrb[125].mxu0  ;;  %v4331_v41 = vpop.f32.mrb[101].mxu1 }
 0x2d3   : > { %v1971_v1 = vpop.f32.mrb[126].mxu0  ;;  %v2141_v16 = vpop.f32.mrb[102].mxu1 }
 0x2d4   : > { %v2010_v57 = vadd.f32 %v1971_v1, %v1800_v32  ;;  %v2210_v22 = vadd.f32 %v2141_v16, %v2000_v52  ;;  %v4332_v60 = vpop.f32.mrb[103].mxu1  ;;  %v4308_v11 = vpop.f32.mrb[127].mxu0 }
 0x2d9   : > { %v1976_v42 = vpop.f32.mrb[128].mxu0  ;;  %v2146_v24 = vpop.f32.mrb[104].mxu1 }
 0x2da   : > { %v2011_v0 = vadd.f32 %v1976_v42, %v1801_v50  ;;  %v2211_v17 = vadd.f32 %v2146_v24, %v2001_v18  ;;  %v4311_v62 = vpop.f32.mrb[129].mxu0  ;;  %v4335_v6 = vpop.f32.mrb[105].mxu1 }
 0x2db   : > { %v1979_v25 = vpop.f32.mrb[130].mxu0  ;;  %v2149_v8 = vpop.f32.mrb[106].mxu1 }
 0x2dc   : > { %v2012_v7 = vadd.f32 %v1979_v25, %v1802_v4  ;;  %v2212_v10 = vadd.f32 %v2149_v8, %v2002_v13  ;;  %v4336_v59 = vpop.f32.mrb[107].mxu1  ;;  %v4312_v20 = vpop.f32.mrb[131].mxu0 }
 0x2e1   : > { %v1984_v34 = vpop.f32.mrb[132].mxu0  ;;  %v2154_v45 = vpop.f32.mrb[108].mxu1 }
 0x2e2   : > { %v2013_v33 = vadd.f32 %v1984_v34, %v1803_v48  ;;  %v2213_v61 = vadd.f32 %v2154_v45, %v2003_v63  ;;  %v4315_v32 = vpop.f32.mrb[133].mxu0  ;;  %v4339_v52 = vpop.f32.mrb[109].mxu1 }
 0x2e3   : > { %v1987_v56 = vpop.f32.mrb[134].mxu0  ;;  %v2157_v44 = vpop.f32.mrb[110].mxu1 }
 0x2e4   : > { %v2014_v2 = vadd.f32 %v1987_v56, %v1804_v19  ;;  %v2214_v31 = vadd.f32 %v2157_v44, %v2004_v15  ;;  %v4340_v50 = vpop.f32.mrb[111].mxu1  ;;  %v4316_v18 = vpop.f32.mrb[135].mxu0 }
 0x2e9   : > { %v1992_v46 = vpop.f32.mrb[136].mxu0  ;;  %v2162_v27 = vpop.f32.mrb[112].mxu1 }
 0x2ea   : > { %v2015_v26 = vadd.f32 %v1992_v46, %v1805_v3  ;;  %v2215_v21 = vadd.f32 %v2162_v27, %v2005_v28  ;;  %v4319_v4 = vpop.f32.mrb[137].mxu0  ;;  %v4343_v13 = vpop.f32.mrb[113].mxu1 }
 0x2eb   : > { %v1995_v51 = vpop.f32.mrb[138].mxu0  ;;  %v2165_v35 = vpop.f32.mrb[114].mxu1 }
 0x2ec   : > { %v2016_v9 = vadd.f32 %v1995_v51, %v1806_v49  ;;  %v2216_v14 = vadd.f32 %v2165_v35, %v2006_v58  ;;  %v4344_v48 = vpop.f32.mrb[115].mxu1  ;;  %v4320_v63 = vpop.f32.mrb[139].mxu0 }
 0x2f1   : > { %v2170_v40 = vpop.f32.mrb[116].mxu1  ;;  %v2348_v38 = vpop.f32.mrb[140].mxu0 }
 0x2f2   : > { %v2217_v36 = vadd.f32 %v2170_v40, %v2007_v30  ;;  %v5408_v39 = vadd.f32 %v2348_v38, %v2209_v12  ;;  %v4347_v15 = vpop.f32.mrb[117].mxu1  ;;  %v4375_v19 = vpop.f32.mrb[141].mxu0  ;;  %v5441_v40 = vld [vmem:[%s5621_s4] ss:$0 sm:$0xff] }
 0x2f3   : > { %v2173_v53 = vpop.f32.mrb[118].mxu1  ;;  %v2351_v55 = vpop.f32.mrb[142].mxu0 }
 0x2f4   : > { %v2218_v47 = vadd.f32 %v2173_v53, %v2008_v5  ;;  %v5410_v3 = vadd.f32 %v2351_v55, %v2210_v22  ;;  %v4348_v28 = vpop.f32.mrb[119].mxu1  ;;  %v4376_v29 = vpop.f32.mrb[143].mxu0 }
 0x2f9   : > { %v2178_v23 = vpop.f32.mrb[120].mxu1  ;;  %v2356_v43 = vpop.f32.mrb[144].mxu0 }
 0x2fa   : > { %v2219_v49 = vadd.f32 %v2178_v23, %v2009_v37  ;;  %v5412_v58 = vadd.f32 %v2356_v43, %v2211_v17  ;;  %v4351_v54 = vpop.f32.mrb[121].mxu1  ;;  %v4379_v41 = vpop.f32.mrb[145].mxu0 }
 0x2fb   : > { %v2181_v1 = vpop.f32.mrb[122].mxu1  ;;  %v2359_v30 = vpop.f32.mrb[146].mxu0 }
 0x2fc   : > { %v2220_v12 = vadd.f32 %v2181_v1, %v2010_v57  ;;  %v5414_v16 = vadd.f32 %v2359_v30, %v2212_v10  ;;  %v4352_v60 = vpop.f32.mrb[123].mxu1  ;;  %v4380_v11 = vpop.f32.mrb[147].mxu0 }
 0x301   : > { %v2186_v42 = vpop.f32.mrb[124].mxu1  ;;  %v2364_v5 = vpop.f32.mrb[148].mxu0 }
 0x302   : > { %v5416_v22 = vadd.f32 %v2186_v42, %v2011_v0  ;;  %v5418_v24 = vadd.f32 %v2364_v5, %v2213_v61  ;;  %v4355_v62 = vpop.f32.mrb[125].mxu1  ;;  %v4383_v6 = vpop.f32.mrb[149].mxu0 }
 0x303   : > { %v2189_v37 = vpop.f32.mrb[126].mxu1  ;;  %v2367_v17 = vpop.f32.mrb[150].mxu0 }
 0x304   : > { %v2222_v25 = vadd.f32 %v2189_v37, %v2012_v7  ;;  %v5420_v8 = vadd.f32 %v2367_v17, %v2214_v31  ;;  %v4356_v59 = vpop.f32.mrb[127].mxu1  ;;  %v4384_v20 = vpop.f32.mrb[151].mxu0 }
 0x309   : > { %v2194_v57 = vpop.f32.mrb[128].mxu1  ;;  %v2372_v10 = vpop.f32.mrb[152].mxu0 }
 0x30a   : > { %v5422_v34 = vadd.f32 %v2194_v57, %v2013_v33  ;;  %v5424_v45 = vadd.f32 %v2372_v10, %v2215_v21  ;;  %v4359_v32 = vpop.f32.mrb[129].mxu1  ;;  %v4387_v0 = vpop.f32.mrb[153].mxu0 }
 0x30b   : > { %v2197_v52 = vpop.f32.mrb[130].mxu1  ;;  %v2375_v61 = vpop.f32.mrb[154].mxu0 }
 0x30c   : > { %v5426_v56 = vadd.f32 %v2197_v52, %v2014_v2  ;;  %v5428_v44 = vadd.f32 %v2375_v61, %v2216_v14  ;;  %v4360_v50 = vpop.f32.mrb[131].mxu1  ;;  %v4388_v7 = vpop.f32.mrb[155].mxu0 }
 0x311   : > { %v2202_v31 = vpop.f32.mrb[132].mxu1  ;;  %v2380_v18 = vpop.f32.mrb[156].mxu0 }
 0x312   : > { %v5430_v46 = vadd.f32 %v2202_v31, %v2015_v26  ;;  %v5432_v27 = vadd.f32 %v2380_v18, %v2217_v36  ;;  %v4363_v33 = vpop.f32.mrb[133].mxu1  ;;  %v4391_v4 = vpop.f32.mrb[157].mxu0  ;;  %v4607_v26 = vmov 1983009808   ;;  %v2712_v36 = vlaneseq }
 0x313   : > { %v2205_v21 = vpop.f32.mrb[134].mxu1  ;;  %v2383_v13 = vpop.f32.mrb[158].mxu0  ;;  %v2710_v38 = vunpack.c.l.s4 %v4607_v26 }
 0x314   : > { %v5434_v51 = vadd.f32 %v2205_v21, %v2016_v9  ;;  %v5436_v35 = vadd.f32 %v2383_v13, %v2218_v47  ;;  %v4364_v2 = vpop.f32.mrb[135].mxu1  ;;  %v4392_v48 = vpop.f32.mrb[159].mxu0  ;;  %v2713_v1 = vshrl.u32 %v2712_v36, 7 }
 0x315   : > { %v2711_v41 = vunpack.c.0.s8 %v2710_v38 }
 0x319   : > { %v2388_v14 = vpop.f32.mrb[160].mxu0  ;;  %v2558_v63 = vpop.f32.mrb[136].mxu1 }
 0x31a   : > { %v5443_v15 = vadd.f32 %v2388_v14, %v2219_v49  ;;  %v2629_v19 = vadd.f32 %v2558_v63, %v5408_v39  ;;  %v4395_v9 = vpop.f32.mrb[161].mxu0  ;;  %v4419_v53 = vpop.f32.mrb[137].mxu1  ;;  %v5451_v39 = vsub.s32 %v2711_v41, %v2713_v1 }
 0x31b   : > { %v2391_v55 = vpop.f32.mrb[162].mxu0  ;;  %v2561_v47 = vpop.f32.mrb[138].mxu1 }
 0x31c   : > { %v2654_v28 = vadd.f32 %v5441_v40, %v2629_v19  ;;  %v5447_v29 = vadd.f32 %v2391_v55, %v2220_v12  ;;  %v2630_v23 = vadd.f32 %v2561_v47, %v5410_v3  ;;  %v4420_v43 = vpop.f32.mrb[139].mxu1  ;;  %v4396_v54 = vpop.f32.mrb[163].mxu0 }
 0x31e   : > { %v2672_v30 = vmax.f32 %v2654_v28, 0.0  ;;  %v2655_v49 = vadd.f32 %v5441_v40, %v2630_v23 }
 0x320   : > { %v2673_v60 = vmax.f32 %v2655_v49, 0.0  ;;  %v2708_v11 = vcombine.high %v2672_v30, %v2672_v30  ;;  %v2715_v0 = vrot.slane %v2672_v30, %v5451_v39 }
 0x321   : > { %v2396_v42 = vpop.f32.mrb[164].mxu0  ;;  %v2566_v5 = vpop.f32.mrb[140].mxu1 }
 0x322   : > { %v4399_v62 = vpop.f32.mrb[165].mxu0  ;;  %v4423_v6 = vpop.f32.mrb[141].mxu1  ;;  %v2725_v37 = vcombine.high %v2673_v60, %v2673_v60  ;;  %v5454_v12 = vadd.f32 %v2396_v42, %v5416_v22  ;;  %v2631_v3 = vadd.f32 %v2566_v5, %v5412_v58  ;;  %v2722_v52 = vrot.slane %v2708_v11, %v5451_v39 }
 0x323   : > { %v2399_v17 = vpop.f32.mrb[166].mxu0  ;;  %v2569_v59 = vpop.f32.mrb[142].mxu1  ;;  %v2732_v22 = vrot.slane %v2673_v60, %v5451_v39  ;;  %v2723_v31 = vcombine.high %v2715_v0, %v2715_v0 }
 0x324   : > { %v5457_v20 = vadd.f32 %v2399_v17, %v2222_v25  ;;  %v2632_v57 = vadd.f32 %v2569_v59, %v5414_v16  ;;  %v4424_v10 = vpop.f32.mrb[143].mxu1  ;;  %v4400_v32 = vpop.f32.mrb[167].mxu0  ;;  %v2656_v61 = vadd.f32 %v5441_v40, %v2631_v3  ;;  %v5466_v58 = vrot.slane %v2725_v37, %v5451_v39 }
 0x325   : > { %v2724_v33 = vcombine.high %v2722_v52, %v2722_v52  ;;  %v2740_v38 = vcombine.high %v2732_v22, %v2732_v22 }
 0x326   : > { %v2657_v50 = vadd.f32 %v5441_v40, %v2632_v57  ;;  %v2674_v7 = vmax.f32 %v2656_v61, 0.0  ;;  %v2741_v9 = vcombine.high %v5466_v58, %v5466_v58 }
 0x328   : > { %v2675_v25 = vmax.f32 %v2657_v50, 0.0  ;;  %v2742_v18 = vcombine.high %v2674_v7, %v2674_v7  ;;  %v2749_v16 = vrot.slane %v2674_v7, %v5451_v39 }
 0x329   : > { %v2404_v4 = vpop.f32.mrb[168].mxu0  ;;  %v2574_v21 = vpop.f32.mrb[144].mxu1 }
 0x32a   : > { %v2759_v13 = vcombine.high %v2675_v25, %v2675_v25  ;;  %v2766_v2 = vrot.slane %v2675_v25, %v5451_v39  ;;  %v5471_v48 = vadd.f32 %v2404_v4, %v5422_v34  ;;  %v2633_v14 = vadd.f32 %v2574_v21, %v5418_v24  ;;  %v4403_v63 = vpop.f32.mrb[169].mxu0  ;;  %v4427_v26 = vpop.f32.mrb[145].mxu1 }
 0x32b   : > { %v2756_v36 = vrot.slane %v2742_v18, %v5451_v39  ;;  %v2757_v19 = vcombine.high %v2749_v16, %v2749_v16  ;;  %v2407_v53 = vpop.f32.mrb[170].mxu0  ;;  %v5477_v55 = vpop.f32.mrb[146].mxu1 }
 0x32c   : > { %v2773_v47 = vrot.slane %v2759_v13, %v5451_v39  ;;  %v2774_v28 = vcombine.high %v2766_v2, %v2766_v2  ;;  %v3077_v23 = vmax.f32 %v2724_v33, %v2766_v2  ;;  %v2658_v34 = vadd.f32 %v5441_v40, %v2633_v14  ;;  %v4428_v43 = vpop.f32.mrb[147].mxu1  ;;  %v4404_v24 = vpop.f32.mrb[171].mxu0 }
 0x32d   : > { %v2758_v54 = vcombine.high %v2756_v36, %v2756_v36  ;;  %v3074_v41 = vmax.f32 %v2715_v0, %v2757_v19  ;;  %v3075_v1 = vmax.f32 %v2723_v31, %v2756_v36  ;;  %v5482_v30 = vadd.f32 %v2407_v53, %v5426_v56 }
 0x32e   : > { %v2775_v49 = vcombine.high %v2773_v47, %v2773_v47  ;;  %v3078_v60 = vmax.f32 %v2732_v22, %v2774_v28  ;;  %v3079_v11 = vmax.f32 %v2740_v38, %v2773_v47  ;;  %v3802_v42 = vrot.slane %v3077_v23, 9 }
 0x32f   : > { %v3076_v5 = vmax.f32 %v2722_v52, %v2758_v54  ;;  %v3799_v62 = vrot.slane %v3074_v41, 9  ;;  %v3800_v6 = vrot.slane %v3075_v1, 9  ;;  %v2676_v37 = vmax.f32 %v2658_v34, 0.0 }
 0x330   : > { %v3080_v3 = vmax.f32 %v5466_v58, %v2775_v49  ;;  %v3803_v17 = vrot.slane %v3078_v60, 9  ;;  %v3804_v59 = vrot.slane %v3079_v11, 9  ;;  %v3237_v57 = vmax.f32 %v3077_v23, %v3802_v42 }
 0x331   : > { %v3801_v10 = vrot.slane %v3076_v5, 9  ;;  %v3234_v32 = vmax.f32 %v3074_v41, %v3799_v62  ;;  %v3235_v0 = vmax.f32 %v3075_v1, %v3800_v6  ;;  %v2776_v56 = vcombine.high %v2676_v37, %v2676_v37  ;;  %v2412_v61 = vpop.f32.mrb[172].mxu0  ;;  %v2582_v50 = vpop.f32.mrb[148].mxu1 }
 0x332   : > { %v3805_v22 = vrot.slane %v3080_v3, 9  ;;  %v3238_v7 = vmax.f32 %v3078_v60, %v3803_v17  ;;  %v3239_v25 = vmax.f32 %v3079_v11, %v3804_v59  ;;  %v3869_v52 = vpack.c.bf16 %v3237_v57, %v3237_v57  ;;  %v4407_v31 = vpop.f32.mrb[173].mxu0  ;;  %v4431_v18 = vpop.f32.mrb[149].mxu1 }
 0x333   : > { %v3236_v16 = vmax.f32 %v3076_v5, %v3801_v10  ;;  %v3866_v33 = vpack.c.bf16 %v3234_v32, %v3234_v32  ;;  %v3867_v4 = vpack.c.bf16 %v3235_v0, %v3235_v0  ;;  %v2783_v21 = vrot.slane %v2676_v37, %v5451_v39  ;;  %v2415_v13 = vpop.f32.mrb[174].mxu0  ;;  %v2585_v2 = vpop.f32.mrb[150].mxu1 }
 0x334   : > { %v3240_v14 = vmax.f32 %v3080_v3, %v3805_v22  ;;  %v3870_v63 = vpack.c.bf16 %v3238_v7, %v3238_v7  ;;  %v3871_v26 = vpack.c.bf16 %v3239_v25, %v3239_v25  ;;  %v3397_v38 = vunpack.c.l.b16 %v3869_v52  ;;  %v4432_v36 = vpop.f32.mrb[151].mxu1  ;;  %v4408_v19 = vpop.f32.mrb[175].mxu0 }
 0x335   : > { %v3868_v53 = vpack.c.bf16 %v3236_v16, %v3236_v16  ;;  %v3394_v47 = vunpack.c.l.b16 %v3866_v33  ;;  %v3395_v28 = vunpack.c.l.b16 %v3867_v4  ;;  %v5487_v23 = vrot.slane %v2776_v56, %v5451_v39 }
 0x336   : > { %v3872_v34 = vpack.c.bf16 %v3240_v14, %v3240_v14  ;;  %v3398_v43 = vunpack.c.l.b16 %v3870_v63  ;;  %v3399_v24 = vunpack.c.l.b16 %v3871_v26  ;;  %v3432_v54 = vrot.slane %v3397_v38, 5 }
 0x337   : > { %v3396_v41 = vunpack.c.l.b16 %v3868_v53  ;;  %v3426_v1 = vrot.slane %v3395_v28, 7  ;;  %v3081_v49 = vmax.f32 %v2741_v9, %v2783_v21  ;;  %v2634_v60 = vadd.f32 %v5477_v55, %v5420_v8 }
 0x338   : > { %v3400_v11 = vunpack.c.l.b16 %v3872_v34  ;;  %v3435_v42 = vrot.slane %v3398_v43, 4  ;;  %v3438_v5 = vrot.slane %v3399_v24, 3  ;;  %v5495_v62 = vadd.f32 %v2412_v61, %v5430_v46 }
 0x339   : > { %v3428_v6 = vsel %vm3427_vm9, %v3426_v1, %v3394_v47  ;;  %v3429_v37 = vrot.slane %v3396_v41, 6  ;;  %v3806_v3 = vrot.slane %v3081_v49, 9  ;;  %v2659_v17 = vadd.f32 %v5441_v40, %v2634_v60  ;;  %v2590_v59 = vpop.f32.mrb[152].mxu1 }
 0x33a   : > { %v3441_v57 = vrot.slane %v3400_v11, 2  ;;  %v2635_v58 = vadd.f32 %v2582_v50, %v5424_v45  ;;  %v5501_v9 = vadd.f32 %v2415_v13, %v5434_v51  ;;  %v2636_v8 = vadd.f32 %v2585_v2, %v5428_v44  ;;  %v4435_v55 = vpop.f32.mrb[153].mxu1 }
 0x33b   : > { %v3431_v10 = vsel %vm3430_vm10, %v3429_v37, %v3428_v6  ;;  %v3241_v46 = vmax.f32 %v3081_v49, %v3806_v3  ;;  %v2677_v32 = vmax.f32 %v2659_v17, 0.0  ;;  %v2791_v0 = vcombine.high %v5487_v23, %v5487_v23  ;;  %v2593_v56 = vpop.f32.mrb[154].mxu1 }
 0x33c   : > { %v3434_v61 = vsel %vm3433_vm11, %v3432_v54, %v3431_v10  ;;  %v2660_v22 = vadd.f32 %v5441_v40, %v2635_v58  ;;  %v2661_v45 = vadd.f32 %v5441_v40, %v2636_v8  ;;  %v2637_v51 = vadd.f32 %v2590_v59, %v5432_v27  ;;  %v4436_v50 = vpop.f32.mrb[155].mxu1 }
 0x33d   : > { %v3437_v44 = vsel %vm3436_vm12, %v3435_v42, %v3434_v61  ;;  %v3873_v7 = vpack.c.bf16 %v3241_v46, %v3241_v46  ;;  %v2792_v25 = vcombine.high %v2677_v32, %v2677_v32  ;;  %v2799_v52 = vrot.slane %v2677_v32, %v5451_v39 }
 0x33e   : > { %v3440_v31 = vsel %vm3439_vm13, %v3438_v5, %v3437_v44  ;;  %v2678_v18 = vmax.f32 %v2660_v22, 0.0  ;;  %v2679_v16 = vmax.f32 %v2661_v45, 0.0  ;;  %v2662_v33 = vadd.f32 %v5441_v40, %v2637_v51 }
 0x33f   : > { %v3401_v4 = vunpack.c.l.b16 %v3873_v7  ;;  %v3443_v21 = vsel %vm3442_vm14, %v3441_v57, %v3440_v31  ;;  %v2806_v13 = vrot.slane %v2792_v25, %v5451_v39  ;;  %v2807_v2 = vcombine.high %v2799_v52, %v2799_v52 }
 0x340   : > { %v2809_v27 = vcombine.high %v2678_v18, %v2678_v18  ;;  %v2816_v14 = vrot.slane %v2678_v18, %v5451_v39  ;;  %v2826_v63 = vcombine.high %v2679_v16, %v2679_v16  ;;  %v2833_v26 = vrot.slane %v2679_v16, %v5451_v39 }
 0x341   : > { %v3444_v38 = vrot.slane %v3401_v4, 1  ;;  %v2680_v36 = vmax.f32 %v2662_v33, 0.0  ;;  %v2808_v19 = vcombine.high %v2806_v13, %v2806_v13  ;;  %v5520_v53 = vadd.f32 %v2593_v56, %v5436_v35  ;;  %v5522_v47 = vpop.f32.mrb[156].mxu1 }
 0x342   : > { %v2823_v28 = vrot.slane %v2809_v27, %v5451_v39  ;;  %v2824_v34 = vcombine.high %v2816_v14, %v2816_v14  ;;  %v2840_v43 = vrot.slane %v2826_v63, %v5451_v39  ;;  %v2841_v24 = vcombine.high %v2833_v26, %v2833_v26  ;;  %v4439_v54 = vpop.f32.mrb[157].mxu1 }
 0x343   : > { %v3446_v41 = vsel %vm3445_vm15, %v3444_v38, %v3443_v21  ;;  %v3083_v1 = vmax.f32 %v2791_v0, %v2833_v26  ;;  %v2843_v49 = vcombine.high %v2680_v36, %v2680_v36  ;;  %v2850_v60 = vrot.slane %v2680_v36, %v5451_v39  ;;  %v5528_v11 = vpop.f32.mrb[158].mxu1 }
 0x344   : > { %v3489_v35 = vpack.c.b16 %v3446_v41, %v3446_v41  ;;  %v2825_v42 = vcombine.high %v2823_v28, %v2823_v28  ;;  %v2842_v5 = vcombine.high %v2840_v43, %v2840_v43  ;;  %v3084_v6 = vmax.f32 %v2799_v52, %v2841_v24  ;;  %v4440_v37 = vpop.f32.mrb[159].mxu1 }
 0x345   : > { %v3085_v3 = vmax.f32 %v2807_v2, %v2840_v43  ;;  %v3808_v17 = vrot.slane %v3083_v1, 9  ;;  %v2857_v59 = vrot.slane %v2843_v49, %v5451_v39  ;;  %v2858_v57 = vcombine.high %v2850_v60, %v2850_v60 }
 0x346   : > { %3497 = vst.msk [vmem:[%s4697_s28] sm:$0xf] %vm771_vm5, %v3489_v35  ;;  %v3082_v58 = vmax.f32 %v5487_v23, %v2825_v42  ;;  %v3086_v8 = vmax.f32 %v2806_v13, %v2842_v5  ;;  %v3809_v55 = vrot.slane %v3084_v6, 9  ;;  %v3087_v10 = vmax.f32 %v2808_v19, %v2850_v60 }
 0x347   : > { %v3810_v46 = vrot.slane %v3085_v3, 9  ;;  %v3243_v32 = vmax.f32 %v3083_v1, %v3808_v17  ;;  %v3088_v0 = vmax.f32 %v2816_v14, %v2858_v57  ;;  %v3089_v56 = vmax.f32 %v2824_v34, %v2857_v59 }
 0x348   : > { %v3807_v61 = vrot.slane %v3082_v58, 9  ;;  %v3811_v22 = vrot.slane %v3086_v8, 9  ;;  %v3244_v45 = vmax.f32 %v3084_v6, %v3809_v55  ;;  %v3812_v51 = vrot.slane %v3087_v10, 9 }
 0x349   : > { %v3245_v50 = vmax.f32 %v3085_v3, %v3810_v46  ;;  %v3875_v44 = vpack.c.bf16 %v3243_v32, %v3243_v32  ;;  %v3813_v7 = vrot.slane %v3088_v0, 9  ;;  %v3814_v25 = vrot.slane %v3089_v56, 9  ;;  %v2606_v52 = vpop.f32.mrb[160].mxu1 }
 0x34a   : > { %v3242_v31 = vmax.f32 %v3082_v58, %v3807_v61  ;;  %v3246_v18 = vmax.f32 %v3086_v8, %v3811_v22  ;;  %v3876_v16 = vpack.c.bf16 %v3244_v45, %v3244_v45  ;;  %v3247_v23 = vmax.f32 %v3087_v10, %v3812_v51  ;;  %v4443_v33 = vpop.f32.mrb[161].mxu1 }
 0x34b   : > { %v3877_v4 = vpack.c.bf16 %v3245_v50, %v3245_v50  ;;  %v3403_v21 = vunpack.c.l.b16 %v3875_v44  ;;  %v3248_v13 = vmax.f32 %v3088_v0, %v3813_v7  ;;  %v3249_v2 = vmax.f32 %v3089_v56, %v3814_v25  ;;  %v2609_v27 = vpop.f32.mrb[162].mxu1 }
 0x34c   : > { %v3874_v14 = vpack.c.bf16 %v3242_v31, %v3242_v31  ;;  %v3878_v63 = vpack.c.bf16 %v3246_v18, %v3246_v18  ;;  %v3404_v26 = vunpack.c.l.b16 %v3876_v16  ;;  %v3879_v38 = vpack.c.bf16 %v3247_v23, %v3247_v23  ;;  %v4444_v36 = vpop.f32.mrb[163].mxu1 }
 0x34d   : > { %v3405_v19 = vunpack.c.l.b16 %v3877_v4  ;;  %v3447_v28 = vrot.slane %v3403_v21, 7  ;;  %v3880_v34 = vpack.c.bf16 %v3248_v13, %v3248_v13  ;;  %v3881_v43 = vpack.c.bf16 %v3249_v2, %v3249_v2 }
 0x34e   : > { %v3402_v24 = vunpack.c.l.b16 %v3874_v14  ;;  %v3406_v54 = vunpack.c.l.b16 %v3878_v63  ;;  %v3449_v41 = vrot.slane %v3404_v26, 6  ;;  %v3407_v1 = vunpack.c.l.b16 %v3879_v38 }
 0x34f   : > { %v3451_v49 = vrot.slane %v3405_v19, 5  ;;  %v3408_v60 = vunpack.c.l.b16 %v3880_v34  ;;  %v3409_v35 = vunpack.c.l.b16 %v3881_v43  ;;  %v2663_v42 = vadd.f32 %v5441_v40, %v5520_v53 }
 0x350   : > { %v3448_v5 = vsel %vm3427_vm9, %v3447_v28, %v3402_v24  ;;  %v3453_v6 = vrot.slane %v3406_v54, 4  ;;  %v3455_v37 = vrot.slane %v3407_v1, 3  ;;  %v2639_v3 = vadd.f32 %v5522_v47, %v5443_v15 }
 0x351   : > { %v3450_v17 = vsel %vm3430_vm10, %v3449_v41, %v3448_v5  ;;  %v3457_v59 = vrot.slane %v3408_v60, 2  ;;  %v3459_v57 = vrot.slane %v3409_v35, 1  ;;  %v2681_v58 = vmax.f32 %v2663_v42, 0.0  ;;  %v2614_v8 = vpop.f32.mrb[164].mxu1 }
 0x352   : > { %v3452_v55 = vsel %vm3433_vm11, %v3451_v49, %v3450_v17  ;;  %v2664_v10 = vadd.f32 %v5441_v40, %v2639_v3  ;;  %v2640_v53 = vadd.f32 %v5528_v11, %v5447_v29  ;;  %v2641_v46 = vadd.f32 %v2606_v52, %v5454_v12  ;;  %v4447_v32 = vpop.f32.mrb[165].mxu1 }
 0x353   : > { %v3454_v0 = vsel %vm3436_vm12, %v3453_v6, %v3452_v55  ;;  %v2859_v56 = vcombine.high %v2681_v58, %v2681_v58  ;;  %v2866_v15 = vrot.slane %v2681_v58, %v5451_v39  ;;  %v2642_v47 = vadd.f32 %v2609_v27, %v5457_v20  ;;  %v5548_v61 = vpop.f32.mrb[166].mxu1 }
 0x354   : > { %v3456_v22 = vsel %vm3439_vm13, %v3455_v37, %v3454_v0  ;;  %v2682_v45 = vmax.f32 %v2664_v10, 0.0  ;;  %v2665_v51 = vadd.f32 %v5441_v40, %v2640_v53  ;;  %v2666_v50 = vadd.f32 %v5441_v40, %v2641_v46  ;;  %v4448_v29 = vpop.f32.mrb[167].mxu1 }
 0x355   : > { %v3458_v12 = vsel %vm3442_vm14, %v3457_v59, %v3456_v22  ;;  %v2873_v11 = vrot.slane %v2859_v56, %v5451_v39  ;;  %v2667_v44 = vadd.f32 %v5441_v40, %v2642_v47  ;;  %v2874_v18 = vcombine.high %v2866_v15, %v2866_v15 }
 0x356   : > { %v3460_v7 = vsel %vm3445_vm15, %v3459_v57, %v3458_v12  ;;  %v2876_v20 = vcombine.high %v2682_v45, %v2682_v45  ;;  %v2883_v25 = vrot.slane %v2682_v45, %v5451_v39  ;;  %v2683_v52 = vmax.f32 %v2665_v51, 0.0 }
 0x357   : > { %v3490_v31 = vpack.c.b16 %v3460_v7, %v3460_v7  ;;  %v2684_v16 = vmax.f32 %v2666_v50, 0.0  ;;  %v2685_v23 = vmax.f32 %v2667_v44, 0.0  ;;  %v2875_v13 = vcombine.high %v2873_v11, %v2873_v11 }
 0x358   : > { %v2890_v33 = vrot.slane %v2876_v20, %v5451_v39  ;;  %v2893_v4 = vcombine.high %v2683_v52, %v2683_v52  ;;  %v2900_v21 = vrot.slane %v2683_v52, %v5451_v39  ;;  %v2891_v2 = vcombine.high %v2883_v25, %v2883_v25 }
 0x359   : > { %3498 = vst.msk [vmem:[%s4697_s28 + $0x4] sm:$0xf] %vm771_vm5, %v3490_v31  ;;  %v2910_v27 = vcombine.high %v2684_v16, %v2684_v16  ;;  %v2917_v14 = vrot.slane %v2684_v16, %v5451_v39  ;;  %v2934_v63 = vrot.slane %v2685_v23, %v5451_v39  ;;  %v2622_v26 = vpop.f32.mrb[168].mxu1  ;;  %v2643_v28 = vadd.f32 %v2614_v8, %v5471_v48 }
 0x35a   : > { %v2907_v38 = vrot.slane %v2893_v4, %v5451_v39  ;;  %v2908_v36 = vcombine.high %v2900_v21, %v2900_v21  ;;  %v2892_v19 = vcombine.high %v2890_v33, %v2890_v33  ;;  %v4451_v34 = vpop.f32.mrb[169].mxu1  ;;  %v2927_v41 = vcombine.high %v2685_v23, %v2685_v23 }
 0x35b   : > { %v2924_v43 = vrot.slane %v2910_v27, %v5451_v39  ;;  %v2925_v24 = vcombine.high %v2917_v14, %v2917_v14  ;;  %v3093_v54 = vmax.f32 %v2875_v13, %v2917_v14  ;;  %v2625_v1 = vpop.f32.mrb[170].mxu1 }
 0x35c   : > { %v2909_v49 = vcombine.high %v2907_v38, %v2907_v38  ;;  %v3090_v60 = vmax.f32 %v2866_v15, %v2908_v36  ;;  %v3091_v35 = vmax.f32 %v2874_v18, %v2907_v38  ;;  %v3097_v42 = vmax.f32 %v2892_v19, %v2934_v63  ;;  %v4452_v5 = vpop.f32.mrb[171].mxu1 }
 0x35d   : > { %v2926_v6 = vcombine.high %v2924_v43, %v2924_v43  ;;  %v3094_v37 = vmax.f32 %v2883_v25, %v2925_v24  ;;  %v3095_v3 = vmax.f32 %v2891_v2, %v2924_v43  ;;  %v3818_v17 = vrot.slane %v3093_v54, 9 }
 0x35e   : > { %v3092_v59 = vmax.f32 %v2873_v11, %v2909_v49  ;;  %v3815_v57 = vrot.slane %v3090_v60, 9  ;;  %v3816_v58 = vrot.slane %v3091_v35, 9  ;;  %v3822_v48 = vrot.slane %v3097_v42, 9 }
 0x35f   : > { %v3096_v8 = vmax.f32 %v2890_v33, %v2926_v6  ;;  %v3819_v55 = vrot.slane %v3094_v37, 9  ;;  %v3820_v10 = vrot.slane %v3095_v3, 9  ;;  %v3253_v53 = vmax.f32 %v3093_v54, %v3818_v17 }
 0x360   : > { %v3817_v46 = vrot.slane %v3092_v59, 9  ;;  %v3250_v32 = vmax.f32 %v3090_v60, %v3815_v57  ;;  %v3251_v0 = vmax.f32 %v3091_v35, %v3816_v58  ;;  %v3257_v56 = vmax.f32 %v3097_v42, %v3822_v48 }
 0x361   : > { %v3821_v15 = vrot.slane %v3096_v8, 9  ;;  %v3254_v47 = vmax.f32 %v3094_v37, %v3819_v55  ;;  %v3255_v22 = vmax.f32 %v3095_v3, %v3820_v10  ;;  %v3885_v45 = vpack.c.bf16 %v3253_v53, %v3253_v53 }
 0x362   : > { %v3252_v51 = vmax.f32 %v3092_v59, %v3817_v46  ;;  %v3882_v50 = vpack.c.bf16 %v3250_v32, %v3250_v32  ;;  %v3883_v29 = vpack.c.bf16 %v3251_v0, %v3251_v0  ;;  %v3889_v12 = vpack.c.bf16 %v3257_v56, %v3257_v56 }
 0x363   : > { %v3256_v11 = vmax.f32 %v3096_v8, %v3821_v15  ;;  %v3886_v44 = vpack.c.bf16 %v3254_v47, %v3254_v47  ;;  %v3887_v7 = vpack.c.bf16 %v3255_v22, %v3255_v22  ;;  %v3413_v20 = vunpack.c.l.b16 %v3885_v45 }
 0x364   : > { %v3884_v25 = vpack.c.bf16 %v3252_v51, %v3252_v51  ;;  %v3411_v52 = vunpack.c.l.b16 %v3883_v29  ;;  %v2941_v31 = vrot.slane %v2927_v41, %v5451_v39  ;;  %v3410_v18 = vunpack.c.l.b16 %v3882_v50 }
 0x365   : > { %v3888_v16 = vpack.c.bf16 %v3256_v11, %v3256_v11  ;;  %v3414_v23 = vunpack.c.l.b16 %v3886_v44  ;;  %v3415_v33 = vunpack.c.l.b16 %v3887_v7  ;;  %v3417_v13 = vunpack.c.l.b16 %v3889_v12 }
 0x366   : > { %v3412_v4 = vunpack.c.l.b16 %v3884_v25  ;;  %v3461_v21 = vrot.slane %v3411_v52, 7  ;;  %v2668_v2 = vadd.f32 %v5441_v40, %v2643_v28  ;;  %v3465_v14 = vrot.slane %v3413_v20, 5 }
 0x367   : > { %v3416_v27 = vunpack.c.l.b16 %v3888_v16  ;;  %v3467_v63 = vrot.slane %v3414_v23, 4  ;;  %v2644_v38 = vadd.f32 %v5548_v61, %v5482_v30  ;;  %v2645_v43 = vadd.f32 %v2622_v26, %v5495_v62 }
 0x368   : > { %v3462_v36 = vsel %vm3427_vm9, %v3461_v21, %v3410_v18  ;;  %v3463_v19 = vrot.slane %v3412_v4, 6  ;;  %v2686_v34 = vmax.f32 %v2668_v2, 0.0  ;;  %v3469_v24 = vrot.slane %v3415_v33, 3 }
 0x369   : > { %v3471_v54 = vrot.slane %v3416_v27, 2  ;;  %v2669_v41 = vadd.f32 %v5441_v40, %v2644_v38  ;;  %v2646_v49 = vadd.f32 %v2625_v1, %v5501_v9  ;;  %v2670_v42 = vadd.f32 %v5441_v40, %v2645_v43 }
 0x36a   : > { %v3464_v28 = vsel %vm3430_vm10, %v3463_v19, %v3462_v36  ;;  %v2943_v60 = vcombine.high %v2686_v34, %v2686_v34  ;;  %v2950_v35 = vrot.slane %v2686_v34, %v5451_v39  ;;  %v3473_v61 = vrot.slane %v3417_v13, 1 }
 0x36b   : > { %v3466_v30 = vsel %vm3433_vm11, %v3465_v14, %v3464_v28  ;;  %v2687_v5 = vmax.f32 %v2669_v41, 0.0  ;;  %v2671_v6 = vadd.f32 %v5441_v40, %v2646_v49  ;;  %v2688_v37 = vmax.f32 %v2670_v42, 0.0 }
 0x36c   : > { %v3468_v62 = vsel %vm3436_vm12, %v3467_v63, %v3466_v30  ;;  %v2957_v26 = vrot.slane %v2943_v60, %v5451_v39  ;;  %v2942_v3 = vcombine.high %v2941_v31, %v2941_v31  ;;  %v2958_v58 = vcombine.high %v2950_v35, %v2950_v35 }
 0x36d   : > { %v3470_v9 = vsel %vm3439_vm13, %v3469_v24, %v3468_v62  ;;  %v2960_v1 = vcombine.high %v2687_v5, %v2687_v5  ;;  %v2967_v17 = vrot.slane %v2687_v5, %v5451_v39  ;;  %v2689_v59 = vmax.f32 %v2671_v6, 0.0 }
 0x36e   : > { %v3472_v57 = vsel %vm3442_vm14, %v3471_v54, %v3470_v9  ;;  %v2977_v48 = vcombine.high %v2688_v37, %v2688_v37  ;;  %v2984_v8 = vrot.slane %v2688_v37, %v5451_v39  ;;  %v2959_v10 = vcombine.high %v2957_v26, %v2957_v26 }
 0x36f   : > { %v3474_v40 = vsel %vm3445_vm15, %v3473_v61, %v3472_v57  ;;  %v2974_v55 = vrot.slane %v2960_v1, %v5451_v39  ;;  %v2994_v53 = vcombine.high %v2689_v59, %v2689_v59  ;;  %v2975_v15 = vcombine.high %v2967_v17, %v2967_v17 }
 0x370   : > { %v3491_v46 = vpack.c.b16 %v3474_v40, %v3474_v40  ;;  %v2991_v32 = vrot.slane %v2977_v48, %v5451_v39  ;;  %v2992_v0 = vcombine.high %v2984_v8, %v2984_v8  ;;  %v3099_v56 = vmax.f32 %v2942_v3, %v2984_v8 }
 0x371   : > { %v2976_v47 = vcombine.high %v2974_v55, %v2974_v55  ;;  %v3001_v22 = vrot.slane %v2689_v59, %v5451_v39  ;;  %v3008_v45 = vrot.slane %v2994_v53, %v5451_v39 }
 0x372   : > { %3499 = vst.msk [vmem:[%s4697_s28 + $0x8] sm:$0xf] %vm771_vm5, %v3491_v46  ;;  %v2993_v51 = vcombine.high %v2991_v32, %v2991_v32  ;;  %v3100_v50 = vmax.f32 %v2950_v35, %v2992_v0  ;;  %v3101_v29 = vmax.f32 %v2958_v58, %v2991_v32  ;;  %v3824_v12 = vrot.slane %v3099_v56, 9 }
 0x373   : > { %v3098_v11 = vmax.f32 %v2941_v31, %v2976_v47  ;;  %v3009_v44 = vcombine.high %v3001_v22, %v3001_v22  ;;  %v3103_v7 = vmax.f32 %v2959_v10, %v3001_v22  ;;  %v3105_v20 = vmax.f32 %v2975_v15, %v3008_v45 }
 0x374   : > { %v3102_v25 = vmax.f32 %v2957_v26, %v2993_v51  ;;  %v3825_v52 = vrot.slane %v3100_v50, 9  ;;  %v3826_v18 = vrot.slane %v3101_v29, 9  ;;  %v3259_v16 = vmax.f32 %v3099_v56, %v3824_v12 }
 0x375   : > { %v3823_v23 = vrot.slane %v3098_v11, 9  ;;  %v3104_v33 = vmax.f32 %v2967_v17, %v3009_v44  ;;  %v3828_v4 = vrot.slane %v3103_v7, 9  ;;  %v3830_v21 = vrot.slane %v3105_v20, 9 }
 0x376   : > { %v3827_v13 = vrot.slane %v3102_v25, 9  ;;  %v3260_v39 = vmax.f32 %v3100_v50, %v3825_v52  ;;  %v3261_v2 = vmax.f32 %v3101_v29, %v3826_v18  ;;  %v3891_v27 = vpack.c.bf16 %v3259_v16, %v3259_v16 }
 0x377   : > { %v3258_v14 = vmax.f32 %v3098_v11, %v3823_v23  ;;  %v3829_v63 = vrot.slane %v3104_v33, 9  ;;  %v3263_v38 = vmax.f32 %v3103_v7, %v3828_v4  ;;  %v3265_v36 = vmax.f32 %v3105_v20, %v3830_v21 }
 0x378   : > { %v3262_v31 = vmax.f32 %v3102_v25, %v3827_v13  ;;  %v3892_v19 = vpack.c.bf16 %v3260_v39, %v3260_v39  ;;  %v3893_v34 = vpack.c.bf16 %v3261_v2, %v3261_v2  ;;  %v3419_v43 = vunpack.c.l.b16 %v3891_v27 }
 0x379   : > { %v3890_v24 = vpack.c.bf16 %v3258_v14, %v3258_v14  ;;  %v3264_v54 = vmax.f32 %v3104_v33, %v3829_v63  ;;  %v3895_v41 = vpack.c.bf16 %v3263_v38, %v3263_v38  ;;  %v3897_v49 = vpack.c.bf16 %v3265_v36, %v3265_v36 }
 0x37a   : > { %v3894_v28 = vpack.c.bf16 %v3262_v31, %v3262_v31  ;;  %v3420_v60 = vunpack.c.l.b16 %v3892_v19  ;;  %v3421_v35 = vunpack.c.l.b16 %v3893_v34  ;;  %v3475_v42 = vrot.slane %v3419_v43, 7 }
 0x37b   : > { %v3418_v30 = vunpack.c.l.b16 %v3890_v24  ;;  %v3896_v61 = vpack.c.bf16 %v3264_v54, %v3264_v54  ;;  %v3423_v5 = vunpack.c.l.b16 %v3895_v41  ;;  %v3425_v9 = vunpack.c.l.b16 %v3897_v49 }
 0x37c   : > { %v3422_v6 = vunpack.c.l.b16 %v3894_v28  ;;  %v3477_v62 = vrot.slane %v3420_v60, 6  ;;  %v3479_v26 = vrot.slane %v3421_v35, 5 }
 0x37d   : > { %v3476_v37 = vsel %vm3427_vm9, %v3475_v42, %v3418_v30  ;;  %v3424_v3 = vunpack.c.l.b16 %v3896_v61  ;;  %v3483_v57 = vrot.slane %v3423_v5, 3  ;;  %v3487_v40 = vrot.slane %v3425_v9, 1 }
 0x37e   : > { %v3478_v1 = vsel %vm3430_vm10, %v3477_v62, %v3476_v37  ;;  %v3481_v17 = vrot.slane %v3422_v6, 4 }
 0x37f   : > { %v3480_v59 = vsel %vm3433_vm11, %v3479_v26, %v3478_v1  ;;  %v3485_v48 = vrot.slane %v3424_v3, 2 }
 0x380   : > { %v3482_v58 = vsel %vm3436_vm12, %v3481_v17, %v3480_v59 }
 0x381   : > { %v3484_v8 = vsel %vm3439_vm13, %v3483_v57, %v3482_v58 }
 0x382   : > { %v3486_v55 = vsel %vm3442_vm14, %v3485_v48, %v3484_v8 }
 0x383   : > { %v3488_v10 = vsel %vm3445_vm15, %v3487_v40, %v3486_v55 }
 0x384   : > { %v3492_v53 = vpack.c.b16 %v3488_v10, %v3488_v10 }
 0x386   : > { %3500 = vst.msk [vmem:[%s4697_s28 + $0xc] sm:$0xf] %vm771_vm5, %v3492_v53 }
 0x387 PF: > { %s16_s25 = sadd.s32 1, %s4599_s25   ;;  %s5624_s21 = smov %s4591_s23 }
 0x388   : > { %p13_p8 = scmp.ge.s32.totalorder %s16_s25, 6   ;;  %s5625_s22 = smov %s4595_s24 }
 0x389   : > { %s5626_s23 = smov %s5629_s26  ;;  %s5627_s24 = smov %s5633_s27 }
 0x38a   :  { %15 = sbr.rel (!%p13_p8) target bundleno = 3 (0x3), region = 90 }

// kernel: vgg_features_forward.3
= control target key start
LH: loop header
LB: loop body
LE: loop exit
PB: predicated region body
PF: predicated region fallthrough
CT: control target
= control target key end

     0   :  { %s4271_s21 = smov 0   ;;  %s4273_s22 = smov 0   ;;  %s5018_s0 = inlined_call_operand.vmem [shape: bf16[4,90,64], index: 0, kind: input, shape index: {}]   ;;  %s5019_s1 = inlined_call_operand.vmem [shape: bf16[3,3,64,128], index: 1, kind: input, shape index: {}]   ;;  %s5020_s2 = inlined_call_operand.vmem [shape: f32[1,128], index: 2, kind: input, shape index: {}]   ;;  %s5021_s3 = inlined_call_operand.vmem [shape: bf16[3,3,128,128], index: 3, kind: input, shape index: {}]   ;;  %s5022_s4 = inlined_call_operand.vmem [shape: f32[1,128], index: 4, kind: input, shape index: {}]   ;;  %s5023_s5 = inlined_call_operand.vmem [shape: f32[60,1], index: 5, kind: input, shape index: {}]   ;;  %s5024_s6 = inlined_call_operand.vmem [shape: f32[4,40,128], index: 6, kind: output, shape index: {}]  }
   0x1   :  { %s4275_s23 = smov 0   ;;  %s4277_s24 = smov 0  }
   0x2   :  { %s4279_s25 = smov 0  }
   0x3 LB: > { %s25_s26 = sadd.s32 1, %s4221_s23  ;;  %s28_s27 = sadd.s32 1, %s4225_s24  ;;  %s4229_s25 = sphi %s4279_s25, %s16_s25   ;;  %s4225_s24 = sphi %s4277_s24, %s5028_s24   ;;  %s4221_s23 = sphi %s4275_s23, %s5027_s23   ;;  %s4217_s22 = sphi %s4273_s22, %s5026_s22   ;;  %s4213_s21 = sphi %s4271_s21, %s5025_s21  }
   0x4   : > { %p26_p0 = scmp.ge.s32.totalorder %s25_s26, 2  ;;  %p3012_p1 = scmp.ge.s32.totalorder %s4229_s25, 1 }
   0x5   : > { %p236_p2 = scmp.lt.s32.totalorder %s4229_s25, 5 }
   0x6   : > { %s5030_s26 = smov (%p26_p0, %s25_s26), 0  ;;  %s5032_s27 = smov (!%p26_p0, %s28_s27), %s4225_s24 }
   0x7   : > { %p237_p3 = pnand %p3012_p1, %p236_p2  ;;  %p30_p4 = scmp.ge.s32.totalorder %s5032_s27, 2 }
   0x8   : > { %v4061_v0 = vld [vmem:[%s5019_s1 + $0x20] sm:$0xff] (!%p237_p3)   ;;  %s3013_s30 = sshll.u32 (!%p237_p3), %s4217_s22, 1  ;;  %v4062_v1 = vld [vmem:[%s5019_s1 + $0x28] sm:$0xff] (!%p237_p3)   ;;  %v4063_v2 = vld [vmem:[%s5019_s1 + $0x30] sm:$0xff] (!%p237_p3)   ;;  %vm335_vm0 = vsmask.f32 (!%p237_p3), 7424 }
   0x9   : > { %s5034_s27 = smov (%p30_p4, %s5032_s27), 0  ;;  %240 = sbr.rel (%p237_p3) target bundleno = 856 (0x358), region = 44 }
   0xa   : > { %s271_s9 = sadd.s32 (!%p237_p3), %s4213_s21, %s3013_s30  ;;  %3552 = vmatprep.subr.bf16.mxu0 (!%p237_p3), %v4061_v0  ;;  %v4064_v3 = vld [vmem:[%s5019_s1 + $0x38] sm:$0xff] (!%p237_p3)   ;;  %v4067_v8 = vld [vmem:[%s5019_s1] sm:$0xff] (!%p237_p3)   ;;  %vm391_vm1 = vcmask (!%p237_p3), 523264   ;;  %v4069_v29 = vld [vmem:[%s5019_s1 + $0x8] sm:$0xff] (!%p237_p3)   ;;  %vm583_vm2 = vcmask (!%p237_p3), 1046528   ;;  %v4231_v46 = vmov (!%p237_p3), 0  }
   0xb   : > { %p272_p5 = scmp.lt.s32.totalorder (!%p237_p3), %s271_s9, 3  ;;  %3553 = vmatpush3.bf16.msra.mxu0 (!%p237_p3), %v4061_v0  ;;  %v4071_v32 = vld [vmem:[%s5019_s1 + $0x10] sm:$0xff] (!%p237_p3)   ;;  %v4072_v34 = vld [vmem:[%s5019_s1 + $0x18] sm:$0xff] (!%p237_p3)   ;;  %v4073_v35 = vld [vmem:[%s5019_s1 + $0x40] sm:$0xff] (!%p237_p3)   ;;  %4060 = vset.pattern.permute.xlu1 (!%p237_p3), %v4231_v46  ;;  %vm866_vm3 = vsmask.f32 (!%p237_p3), 6400 }
   0xc   : > { %3554 = vmatprep.subr.bf16.mxu0 (!%p237_p3), %v4062_v1  ;;  %v4074_v37 = vld [vmem:[%s5019_s1 + $0x48] sm:$0xff] (!%p237_p3)   ;;  %v4075_v39 = vld [vmem:[%s5019_s1 + $0x50] sm:$0xff] (!%p237_p3)   ;;  %v4077_v44 = vld [vmem:[%s5019_s1 + $0x58] sm:$0xff] (!%p237_p3)   ;;  %4059 = vset.pattern.permute.xlu0 (!%p237_p3), %v4231_v46  ;;  %vm1024_vm4 = vcmask (!%p237_p3), 1045504   ;;  %vm1335_vm5 = vsmask.f32 (!%p237_p3), 5376 }
   0xd   : > { %v4079_v47 = vld [vmem:[%s5019_s1 + $0x60] sm:$0xff] (!%p237_p3)   ;;  %v4080_v55 = vld [vmem:[%s5019_s1 + $0x68] sm:$0xff] (!%p237_p3)   ;;  %v4081_v57 = vld [vmem:[%s5019_s1 + $0x70] sm:$0xff] (!%p237_p3)   ;;  %vm1498_vm6 = vcmask (!%p237_p3), 1044480   ;;  %p3176_p6 = scmp.ne.s32.totalorder (!%p237_p3), %s4213_s21, 0 }
   0xe   : > { %v4082_v0 = vld [vmem:[%s5019_s1 + $0x78] sm:$0xff] (!%p237_p3)  }
   0xf   : > { %3555 = vmatpush3.bf16.msra.mxu0 (!%p237_p3), %v4062_v1 }
  0x10   : > { %s5036_s9 = smov (!%p272_p5, %s271_s9), 3  ;;  %3556 = vmatprep.subr.bf16.mxu0 %v4063_v2 }
  0x11   : > { %s4012_s12 = smul.u32 48, %s5036_s9 }
  0x12   : > { %s4013_s13 = smul.u32 40, %s5036_s9 }
  0x13   : > { %s4319_s18 = scalar_lea.vmem %s5018_s0, %s4012_s12  ;;  %3557 = vmatpush3.bf16.msra.mxu0 %v4063_v2  ;;  %v1642_v2 = vld [vmem:[%s5023_s5 + $0x10] sm:$0xff] }
  0x14   : > { %s4324_s22 = scalar_lea.vmem %s5024_s6, %s4013_s13  ;;  %v289_v4 = vld [vmem:[%s4319_s18] sm:$0xf]  ;;  %v290_v5 = vld [vmem:[%s4319_s18 + $0x4] sm:$0xf]  ;;  %v4329_v7 = vld [vmem:[%s4319_s18 + $0x8] sm:$0xff]   ;;  %3558 = vmatprep.subr.bf16.mxu0 %v4064_v3  ;;  %1660 = vperm.xlu1 %4060, %v1642_v2  }
  0x15   : > { %v3025_v6 = vcombine.low %v289_v4, %v290_v5  ;;  %v4335_v9 = vld [vmem:[%s4319_s18 + $0x10] sm:$0xff]   ;;  %v4338_v10 = vld [vmem:[%s4319_s18 + $0x18] sm:$0xf]  ;;  %v344_v13 = vshll.u32 %v4329_v7, 16  ;;  %v348_v14 = vshrl.u32 %v4329_v7, 16  ;;  %v585_v42 = vrot.slane %v4329_v7, 1 }
  0x16   : > { %v305_v15 = vld [vmem:[%s4319_s18 + $0x1c] sm:$0x7]  ;;  %v352_v16 = vshll.u32 %v4335_v9, 16  ;;  %v356_v18 = vshrl.u32 %v4335_v9, 16  ;;  %v570_v36 = vld [vmem:[%s4319_s18] sm:$0xe] }
  0x17   : > { %v337_v11 = vshrl.u32 %v3025_v6, 16  ;;  %v339_v12 = vshll.u32 %v3025_v6, 16  ;;  %v4345_v17 = vcombine.low %v4338_v10, %v305_v15  ;;  %v346_v20 = vrot.slane %v344_v13, 1  ;;  %3559 = vmatpush3.bf16.msra.mxu0 %v4064_v3  ;;  %v296_v40 = vld [vmem:[%s4319_s18 + $0x1c] sm:$0x3]  ;;  %v4399_v54 = vld [vmem:[%s4319_s18 + $0xc] sm:$0xff]  }
  0x18   : > { %v354_v21 = vrot.slane %v352_v16, 1  ;;  %3568 = vmatprep.subr.bf16.mxu0 %v4067_v8  ;;  %v3054_v38 = vcombine.low %v570_v36, %v290_v5  ;;  %v3037_v43 = vcombine.low %v4338_v10, %v296_v40  ;;  %v587_v48 = vrot.slane %v4335_v9, 1  ;;  %v700_v50 = vld [vmem:[%s4319_s18 + $0x4] sm:$0xe]  ;;  %v4394_v51 = vld [vmem:[%s4319_s18 + $0x8] sm:$0xf] }
  0x19   : > { %v341_v19 = vrot.slane %v339_v12, 1  ;;  %v360_v22 = vshll.u32 %v4345_v17, 16  ;;  %v350_v24 = vor.u32 %v348_v14, %v346_v20  ;;  %v364_v31 = vshrl.u32 %v4345_v17, 16  ;;  %v706_v60 = vld [vmem:[%s4319_s18 + $0x1c] sm:$0xf]  ;;  %v4414_v62 = vld [vmem:[%s4319_s18 + $0x14] sm:$0xff]  }
  0x1a   : > { %v358_v25 = vor.u32 %v356_v18, %v354_v21  ;;  %v584_v41 = vrot.slane %v3054_v38, 1  ;;  %v589_v49 = vrot.slane %v4345_v17, 1  ;;  %v588_v52 = vsel %vm583_vm2, %v585_v42, %v587_v48  ;;  %v707_v61 = vld [vmem:[%s4319_s18 + $0x20] sm:$0x7]  ;;  %v1643_v12 = vld [vmem:[%s5023_s5 + $0x18] sm:$0xff]  ;;  %v1641_v13 = vld [vmem:[%s5023_s5 + $0x8] sm:$0xff] }
  0x1b   : > { %v342_v23 = vor.u32 %v341_v19, %v337_v11  ;;  %v362_v26 = vrot.slane %v360_v22, 1  ;;  %v355_v28 = vsel %vm335_vm0, %v350_v24, %v354_v21  ;;  %v3071_v53 = vcombine.low %v700_v50, %v4394_v51  ;;  %v1640_v3 = vld [vmem:[%s5023_s5] sm:$0xff]  ;;  %v4087_v17 = vld [vmem:[%s5019_s1 + $0x88] sm:$0xff]   ;;  %1665 = vperm.xlu1 %4060, %v1643_v12   ;;  %v4095_v50 = vld [vmem:[%s5019_s1 + $0xb8] sm:$0xff]  }
  0x1c   : > { %v586_v45 = vsel %vm583_vm2, %v584_v41, %v585_v42  ;;  %v590_v56 = vsel %vm583_vm2, %v587_v48, %v589_v49  ;;  %v738_v59 = vrot.slane %v4399_v54, 1  ;;  %v3074_v63 = vcombine.low %v706_v60, %v707_v61  ;;  %v4085_v4 = vld [vmem:[%s5019_s1 + $0x80] sm:$0xff]   ;;  %1650 = vperm.xlu0 %4059, %v1640_v3   ;;  %v1645_v22 = vld [vmem:[%s5023_s5 + $0x28] sm:$0xff]  ;;  %v4100_v3 = vld [vmem:[%s5019_s1 + $0xd8] sm:$0xff]  }
  0x1d   : > { %v347_v27 = vsel %vm335_vm0, %v342_v23, %v346_v20  ;;  %v363_v30 = vsel %vm335_vm0, %v358_v25, %v362_v26  ;;  %v366_v33 = vor.u32 %v364_v31, %v362_v26  ;;  %v737_v58 = vrot.slane %v3071_v53, 1  ;;  %v1644_v23 = vld [vmem:[%s5023_s5 + $0x20] sm:$0xff]  ;;  %v4090_v26 = vld [vmem:[%s5019_s1 + $0x90] sm:$0xff]   ;;  %v1647_v31 = vld [vmem:[%s5023_s5 + $0x38] sm:$0xf] }
  0x1e   : > { %3560 = vmatprep.mubr.msk.bf16.mxu0 %vm391_vm1, %v347_v27  ;;  %v740_v5 = vrot.slane %v4414_v62, 1  ;;  %v876_v10 = vshrl.u32 %v4399_v54, 16  ;;  %v879_v11 = vshll.u32 %v4399_v54, 16  ;;  %v885_v24 = vshrl.u32 %v4414_v62, 16  ;;  %v4092_v40 = vld [vmem:[%s5019_s1 + $0xa0] sm:$0xff]  }
  0x1f   : > { %3561 = vmatmul.mubr.msk.bf16.vlgmr.msra.gmra.mrb[0].mxu0 %vm391_vm1, %v355_v28  ;;  %v739_v1 = vsel %vm583_vm2, %v737_v58, %v738_v59  ;;  %v888_v25 = vshll.u32 %v4414_v62, 16  ;;  %1675 = vperm.xlu1 %4060, %v1645_v22   ;;  %v1011_v42 = vld [vmem:[%s4319_s18 + $0x4] sm:$0xc]  ;;  %v4101_v58 = vld [vmem:[%s4319_s18 + $0x8] sm:$0xfc]  }
  0x20   : > { %3569 = vmatpush3.bf16.msra.mxu0 %v4067_v8  ;;  %3564 = vmatprep.mubr.msk.bf16.mxu0 %vm391_vm1, %v363_v30  ;;  %v868_v8 = vshrl.u32 %v3071_v53, 16  ;;  %v741_v14 = vsel %vm583_vm2, %v738_v59, %v740_v5  ;;  %v878_v20 = vrot.slane %v876_v10, 1  ;;  %v881_v21 = vrot.slane %v879_v11, 2  ;;  %v4102_v59 = vld [vmem:[%s4319_s18 + $0x10] sm:$0xff]   ;;  %v4106_v2 = vld [vmem:[%s4319_s18 + $0x20] sm:$0xff]  }
  0x21   : > { %3570 = vmatprep.subr.bf16.mxu0 %v4069_v29  ;;  %1655 = vperm.xlu0 %4059, %v1641_v13   ;;  %v3108_v46 = vcombine.low %v1011_v42, %v4394_v51  ;;  %v1178_v61 = vrot.slane %v4101_v58, 2  ;;  %v4544_v22 = vld [vmem:[%s4319_s18 + $0x20] sm:$0xff]  }
  0x22   : > { %v870_v18 = vrot.slane %v868_v8, 1  ;;  %v882_v28 = vor.u32 %v881_v21, %v878_v20  ;;  %v1183_v8 = vrot.slane %v4106_v2, 2 }
  0x23   : > { %1685 = vperm.xlu1 %4060, %v1647_v31   ;;  %v1025_v48 = vrot.slane %v3108_v46, 2 }
  0x24   : > { %3571 = vmatpush3.bf16.msra.mxu0 %v4069_v29 }
  0x25   : > { %3572 = vmatprep.subr.bf16.mxu0 %v4071_v32  ;;  %1670 = vperm.xlu0 %4059, %v1644_v23  }
  0x27   : > { %3565 = vmatmul.mubr.msk.bf16.gmra.mrb[4].mxu0 %vm391_vm1, %v366_v33  ;;  %v887_v33 = vrot.slane %v885_v24, 1 }
  0x28   : > { %3573 = vmatpush3.bf16.msra.mxu0 %v4071_v32  ;;  %3576 = vmatprep.mubr.msk.bf16.mxu0 %vm391_vm1, %v3025_v6  ;;  %v742_v6 = vrot.slane %v3074_v63, 1  ;;  %v1646_v32 = vld [vmem:[%s5023_s5 + $0x30] sm:$0xff]  ;;  %v1294_v63 = vld [vmem:[%s4319_s18 + $0x8] sm:$0xc] }
  0x29   : > { %3574 = vmatprep.subr.bf16.mxu0 %v4072_v34  ;;  %1680 = vperm.xlu0 %4059, %v1646_v32   ;;  %v4108_v32 = vld [vmem:[%s5019_s1 + $0xf8] sm:$0xff]  }
  0x2a   : > { %v743_v15 = vsel %vm583_vm2, %v740_v5, %v742_v6 }
  0x2c   : > { %3575 = vmatpush3.bf16.msra.mxu0 %v4072_v34  ;;  %v890_v34 = vrot.slane %v888_v25, 2  ;;  %v4107_v25 = vld [vmem:[%s5019_s1 + $0xf0] sm:$0xff]  }
  0x2d   : > { %3584 = vmatprep.subr.bf16.mxu0 %v4073_v35 }
  0x2f   : > { %3577 = vmatmul.mubr.msk.bf16.vlgmr.msra.gmra.mrb[0].mxu0 %vm391_vm1, %v4329_v7  ;;  %v853_v7 = vld [vmem:[%s4319_s18 + $0x20] sm:$0xf] }
  0x30   : > { %3585 = vmatpush3.bf16.msra.mxu0 %v4073_v35  ;;  %3580 = vmatprep.mubr.msk.bf16.mxu0 %vm391_vm1, %v4335_v9  ;;  %v871_v9 = vshll.u32 %v3071_v53, 16  ;;  %v4443_v16 = vcombine.low %v706_v60, %v853_v7  ;;  %v4091_v35 = vld [vmem:[%s5019_s1 + $0x98] sm:$0xff]   ;;  %v4097_v53 = vld [vmem:[%s5019_s1 + $0xc0] sm:$0xff]   ;;  %v4099_v60 = vld [vmem:[%s5019_s1 + $0xd0] sm:$0xff]  }
  0x31   : > { %3586 = vmatprep.subr.bf16.mxu0 %v4074_v37 }
  0x32   : > { %v873_v19 = vrot.slane %v871_v9, 2  ;;  %v894_v29 = vshrl.u32 %v4443_v16, 16  ;;  %v897_v30 = vshll.u32 %v4443_v16, 16  ;;  %v4103_v9 = vld [vmem:[%s5019_s1 + $0xe0] sm:$0xff]  }
  0x34   : > { %3587 = vmatpush3.bf16.msra.mxu0 %v4074_v37  ;;  %v874_v27 = vor.u32 %v873_v19, %v870_v18  ;;  %v896_v37 = vrot.slane %v894_v29, 1  ;;  %v899_v38 = vrot.slane %v897_v30, 2  ;;  %v1366_v29 = vshll.u32 %v4544_v22, 16 }
  0x35   : > { %3588 = vmatprep.subr.bf16.mxu0 %v4075_v39 }
  0x36   : > { %v883_v36 = vsel %vm866_vm3, %v874_v27, %v882_v28  ;;  %v900_v41 = vor.u32 %v899_v38, %v896_v37  ;;  %v4116_v37 = vld [vmem:[%s4319_s18 + $0x28] ss:$0 sps:$4 sm:$0x11]   ;;  %v4111_v38 = vld [vmem:[%s5019_s1 + $0x100] sm:$0xff]  }
  0x37   : > { %3581 = vmatmul.mubr.msk.bf16.gmra.mrb[4].mxu0 %vm391_vm1, %v3037_v43  ;;  %v1372_v42 = vshll.u32 %v4116_v37, 16 }
  0x38   : > { %3589 = vmatpush3.bf16.msra.mxu0 %v4075_v39  ;;  %3592 = vmatprep.mubr.msk.bf16.mxu0 %vm391_vm1, %v586_v45  ;;  %v891_v39 = vor.u32 %v890_v34, %v887_v33 }
  0x39   : > { %3590 = vmatprep.subr.bf16.mxu0 %v4077_v44  ;;  %v1374_v46 = vrot.slane %v1372_v42, 3 }
  0x3a   : > { %v892_v43 = vsel %vm866_vm3, %v882_v28, %v891_v39  ;;  %v901_v45 = vsel %vm866_vm3, %v891_v39, %v900_v41  ;;  %v1363_v28 = vshrl.u32 %v4544_v22, 16 }
  0x3c   : > { %3591 = vmatpush3.bf16.msra.mxu0 %v4077_v44  ;;  %v4093_v44 = vld [vmem:[%s5019_s1 + $0xa8] sm:$0xff]   ;;  %v1365_v34 = vrot.slane %v1363_v28, 2 }
  0x3d   : > { %3600 = vmatprep.subr.bf16.mxu0 %v4079_v47 }
  0x3f   : > { %3593 = vmatmul.mubr.msk.bf16.vlgmr.msra.gmra.mrb[0].mxu0 %vm391_vm1, %v588_v52  ;;  %v1028_v52 = vrot.slane %v4414_v62, 2  ;;  %v1179_v62 = vrot.slane %v4102_v59, 2  ;;  %v4232_v59 = vmov 0.0  }
  0x40   : > { %3601 = vmatpush3.bf16.msra.mxu0 %v4079_v47  ;;  %3596 = vmatprep.mubr.msk.bf16.mxu0 %vm391_vm1, %v590_v56  ;;  %v4094_v47 = vld [vmem:[%s5019_s1 + $0xb0] sm:$0xff]   ;;  %v4098_v56 = vld [vmem:[%s5019_s1 + $0xc8] sm:$0xff]   ;;  %1704 = vst [vmem:[#allocation2] sm:$0x1] %v4232_v59  ;;  %1705 = vst [vmem:[#allocation2 + $0x3d] sm:$0xff] %v4232_v59 }
  0x41   : > { %3602 = vmatprep.subr.bf16.mxu0 %v4080_v55 }
  0x44   : > { %3603 = vmatpush3.bf16.msra.mxu0 %v4080_v55 }
  0x45   : > { %3604 = vmatprep.subr.bf16.mxu0 %v4081_v57 }
  0x47   : > { %3597 = vmatmul.mubr.msk.bf16.gmra.mrb[4].mxu0 %vm391_vm1, %v589_v49  ;;  %v1026_v49 = vrot.slane %v4399_v54, 2  ;;  %v1030_v54 = vrot.slane %v4443_v16, 2  ;;  %v4538_v16 = vld [vmem:[%s4319_s18 + $0x18] sm:$0xff]  }
  0x48   : > { %3605 = vmatpush3.bf16.msra.mxu0 %v4081_v57  ;;  %3608 = vmatprep.mubr.msk.bf16.mxu0 %vm391_vm1, %v739_v1  ;;  %v4104_v1 = vld [vmem:[%s4319_s18 + $0x18] sm:$0xff]   ;;  %v1354_v23 = vshrl.u32 %v4538_v16, 16  ;;  %v1357_v24 = vshll.u32 %v4538_v16, 16 }
  0x49   : > { %3606 = vmatprep.subr.bf16.mxu0 %v4082_v0  ;;  %v1027_v51 = vsel %vm1024_vm4, %v1025_v48, %v1026_v49  ;;  %v1029_v55 = vsel %vm1024_vm4, %v1026_v49, %v1028_v52  ;;  %v1031_v57 = vsel %vm1024_vm4, %v1028_v52, %v1030_v54  ;;  %v1181_v7 = vrot.slane %v4104_v1, 2 }
  0x4a   : > { %v1356_v30 = vrot.slane %v1354_v23, 2  ;;  %v1359_v31 = vrot.slane %v1357_v24, 3 }
  0x4c   : > { %3607 = vmatpush3.bf16.msra.mxu0 %v4082_v0  ;;  %v4516_v0 = vld [vmem:[%s4319_s18 + $0xc] sm:$0xf] }
  0x4d   : > { %3616 = vmatprep.subr.bf16.mxu0 %v4085_v4  ;;  %v3145_v5 = vcombine.low %v1294_v63, %v4516_v0 }
  0x4f   : > { %3609 = vmatmul.mubr.msk.bf16.vlgmr.msra.gmra.mrb[0].mxu0 %vm391_vm1, %v741_v14  ;;  %v1337_v10 = vshrl.u32 %v3145_v5, 16  ;;  %v1340_v11 = vshll.u32 %v3145_v5, 16  ;;  %v1182_v14 = vsel %vm1024_vm4, %v1179_v62, %v1181_v7 }
  0x50   : > { %3617 = vmatpush3.bf16.msra.mxu0 %v4085_v4  ;;  %3612 = vmatprep.mubr.msk.bf16.mxu0 %vm391_vm1, %v743_v15  ;;  %v1180_v4 = vsel %vm1024_vm4, %v1178_v61, %v1179_v62  ;;  %v1184_v15 = vsel %vm1024_vm4, %v1181_v7, %v1183_v8  ;;  %v3175_v62 = vld [vmem:[%s5020_s2] ss:$0 sm:$0xff] }
  0x51   : > { %3618 = vmatprep.subr.bf16.mxu0 %v4087_v17  ;;  %v1339_v18 = vrot.slane %v1337_v10, 2  ;;  %v1342_v19 = vrot.slane %v1340_v11, 3 }
  0x54   : > { %3619 = vmatpush3.bf16.msra.mxu0 %v4087_v17  ;;  %v4105_v17 = vld [vmem:[%s5019_s1 + $0xe8] sm:$0xff]  }
  0x55   : > { %3620 = vmatprep.subr.bf16.mxu0 %v4090_v26 }
  0x57   : > { %3613 = vmatmul.mubr.msk.bf16.gmra.mrb[4].mxu0 %vm391_vm1, %v742_v6  ;;  %v4526_v6 = vld [vmem:[%s4319_s18 + $0x10] sm:$0xff]  }
  0x58   : > { %3621 = vmatpush3.bf16.msra.mxu0 %v4090_v26  ;;  %3624 = vmatprep.mubr.msk.bf16.mxu0 %vm391_vm1, %v883_v36  ;;  %v1345_v12 = vshrl.u32 %v4526_v6, 16  ;;  %v1348_v13 = vshll.u32 %v4526_v6, 16  ;;  %v1343_v26 = vor.u32 %v1342_v19, %v1339_v18  ;;  %v1360_v36 = vor.u32 %v1359_v31, %v1356_v30 }
  0x59   : > { %3622 = vmatprep.subr.bf16.mxu0 %v4091_v35  ;;  %v1500_v49 = vrot.slane %v4526_v6, 3 }
  0x5a   : > { %v1347_v20 = vrot.slane %v1345_v12, 2  ;;  %v1350_v21 = vrot.slane %v1348_v13, 3 }
  0x5c   : > { %3623 = vmatpush3.bf16.msra.mxu0 %v4091_v35  ;;  %v1351_v27 = vor.u32 %v1350_v21, %v1347_v20  ;;  %v1368_v35 = vrot.slane %v1366_v29, 3 }
  0x5d   : > { %3632 = vmatprep.subr.bf16.mxu0 %v4092_v40 }
  0x5e   : > { %v1352_v33 = vsel %vm1335_vm5, %v1343_v26, %v1351_v27  ;;  %v1369_v39 = vor.u32 %v1368_v35, %v1365_v34 }
  0x5f   : > { %3625 = vmatmul.mubr.msk.bf16.vlgmr.msra.gmra.mrb[0].mxu0 %vm391_vm1, %v892_v43  ;;  %v4113_v43 = vld [vmem:[%s5019_s1 + $0x108] sm:$0xff]  }
  0x60   : > { %3633 = vmatpush3.bf16.msra.mxu0 %v4092_v40  ;;  %3628 = vmatprep.mubr.msk.bf16.mxu0 %vm391_vm1, %v901_v45  ;;  %v1485_v40 = vld [vmem:[%s4319_s18 + $0x8] sm:$0x8] }
  0x61   : > { %3634 = vmatprep.subr.bf16.mxu0 %v4093_v44  ;;  %v3166_v45 = vcombine.low %v1485_v40, %v4516_v0 }
  0x63   : > { %v1499_v48 = vrot.slane %v3166_v45, 3 }
  0x64   : > { %3635 = vmatpush3.bf16.msra.mxu0 %v4093_v44  ;;  %v1370_v44 = vsel %vm1335_vm5, %v1360_v36, %v1369_v39 }
  0x65   : > { %3636 = vmatprep.subr.bf16.mxu0 %v4094_v47  ;;  %v1501_v52 = vsel %vm1498_vm6, %v1499_v48, %v1500_v49 }
  0x67   : > { %3629 = vmatmul.mubr.msk.bf16.gmra.mrb[4].mxu0 %vm391_vm1, %v900_v41  ;;  %v1361_v41 = vsel %vm1335_vm5, %v1351_v27, %v1360_v36 }
  0x68   : > { %3637 = vmatpush3.bf16.msra.mxu0 %v4094_v47  ;;  %3640 = vmatprep.mubr.msk.bf16.mxu0 %vm391_vm1, %v1027_v51  ;;  %v4115_v47 = vld [vmem:[%s5019_s1 + $0x110] sm:$0xff]   ;;  %v4117_v51 = vld [vmem:[%s5019_s1 + $0x118] sm:$0xff]  }
  0x69   : > { %3638 = vmatprep.subr.bf16.mxu0 %v4095_v50 }
  0x6c   : > { %3639 = vmatpush3.bf16.msra.mxu0 %v4095_v50  ;;  %v1375_v50 = vsel %vm1335_vm5, %v1369_v39, %v1374_v46 }
  0x6d   : > { %3648 = vmatprep.subr.bf16.mxu0 %v4097_v53 }
  0x6f   : > { %3641 = vmatmul.mubr.msk.bf16.vlgmr.msra.gmra.mrb[0].mxu0 %vm391_vm1, %v1029_v55 }
  0x70   : > { %3649 = vmatpush3.bf16.msra.mxu0 %v4097_v53  ;;  %3644 = vmatprep.mubr.msk.bf16.mxu0 %vm391_vm1, %v1031_v57  ;;  %v1502_v53 = vrot.slane %v4538_v16, 3  ;;  %v1506_v57 = vrot.slane %v4116_v37, 3  ;;  %v4233_v37 = vmov (!%p3176_p6), 0.0  }
  0x71   : > { %3650 = vmatprep.subr.bf16.mxu0 %v4098_v56 }
  0x72   : > { %v1503_v55 = vsel %vm1498_vm6, %v1500_v49, %v1502_v53 }
  0x74   : > { %3651 = vmatpush3.bf16.msra.mxu0 %v4098_v56 }
  0x75   : > { %3652 = vmatprep.subr.bf16.mxu0 %v4099_v60 }
  0x77   : > { %3645 = vmatmul.mubr.msk.bf16.gmra.mrb[4].mxu0 %vm391_vm1, %v1030_v54  ;;  %v1504_v54 = vrot.slane %v4544_v22, 3 }
  0x78   : > { %3653 = vmatpush3.bf16.msra.mxu0 %v4099_v60  ;;  %3656 = vmatprep.mubr.msk.bf16.mxu0 %vm391_vm1, %v1180_v4 }
  0x79   : > { %3654 = vmatprep.subr.bf16.mxu0 %v4100_v3  ;;  %v1505_v56 = vsel %vm1498_vm6, %v1502_v53, %v1504_v54  ;;  %v1507_v58 = vsel %vm1498_vm6, %v1504_v54, %v1506_v57 }
  0x7c   : > { %3655 = vmatpush3.bf16.msra.mxu0 %v4100_v3 }
  0x7d   : > { %3664 = vmatprep.subr.bf16.mxu0 %v4103_v9 }
  0x7f   : > { %3657 = vmatmul.mubr.msk.bf16.vlgmr.msra.gmra.mrb[0].mxu0 %vm391_vm1, %v1182_v14 }
  0x80   : > { %3665 = vmatpush3.bf16.msra.mxu0 %v4103_v9  ;;  %3660 = vmatprep.mubr.msk.bf16.mxu0 %vm391_vm1, %v1184_v15 }
  0x81   : > { %3666 = vmatprep.subr.bf16.mxu0 %v4105_v17 }
  0x84   : > { %3667 = vmatpush3.bf16.msra.mxu0 %v4105_v17 }
  0x85   : > { %3668 = vmatprep.subr.bf16.mxu0 %v4107_v25 }
  0x87   : > { %3661 = vmatmul.mubr.msk.bf16.gmra.mrb[4].mxu0 %vm391_vm1, %v1183_v8 }
  0x88   : > { %3669 = vmatpush3.bf16.msra.mxu0 %v4107_v25  ;;  %3672 = vmatprep.mubr.msk.bf16.mxu0 %vm391_vm1, %v1352_v33 }
  0x89   : > { %3670 = vmatprep.subr.bf16.mxu0 %v4108_v32 }
  0x8c   : > { %3671 = vmatpush3.bf16.msra.mxu0 %v4108_v32 }
  0x8d   : > { %3680 = vmatprep.subr.bf16.mxu0 %v4111_v38 }
  0x8f   : > { %3673 = vmatmul.mubr.msk.bf16.vlgmr.msra.gmra.mrb[0].mxu0 %vm391_vm1, %v1361_v41 }
  0x90   : > { %3681 = vmatpush3.bf16.msra.mxu0 %v4111_v38  ;;  %3676 = vmatprep.mubr.msk.bf16.mxu0 %vm391_vm1, %v1370_v44 }
  0x91   : > { %3682 = vmatprep.subr.bf16.mxu0 %v4113_v43 }
  0x93   : > { %v1661_v61 = vpop.permute.xlu1 %1660 }
  0x94   : > { %3683 = vmatpush3.bf16.msra.mxu0 %v4113_v43 }
  0x95   : > { %3684 = vmatprep.subr.bf16.mxu0 %v4115_v47 }
  0x97   : > { %3677 = vmatmul.mubr.msk.bf16.gmra.mrb[4].mxu0 %vm391_vm1, %v1375_v50 }
  0x98   : > { %3685 = vmatpush3.bf16.msra.mxu0 %v4115_v47  ;;  %3688 = vmatprep.mubr.msk.bf16.mxu0 %vm391_vm1, %v1501_v52 }
  0x99   : > { %3686 = vmatprep.subr.bf16.mxu0 %v4117_v51 }
  0x9a   : > { %v1666_v3 = vpop.permute.xlu1 %1665 }
  0x9b   : > { %v1651_v60 = vpop.permute.xlu0 %1650 }
  0x9c   : > { %3687 = vmatpush3.bf16.msra.mxu0 %v4117_v51 }
  0x9e   : > { %v1676_v17 = vpop.permute.xlu1 %1675 }
  0x9f   : > { %3689 = vmatmul.mubr.msk.bf16.vlgmr.msra.gmra.mrb[0].mxu0 %vm391_vm1, %v1503_v55 }
  0xa0   : > { %3692 = vmatprep.mubr.msk.bf16.mxu0 %vm391_vm1, %v1505_v56  ;;  %v1656_v63 = vpop.permute.xlu0 %1655 }
  0xa2   : > { %v1686_v32 = vpop.permute.xlu1 %1685 }
  0xa4   : > { %v1671_v13 = vpop.permute.xlu0 %1670 }
  0xa7   : > { %3693 = vmatmul.mubr.msk.bf16.gmra.mrb[4].mxu0 %vm391_vm1, %v1507_v58 }
  0xa8   : > { %v1681_v27 = vpop.permute.xlu0 %1680 }
 0x172   : > { %v3690_v0 = vpop.f32.mrb[0].mxu0 }
 0x173   : > { %v1626_v1 = vadd.f32 %v3690_v0, %v3175_v62  ;;  %v1578_v2 = vpop.f32.mrb[1].mxu0 }
 0x174   : > { %v1624_v4 = vadd.f32 %v3175_v62, %v1578_v2  ;;  %v3691_v5 = vpop.f32.mrb[2].mxu0 }
 0x175   : > { %v1634_v6 = vmax.f32 %v1626_v1, 0.0  ;;  %v1627_v7 = vadd.f32 %v3691_v5, %v3175_v62  ;;  %v1581_v8 = vpop.f32.mrb[3].mxu0 }
 0x176   : > { %v1632_v9 = vmax.f32 %v1624_v4, 0.0  ;;  %v1625_v10 = vadd.f32 %v3175_v62, %v1581_v8 }
 0x177   : > { %v1690_v11 = vmul.f32 %v1661_v61, %v1634_v6  ;;  %v1635_v12 = vmax.f32 %v1627_v7, 0.0 }
 0x178   : > { %v1688_v14 = vmul.f32 %v1651_v60, %v1632_v9  ;;  %v1633_v15 = vmax.f32 %v1625_v10, 0.0 }
 0x179   : > { %1698 = vst [vmem:[#allocation2 + $0x11] sm:$0xff] %v1690_v11  ;;  %v1691_v16 = vmul.f32 %v1666_v3, %v1635_v12 }
 0x17a   : > { %1696 = vst [vmem:[#allocation2 + $0x1] sm:$0xff] %v1688_v14  ;;  %v1689_v18 = vmul.f32 %v1656_v63, %v1633_v15  ;;  %v3694_v19 = vpop.f32.mrb[4].mxu0 }
 0x17b   : > { %1699 = vst [vmem:[#allocation2 + $0x19] sm:$0xff] %v1691_v16  ;;  %v1630_v20 = vadd.f32 %v3694_v19, %v3175_v62  ;;  %v1594_v21 = vpop.f32.mrb[5].mxu0  ;;  %1711 = vst [vmem:[#allocation2] sm:$0xff] (!%p3176_p6), %v4233_v37 }
 0x17c   : > { %1697 = vst [vmem:[#allocation2 + $0x9] sm:$0xff] %v1689_v18  ;;  %v1628_v22 = vadd.f32 %v3175_v62, %v1594_v21  ;;  %v3695_v23 = vpop.f32.mrb[6].mxu0 }
 0x17d   : > { %v1638_v24 = vmax.f32 %v1630_v20, 0.0  ;;  %v1631_v25 = vadd.f32 %v3695_v23, %v3175_v62  ;;  %v1597_v26 = vpop.f32.mrb[7].mxu0  ;;  %1712 = vst [vmem:[#allocation2 + $0x8] sm:$0x3] (!%p3176_p6), %v4233_v37 }
 0x17e   : > { %v1636_v28 = vmax.f32 %v1628_v22, 0.0  ;;  %v1629_v29 = vadd.f32 %v3175_v62, %v1597_v26  ;;  %1710 = sbr.rel (%p3176_p6) target bundleno = 389 (0x185), region = 48 }
 0x17f   : > { %v1694_v30 = vmul.f32 %v1681_v27, %v1638_v24  ;;  %v1639_v31 = vmax.f32 %v1631_v25, 0.0 }
 0x180   : > { %v1692_v33 = vmul.f32 %v1671_v13, %v1636_v28  ;;  %v1637_v34 = vmax.f32 %v1629_v29, 0.0 }
 0x181   : > { %1702 = vst [vmem:[#allocation2 + $0x31] sm:$0xff] %v1694_v30  ;;  %v1695_v35 = vmul.f32 %v1686_v32, %v1639_v31 }
 0x182   : > { %1700 = vst [vmem:[#allocation2 + $0x21] sm:$0xff] %v1692_v33  ;;  %v1693_v36 = vmul.f32 %v1676_v17, %v1637_v34 }
 0x183   : > { %1703 = vst [vmem:[#allocation2 + $0x39] sm:$0xf] %v1695_v35 }
 0x184   : > { %1701 = vst [vmem:[#allocation2 + $0x29] sm:$0xff] %v1693_v36 }
 0x185 PF: > { %p3177_p7 = scmp.ne.s32.totalorder %s4213_s21, 1 }
 0x186   : > { %v4234_v38 = vmov (!%p3177_p7), 0.0  }
 0x187   : > { %1716 = sbr.rel (%p3177_p7) target bundleno = 398 (0x18e), region = 52  ;;  %1717 = vst [vmem:[#allocation2 + $0x32] sm:$0xff] (!%p3177_p7), %v4234_v38  ;;  %1718 = vst [vmem:[#allocation2 + $0x3a] sm:$0x3] (!%p3177_p7), %v4234_v38 }
 0x18e PF: > { %3696 = vmatprep.subr.bf16.mxu1 %v4232_v59  ;;  %v4119_v39 = vld [vmem:[%s5021_s3 + $0x40] sm:$0xff]   ;;  %3836 = vmatprep.subr.bf16.mxu0 %v4232_v59  ;;  %vm4235_vm7 = vmmov 0   ;;  %v4120_v40 = vld [vmem:[%s5021_s3 + $0x48] sm:$0xff]   ;;  %v4121_v41 = vld [vmem:[%s5021_s3 + $0x50] sm:$0xff]  }
 0x18f   : > { %3712 = vmatprep.mubr.msk.bf16.mxu1 %vm4235_vm7, %v4232_v59  ;;  %3852 = vmatprep.mubr.msk.bf16.mxu0 %vm4235_vm7, %v4232_v59  ;;  %v4122_v42 = vld [vmem:[%s5021_s3 + $0x58] sm:$0xff]   ;;  %v4123_v43 = vld [vmem:[%s5021_s3 + $0x60] sm:$0xff]   ;;  %v4124_v44 = vld [vmem:[%s5021_s3 + $0x68] sm:$0xff]  }
 0x190   : > { %3697 = vmatpush3.bf16.msra.mxu1 %v4119_v39  ;;  %v4125_v45 = vld [vmem:[%s5021_s3 + $0x70] sm:$0xff]   ;;  %v4126_v46 = vld [vmem:[%s5021_s3 + $0x78] sm:$0xff]   ;;  %v1743_v47 = vld [vmem:[#allocation2 + $0x1] sm:$0xff] }
 0x191   : > { %3698 = vmatprep.subr.bf16.mxu1 %v4232_v59  ;;  %v1744_v48 = vld [vmem:[#allocation2 + $0x9] sm:$0xff]  ;;  %v4127_v50 = vld [vmem:[%s5021_s3] sm:$0xff]   ;;  %v1745_v52 = vld [vmem:[#allocation2 + $0x11] sm:$0xff] }
 0x192   : > { %v1748_v49 = vpack.c.bf16 %v1744_v48, %v1743_v47  ;;  %v4128_v51 = vld [vmem:[%s5021_s3 + $0x8] sm:$0xff]   ;;  %v1746_v53 = vld [vmem:[#allocation2 + $0x19] sm:$0xff]  ;;  %v4129_v54 = vld [vmem:[%s5021_s3 + $0x10] sm:$0xff]  }
 0x193   : > { %v1749_v55 = vpack.c.bf16 %v1746_v53, %v1745_v52  ;;  %v4152_v56 = vld [vmem:[%s5021_s3 + $0x140] sm:$0xff]   ;;  %v4154_v57 = vld [vmem:[%s5021_s3 + $0x148] sm:$0xff]   ;;  %v4130_v58 = vld [vmem:[%s5021_s3 + $0x18] sm:$0xff]  }
 0x194   : > { %3699 = vmatpush3.bf16.msra.mxu1 %v4120_v40  ;;  %3837 = vmatpush3.bf16.msra.mxu0 %v4152_v56  ;;  %v1747_v60 = vld [vmem:[#allocation2 + $0x21] sm:$0xff]  ;;  %v4156_v61 = vld [vmem:[%s5021_s3 + $0x150] sm:$0xff]   ;;  %v4158_v0 = vld [vmem:[%s5021_s3 + $0x158] sm:$0xff]  }
 0x195   : > { %3700 = vmatprep.subr.bf16.mxu1 %v4232_v59  ;;  %3838 = vmatprep.subr.bf16.mxu0 %v4232_v59  ;;  %v1750_v62 = vpack.c.bf16 %v1747_v60, %v1747_v60  ;;  %v4131_v63 = vld [vmem:[%s5021_s3 + $0x20] sm:$0xff]   ;;  %v4132_v1 = vld [vmem:[%s5021_s3 + $0x28] sm:$0xff]   ;;  %v4133_v3 = vld [vmem:[%s5021_s3 + $0x30] sm:$0xff]  }
 0x196   : > { %v4160_v2 = vld [vmem:[%s5021_s3 + $0x160] sm:$0xff]   ;;  %v4162_v4 = vld [vmem:[%s5021_s3 + $0x168] sm:$0xff]   ;;  %v4134_v5 = vld [vmem:[%s5021_s3 + $0x38] sm:$0xff]  }
 0x197   : > { %v1719_v6 = vld [vmem:[#allocation2] sm:$0xff]  ;;  %v1720_v7 = vld [vmem:[#allocation2 + $0x8] sm:$0xff]  ;;  %v4164_v8 = vld [vmem:[%s5021_s3 + $0x170] sm:$0xff]  }
 0x198   : > { %3701 = vmatpush3.bf16.msra.mxu1 %v4121_v41  ;;  %3839 = vmatpush3.bf16.msra.mxu0 %v4154_v57  ;;  %v4701_v9 = vld [vmem:[#allocation2 + $0x14] sm:$0xff]  ;;  %v1724_v10 = vpack.c.bf16 %v1720_v7, %v1719_v6  ;;  %v4704_v11 = vld [vmem:[#allocation2 + $0x1c] sm:$0xff]  ;;  %v2378_v15 = vld [vmem:[#allocation2 + $0xc] sm:$0xff] }
 0x199   : > { %3702 = vmatprep.subr.bf16.mxu1 %v4232_v59  ;;  %3840 = vmatprep.subr.bf16.mxu0 %v4232_v59  ;;  %v4135_v12 = vld [vmem:[%s5021_s3 + $0x80] sm:$0xff]   ;;  %v2517_v13 = vpack.c.bf16 %v4704_v11, %v4701_v9  ;;  %v4166_v14 = vld [vmem:[%s5021_s3 + $0x178] sm:$0xff]   ;;  %v4136_v16 = vld [vmem:[%s5021_s3 + $0x88] sm:$0xff]   ;;  %v2383_v19 = vpack.c.bf16 %v4701_v9, %v2378_v15 }
 0x19a   : > { %v1721_v17 = vld [vmem:[#allocation2 + $0x10] sm:$0xff]  ;;  %v1722_v18 = vld [vmem:[#allocation2 + $0x18] sm:$0xff]  ;;  %v4168_v20 = vld [vmem:[%s5021_s3 + $0x1c0] sm:$0xff]  }
 0x19b   : > { %v4726_v21 = vld [vmem:[#allocation2 + $0x24] sm:$0xff]  ;;  %v1725_v22 = vpack.c.bf16 %v1722_v18, %v1721_v17  ;;  %v4729_v23 = vld [vmem:[#allocation2 + $0x2c] sm:$0xff]  ;;  %v4138_v27 = vld [vmem:[%s5021_s3 + $0x98] sm:$0xff]  }
 0x19c   : > { %3703 = vmatpush3.bf16.msra.mxu1 %v4122_v42  ;;  %3841 = vmatpush3.bf16.msra.mxu0 %v4156_v61  ;;  %v4137_v24 = vld [vmem:[%s5021_s3 + $0x90] sm:$0xff]   ;;  %v2518_v25 = vpack.c.bf16 %v4729_v23, %v4726_v21  ;;  %v4170_v26 = vld [vmem:[%s5021_s3 + $0x1c8] sm:$0xff]   ;;  %v1723_v28 = vld [vmem:[#allocation2 + $0x20] sm:$0xff]  ;;  %v2384_v29 = vpack.c.bf16 %v4726_v21, %v4704_v11  ;;  %v2385_v35 = vpack.c.bf16 %v4729_v23, %v4729_v23 }
 0x19d   : > { %3704 = vmatprep.subr.bf16.mxu1 %v4232_v59  ;;  %3842 = vmatprep.subr.bf16.mxu0 %v4232_v59  ;;  %v4172_v30 = vld [vmem:[%s5021_s3 + $0x1d0] sm:$0xff]   ;;  %v1726_v31 = vpack.c.bf16 %v1723_v28, %v1723_v28  ;;  %v4139_v32 = vld [vmem:[%s5021_s3 + $0xa0] sm:$0xff]   ;;  %v4174_v33 = vld [vmem:[%s5021_s3 + $0x1d8] sm:$0xff]  }
 0x19e   : > { %v4140_v34 = vld [vmem:[%s5021_s3 + $0xa8] sm:$0xff]   ;;  %v4176_v36 = vld [vmem:[%s5021_s3 + $0x1e0] sm:$0xff]   ;;  %v4141_v37 = vld [vmem:[%s5021_s3 + $0xb0] sm:$0xff]  }
 0x19f   : > { %v4178_v38 = vld [vmem:[%s5021_s3 + $0x1e8] sm:$0xff]   ;;  %v4142_v39 = vld [vmem:[%s5021_s3 + $0xb8] sm:$0xff]   ;;  %v4180_v42 = vld [vmem:[%s5021_s3 + $0x1f0] sm:$0xff]  }
 0x1a0   : > { %3705 = vmatpush3.bf16.msra.mxu1 %v4123_v43  ;;  %3843 = vmatpush3.bf16.msra.mxu0 %v4158_v0  ;;  %v1976_v40 = vld [vmem:[#allocation2 + $0x2] sm:$0xff]  ;;  %v1977_v41 = vld [vmem:[#allocation2 + $0xa] sm:$0xff]  ;;  %v4146_v56 = vld [vmem:[%s5021_s3 + $0xd8] sm:$0xff]  }
 0x1a1   : > { %3706 = vmatprep.subr.bf16.mxu1 %v4232_v59  ;;  %3844 = vmatprep.subr.bf16.mxu0 %v4232_v59  ;;  %v1981_v43 = vpack.c.bf16 %v1977_v41, %v1976_v40  ;;  %v2647_v47 = vld [vmem:[#allocation2 + $0x1d] sm:$0xff]  ;;  %v4144_v48 = vld [vmem:[%s5021_s3 + $0xc8] sm:$0xff]   ;;  %v4145_v53 = vld [vmem:[%s5021_s3 + $0xd0] sm:$0xff]  }
 0x1a2   : > { %v1980_v57 = vld [vmem:[#allocation2 + $0x22] sm:$0xff]  ;;  %v4155_v7 = vld [vmem:[%s5021_s3 + $0x110] sm:$0xff]   ;;  %v4165_v17 = vld [vmem:[%s5021_s3 + $0x138] sm:$0xff]  }
 0x1a3   : > { %v1983_v60 = vpack.c.bf16 %v1980_v57, %v1980_v57  ;;  %v4147_v61 = vld [vmem:[%s5021_s3 + $0xe0] sm:$0xff]   ;;  %v4161_v15 = vld [vmem:[%s5021_s3 + $0x128] sm:$0xff]   ;;  %v4186_v9 = vld [vmem:[%s5021_s3 + $0x218] sm:$0xff]  }
 0x1a4   : > { %3707 = vmatpush3.bf16.msra.mxu1 %v4124_v44  ;;  %3845 = vmatpush3.bf16.msra.mxu0 %v4160_v2  ;;  %v4143_v44 = vld [vmem:[%s5021_s3 + $0xc0] sm:$0xff]   ;;  %v4150_v2 = vld [vmem:[%s5021_s3 + $0xf8] sm:$0xff]   ;;  %v2244_v18 = vld [vmem:[#allocation2 + $0xb] sm:$0xff] }
 0x1a5   : > { %3708 = vmatprep.subr.bf16.mxu1 %v4232_v59  ;;  %3846 = vmatprep.subr.bf16.mxu0 %v4232_v59  ;;  %v2516_v11 = vld [vmem:[#allocation2 + $0x34] sm:$0xff]  ;;  %v4187_v40 = vld [vmem:[%s5021_s3 + $0x220] sm:$0xff]   ;;  %v4188_v21 = vld [vmem:[%s5021_s3 + $0x228] sm:$0xff]  }
 0x1a6   : > { %v4189_v23 = vld [vmem:[%s5021_s3 + $0x230] sm:$0xff]  }
 0x1a8   : > { %3709 = vmatpush3.bf16.msra.mxu1 %v4125_v45  ;;  %3847 = vmatpush3.bf16.msra.mxu0 %v4162_v4  ;;  %v4182_v45 = vld [vmem:[%s5021_s3 + $0x1f8] sm:$0xff]   ;;  %v4151_v4 = vld [vmem:[%s5021_s3 + $0x100] sm:$0xff]  }
 0x1a9   : > { %3710 = vmatprep.subr.bf16.mxu1 %v4232_v59  ;;  %3848 = vmatprep.subr.bf16.mxu0 %v4232_v59 }
 0x1ac   : > { %3711 = vmatpush3.bf16.msra.mxu1 %v4126_v46  ;;  %3849 = vmatpush3.bf16.msra.mxu0 %v4164_v8  ;;  %v2646_v46 = vld [vmem:[#allocation2 + $0x15] sm:$0xff] }
 0x1ad   : > { %3724 = vmatprep.subr.bf16.mxu1 %v4232_v59  ;;  %3850 = vmatprep.subr.bf16.mxu0 %v4232_v59  ;;  %v4157_v8 = vld [vmem:[%s5021_s3 + $0x118] sm:$0xff]  }
 0x1af   : > { %3713 = vmatmul.mubr.bf16.vlgmr.msra.gmra.mrb[0].mxu1 %v1748_v49  ;;  %v1978_v49 = vld [vmem:[#allocation2 + $0x12] sm:$0xff] }
 0x1b0   : > { %3725 = vmatpush3.bf16.msra.mxu1 %v4127_v50  ;;  %3716 = vmatprep.mubr.msk.bf16.mxu1 %vm4235_vm7, %v4232_v59  ;;  %v1979_v50 = vld [vmem:[#allocation2 + $0x1a] sm:$0xff] }
 0x1b1   : > { %3726 = vmatprep.subr.bf16.mxu1 %v4232_v59  ;;  %3851 = vmatpush3.bf16.msra.mxu0 %v4166_v14  ;;  %v1982_v52 = vpack.c.bf16 %v1979_v50, %v1978_v49  ;;  %v2116_v6 = vpack.c.bf16 %v1980_v57, %v1979_v50  ;;  %v4159_v14 = vld [vmem:[%s5021_s3 + $0x120] sm:$0xff]  }
 0x1b2   : > { %3892 = vmatprep.subr.bf16.mxu0 %v4232_v59 }
 0x1b4   : > { %3727 = vmatpush3.bf16.msra.mxu1 %v4128_v51  ;;  %3853 = vmatmul.mubr.bf16.vlgmr.msra.gmra.mrb[8].mxu0 %v2383_v19  ;;  %v2651_v51 = vpack.c.bf16 %v2647_v47, %v2646_v46  ;;  %v2245_v19 = vld [vmem:[#allocation2 + $0x13] sm:$0xff] }
 0x1b5   : > { %3728 = vmatprep.subr.bf16.mxu1 %v4232_v59  ;;  %3893 = vmatpush3.bf16.msra.mxu0 %v4168_v20  ;;  %v2249_v20 = vpack.c.bf16 %v2245_v19, %v2244_v18  ;;  %v2784_v47 = vld [vmem:[#allocation2 + $0x36] sm:$0xff] }
 0x1b6   : > { %3856 = vmatprep.mubr.msk.bf16.mxu0 %vm4235_vm7, %v4232_v59  ;;  %3894 = vmatprep.subr.bf16.mxu0 %v4232_v59 }
 0x1b7   : > { %3717 = vmatmul.mubr.bf16.gmra.mrb[4].mxu1 %v1749_v55  ;;  %v2649_v55 = vld [vmem:[#allocation2 + $0x2d] sm:$0xff] }
 0x1b8   : > { %3729 = vmatpush3.bf16.msra.mxu1 %v4129_v54  ;;  %3720 = vmatprep.mubr.msk.bf16.mxu1 %vm4235_vm7, %v4232_v59  ;;  %v2648_v54 = vld [vmem:[#allocation2 + $0x25] sm:$0xff] }
 0x1b9   : > { %3730 = vmatprep.subr.bf16.mxu1 %v4232_v59  ;;  %3895 = vmatpush3.bf16.msra.mxu0 %v4170_v26  ;;  %v2246_v26 = vld [vmem:[#allocation2 + $0x1b] sm:$0xff] }
 0x1ba   : > { %3896 = vmatprep.subr.bf16.mxu0 %v4232_v59 }
 0x1bc   : > { %3731 = vmatpush3.bf16.msra.mxu1 %v4130_v58  ;;  %3857 = vmatmul.mubr.bf16.gmra.mrb[12].mxu0 %v2384_v29  ;;  %v2652_v58 = vpack.c.bf16 %v2649_v55, %v2648_v54  ;;  %v4171_v29 = vld [vmem:[%s5021_s3 + $0x190] sm:$0xff]  }
 0x1bd   : > { %3732 = vmatprep.subr.bf16.mxu1 %v4232_v59  ;;  %3897 = vmatpush3.bf16.msra.mxu0 %v4172_v30  ;;  %v4173_v30 = vld [vmem:[%s5021_s3 + $0x198] sm:$0xff]  }
 0x1be   : > { %3860 = vmatprep.mubr.msk.bf16.mxu0 %vm4235_vm7, %v4232_v59  ;;  %3898 = vmatprep.subr.bf16.mxu0 %v4232_v59 }
 0x1bf   : > { %3721 = vmatmul.mubr.bf16.gmra.mrb[8].mxu1 %v1750_v62  ;;  %v2650_v62 = vld [vmem:[#allocation2 + $0x35] sm:$0xff] }
 0x1c0   : > { %3733 = vmatpush3.bf16.msra.mxu1 %v4131_v63  ;;  %3740 = vmatprep.mubr.msk.bf16.mxu1 %vm4235_vm7, %v4232_v59  ;;  %v4148_v63 = vld [vmem:[%s5021_s3 + $0xe8] sm:$0xff]   ;;  %v2653_v0 = vpack.c.bf16 %v2650_v62, %v2650_v62 }
 0x1c1   : > { %3734 = vmatprep.subr.bf16.mxu1 %v4232_v59  ;;  %3899 = vmatpush3.bf16.msra.mxu0 %v4174_v33  ;;  %v4175_v33 = vld [vmem:[%s5021_s3 + $0x1a0] sm:$0xff]  }
 0x1c2   : > { %3900 = vmatprep.subr.bf16.mxu0 %v4232_v59 }
 0x1c4   : > { %3735 = vmatpush3.bf16.msra.mxu1 %v4132_v1  ;;  %3861 = vmatmul.mubr.bf16.gmra.mrb[16].mxu0 %v2385_v35  ;;  %v4149_v1 = vld [vmem:[%s5021_s3 + $0xf0] sm:$0xff]  }
 0x1c5   : > { %3736 = vmatprep.subr.bf16.mxu1 %v4232_v59  ;;  %3901 = vmatpush3.bf16.msra.mxu0 %v4176_v36  ;;  %v4179_v35 = vld [vmem:[%s5021_s3 + $0x1b0] sm:$0xff]   ;;  %v4181_v36 = vld [vmem:[%s5021_s3 + $0x1b8] sm:$0xff]  }
 0x1c6   : > { %3908 = vmatprep.mubr.msk.bf16.mxu0 %vm4235_vm7, %v4232_v59  ;;  %3902 = vmatprep.subr.bf16.mxu0 %v4232_v59 }
 0x1c8   : > { %3737 = vmatpush3.bf16.msra.mxu1 %v4133_v3  ;;  %v2115_v3 = vpack.c.bf16 %v1978_v49, %v1977_v41  ;;  %v2780_v41 = vld [vmem:[#allocation2 + $0x16] sm:$0xff] }
 0x1c9   : > { %3738 = vmatprep.subr.bf16.mxu1 %v4232_v59  ;;  %3903 = vmatpush3.bf16.msra.mxu0 %v4178_v38  ;;  %v4184_v38 = vld [vmem:[%s5021_s3 + $0x208] sm:$0xff]  }
 0x1ca   : > { %3904 = vmatprep.subr.bf16.mxu0 %v4232_v59 }
 0x1cc   : > { %3739 = vmatpush3.bf16.msra.mxu1 %v4134_v5  ;;  %v4153_v5 = vld [vmem:[%s5021_s3 + $0x108] sm:$0xff]  }
 0x1cd   : > { %3752 = vmatprep.subr.bf16.mxu1 %v4232_v59  ;;  %3905 = vmatpush3.bf16.msra.mxu0 %v4180_v42  ;;  %v2781_v42 = vld [vmem:[#allocation2 + $0x1e] sm:$0xff] }
 0x1ce   : > { %3906 = vmatprep.subr.bf16.mxu0 %v4232_v59 }
 0x1cf   : > { %3741 = vmatmul.mubr.bf16.vlgmr.msra.gmra.mrb[12].mxu1 %v1724_v10  ;;  %v2114_v10 = vld [vmem:[#allocation2 + $0x2a] sm:$0xff] }
 0x1d0   : > { %3753 = vmatpush3.bf16.msra.mxu1 %v4135_v12  ;;  %3744 = vmatprep.mubr.msk.bf16.mxu1 %vm4235_vm7, %v4232_v59  ;;  %v2117_v12 = vpack.c.bf16 %v2114_v10, %v2114_v10 }
 0x1d1   : > { %3754 = vmatprep.subr.bf16.mxu1 %v4232_v59  ;;  %3907 = vmatpush3.bf16.msra.mxu0 %v4182_v45  ;;  %v2783_v45 = vld [vmem:[#allocation2 + $0x2e] sm:$0xff] }
 0x1d4   : > { %3755 = vmatpush3.bf16.msra.mxu1 %v4136_v16  ;;  %3909 = vmatmul.mubr.bf16.vlgmr.msra.gmra.mrb[20].mxu0 %v2651_v51  ;;  %v4163_v16 = vld [vmem:[%s5021_s3 + $0x130] sm:$0xff]  }
 0x1d5   : > { %3756 = vmatprep.subr.bf16.mxu1 %v4232_v59  ;;  %3912 = vmatprep.mubr.msk.bf16.mxu0 %vm4235_vm7, %v4232_v59 }
 0x1d7   : > { %3745 = vmatmul.mubr.bf16.gmra.mrb[16].mxu1 %v1725_v22  ;;  %v4167_v22 = vld [vmem:[%s5021_s3 + $0x180] sm:$0xff]  }
 0x1d8   : > { %3757 = vmatpush3.bf16.msra.mxu1 %v4137_v24  ;;  %3748 = vmatprep.mubr.msk.bf16.mxu1 %vm4235_vm7, %v4232_v59  ;;  %v4169_v24 = vld [vmem:[%s5021_s3 + $0x188] sm:$0xff]  }
 0x1d9   : > { %3758 = vmatprep.subr.bf16.mxu1 %v4232_v59 }
 0x1dc   : > { %3759 = vmatpush3.bf16.msra.mxu1 %v4138_v27  ;;  %3913 = vmatmul.mubr.bf16.gmra.mrb[24].mxu0 %v2652_v58  ;;  %v2247_v27 = vld [vmem:[#allocation2 + $0x23] sm:$0xff] }
 0x1dd   : > { %3760 = vmatprep.subr.bf16.mxu1 %v4232_v59  ;;  %3916 = vmatprep.mubr.msk.bf16.mxu0 %vm4235_vm7, %v4232_v59  ;;  %v2250_v28 = vpack.c.bf16 %v2247_v27, %v2246_v26 }
 0x1df   : > { %3749 = vmatmul.mubr.bf16.gmra.mrb[20].mxu1 %v1726_v31  ;;  %v2248_v31 = vld [vmem:[#allocation2 + $0x2b] sm:$0xff] }
 0x1e0   : > { %3761 = vmatpush3.bf16.msra.mxu1 %v4139_v32  ;;  %3768 = vmatprep.mubr.msk.bf16.mxu1 %vm4235_vm7, %v4232_v59  ;;  %v2251_v32 = vpack.c.bf16 %v2248_v31, %v2248_v31 }
 0x1e1   : > { %3762 = vmatprep.subr.bf16.mxu1 %v4232_v59 }
 0x1e4   : > { %3763 = vmatpush3.bf16.msra.mxu1 %v4140_v34  ;;  %3917 = vmatmul.mubr.bf16.gmra.mrb[28].mxu0 %v2653_v0  ;;  %v4177_v34 = vld [vmem:[%s5021_s3 + $0x1a8] sm:$0xff]  }
 0x1e5   : > { %3764 = vmatprep.subr.bf16.mxu1 %v4232_v59 }
 0x1e8   : > { %3765 = vmatpush3.bf16.msra.mxu1 %v4141_v37  ;;  %v4183_v37 = vld [vmem:[%s5021_s3 + $0x200] sm:$0xff]  }
 0x1e9   : > { %3766 = vmatprep.subr.bf16.mxu1 %v4232_v59 }
 0x1ec   : > { %3767 = vmatpush3.bf16.msra.mxu1 %v4142_v39  ;;  %v4185_v39 = vld [vmem:[%s5021_s3 + $0x210] sm:$0xff]  }
 0x1ed   : > { %3780 = vmatprep.subr.bf16.mxu1 %v4232_v59 }
 0x1ef   : > { %3769 = vmatmul.mubr.bf16.vlgmr.msra.gmra.mrb[24].mxu1 %v1981_v43  ;;  %v2785_v43 = vpack.c.bf16 %v2781_v42, %v2780_v41 }
 0x1f0   : > { %3781 = vmatpush3.bf16.msra.mxu1 %v4143_v44  ;;  %3772 = vmatprep.mubr.msk.bf16.mxu1 %vm4235_vm7, %v4232_v59  ;;  %v2782_v44 = vld [vmem:[#allocation2 + $0x26] sm:$0xff] }
 0x1f1   : > { %3782 = vmatprep.subr.bf16.mxu1 %v4232_v59  ;;  %v2786_v46 = vpack.c.bf16 %v2783_v45, %v2782_v44 }
 0x1f4   : > { %3783 = vmatpush3.bf16.msra.mxu1 %v4144_v48  ;;  %v2787_v48 = vpack.c.bf16 %v2784_v47, %v2784_v47 }
 0x1f5   : > { %3784 = vmatprep.subr.bf16.mxu1 %v4232_v59 }
 0x1f7   : > { %3773 = vmatmul.mubr.bf16.gmra.mrb[28].mxu1 %v1982_v52 }
 0x1f8   : > { %3785 = vmatpush3.bf16.msra.mxu1 %v4145_v53  ;;  %3776 = vmatprep.mubr.msk.bf16.mxu1 %vm4235_vm7, %v4232_v59 }
 0x1f9   : > { %3786 = vmatprep.subr.bf16.mxu1 %v4232_v59 }
 0x1fc   : > { %3787 = vmatpush3.bf16.msra.mxu1 %v4146_v56 }
 0x1fd   : > { %3788 = vmatprep.subr.bf16.mxu1 %v4232_v59 }
 0x1ff   : > { %3777 = vmatmul.mubr.bf16.gmra.mrb[32].mxu1 %v1983_v60 }
 0x200   : > { %3789 = vmatpush3.bf16.msra.mxu1 %v4147_v61  ;;  %3796 = vmatprep.mubr.msk.bf16.mxu1 %vm4235_vm7, %v4232_v59 }
 0x201   : > { %3790 = vmatprep.subr.bf16.mxu1 %v4232_v59 }
 0x204   : > { %3791 = vmatpush3.bf16.msra.mxu1 %v4148_v63 }
 0x205   : > { %3792 = vmatprep.subr.bf16.mxu1 %v4232_v59 }
 0x208   : > { %3793 = vmatpush3.bf16.msra.mxu1 %v4149_v1 }
 0x209   : > { %3794 = vmatprep.subr.bf16.mxu1 %v4232_v59 }
 0x20c   : > { %3795 = vmatpush3.bf16.msra.mxu1 %v4150_v2 }
 0x20d   : > { %3808 = vmatprep.subr.bf16.mxu1 %v4232_v59 }
 0x20f   : > { %3797 = vmatmul.mubr.bf16.vlgmr.msra.gmra.mrb[36].mxu1 %v2115_v3 }
 0x210   : > { %3809 = vmatpush3.bf16.msra.mxu1 %v4151_v4  ;;  %3800 = vmatprep.mubr.msk.bf16.mxu1 %vm4235_vm7, %v4232_v59 }
 0x211   : > { %3810 = vmatprep.subr.bf16.mxu1 %v4232_v59 }
 0x214   : > { %3811 = vmatpush3.bf16.msra.mxu1 %v4153_v5 }
 0x215   : > { %3812 = vmatprep.subr.bf16.mxu1 %v4232_v59 }
 0x217   : > { %3801 = vmatmul.mubr.bf16.gmra.mrb[40].mxu1 %v2116_v6 }
 0x218   : > { %3813 = vmatpush3.bf16.msra.mxu1 %v4155_v7  ;;  %3804 = vmatprep.mubr.msk.bf16.mxu1 %vm4235_vm7, %v4232_v59 }
 0x219   : > { %3814 = vmatprep.subr.bf16.mxu1 %v4232_v59 }
 0x21c   : > { %3815 = vmatpush3.bf16.msra.mxu1 %v4157_v8 }
 0x21d   : > { %3816 = vmatprep.subr.bf16.mxu1 %v4232_v59 }
 0x21f   : > { %3805 = vmatmul.mubr.bf16.gmra.mrb[44].mxu1 %v2117_v12 }
 0x220   : > { %3817 = vmatpush3.bf16.msra.mxu1 %v4159_v14  ;;  %3824 = vmatprep.mubr.msk.bf16.mxu1 %vm4235_vm7, %v4232_v59 }
 0x221   : > { %3818 = vmatprep.subr.bf16.mxu1 %v4232_v59 }
 0x224   : > { %3819 = vmatpush3.bf16.msra.mxu1 %v4161_v15 }
 0x225   : > { %3820 = vmatprep.subr.bf16.mxu1 %v4232_v59 }
 0x228   : > { %3821 = vmatpush3.bf16.msra.mxu1 %v4163_v16 }
 0x229   : > { %3822 = vmatprep.subr.bf16.mxu1 %v4232_v59 }
 0x22c   : > { %3823 = vmatpush3.bf16.msra.mxu1 %v4165_v17 }
 0x22d   : > { %3864 = vmatprep.subr.bf16.mxu1 %v4232_v59 }
 0x22f   : > { %3825 = vmatmul.mubr.bf16.vlgmr.msra.gmra.mrb[48].mxu1 %v2249_v20 }
 0x230   : > { %3865 = vmatpush3.bf16.msra.mxu1 %v4167_v22  ;;  %3828 = vmatprep.mubr.msk.bf16.mxu1 %vm4235_vm7, %v4232_v59 }
 0x231   : > { %3866 = vmatprep.subr.bf16.mxu1 %v4232_v59 }
 0x234   : > { %3867 = vmatpush3.bf16.msra.mxu1 %v4169_v24 }
 0x235   : > { %3868 = vmatprep.subr.bf16.mxu1 %v4232_v59 }
 0x237   : > { %3829 = vmatmul.mubr.bf16.gmra.mrb[52].mxu1 %v2250_v28 }
 0x238   : > { %3869 = vmatpush3.bf16.msra.mxu1 %v4171_v29  ;;  %3832 = vmatprep.mubr.msk.bf16.mxu1 %vm4235_vm7, %v4232_v59 }
 0x239   : > { %3870 = vmatprep.subr.bf16.mxu1 %v4232_v59 }
 0x23c   : > { %3871 = vmatpush3.bf16.msra.mxu1 %v4173_v30 }
 0x23d   : > { %3872 = vmatprep.subr.bf16.mxu1 %v4232_v59 }
 0x23f   : > { %3833 = vmatmul.mubr.bf16.gmra.mrb[56].mxu1 %v2251_v32 }
 0x240   : > { %3873 = vmatpush3.bf16.msra.mxu1 %v4175_v33  ;;  %3880 = vmatprep.mubr.msk.bf16.mxu1 %vm4235_vm7, %v4232_v59 }
 0x241   : > { %3874 = vmatprep.subr.bf16.mxu1 %v4232_v59 }
 0x244   : > { %3875 = vmatpush3.bf16.msra.mxu1 %v4177_v34 }
 0x245   : > { %3876 = vmatprep.subr.bf16.mxu1 %v4232_v59 }
 0x248   : > { %3877 = vmatpush3.bf16.msra.mxu1 %v4179_v35 }
 0x249   : > { %3878 = vmatprep.subr.bf16.mxu1 %v4232_v59 }
 0x24c   : > { %3879 = vmatpush3.bf16.msra.mxu1 %v4181_v36 }
 0x24d   : > { %3920 = vmatprep.subr.bf16.mxu1 %v4232_v59 }
 0x24f   : > { %3881 = vmatmul.mubr.bf16.vlgmr.msra.gmra.mrb[60].mxu1 %v2517_v13  ;;  %v2519_v13 = vpack.c.bf16 %v2516_v11, %v2516_v11 }
 0x250   : > { %3921 = vmatpush3.bf16.msra.mxu1 %v4183_v37  ;;  %3884 = vmatprep.mubr.msk.bf16.mxu1 %vm4235_vm7, %v4232_v59 }
 0x251   : > { %3922 = vmatprep.subr.bf16.mxu1 %v4232_v59 }
 0x254   : > { %3923 = vmatpush3.bf16.msra.mxu1 %v4184_v38 }
 0x255   : > { %3924 = vmatprep.subr.bf16.mxu1 %v4232_v59 }
 0x257   : > { %3885 = vmatmul.mubr.bf16.gmra.mrb[64].mxu1 %v2518_v25  ;;  %v4190_v25 = vld [vmem:[%s5021_s3 + $0x238] sm:$0xff]  }
 0x258   : > { %3925 = vmatpush3.bf16.msra.mxu1 %v4185_v39  ;;  %3888 = vmatprep.mubr.msk.bf16.mxu1 %vm4235_vm7, %v4232_v59 }
 0x259   : > { %3926 = vmatprep.subr.bf16.mxu1 %v4232_v59 }
 0x25c   : > { %3927 = vmatpush3.bf16.msra.mxu1 %v4186_v9 }
 0x25d   : > { %3928 = vmatprep.subr.bf16.mxu1 %v4232_v59 }
 0x25f   : > { %3889 = vmatmul.mubr.bf16.gmra.mrb[68].mxu1 %v2519_v13 }
 0x260   : > { %3929 = vmatpush3.bf16.msra.mxu1 %v4187_v40  ;;  %3936 = vmatprep.mubr.msk.bf16.mxu1 %vm4235_vm7, %v4232_v59 }
 0x261   : > { %3930 = vmatprep.subr.bf16.mxu1 %v4232_v59 }
 0x264   : > { %3931 = vmatpush3.bf16.msra.mxu1 %v4188_v21 }
 0x265   : > { %3932 = vmatprep.subr.bf16.mxu1 %v4232_v59 }
 0x268   : > { %3933 = vmatpush3.bf16.msra.mxu1 %v4189_v23 }
 0x269   : > { %3934 = vmatprep.subr.bf16.mxu1 %v4232_v59 }
 0x26c   : > { %3935 = vmatpush3.bf16.msra.mxu1 %v4190_v25 }
 0x26f   : > { %3937 = vmatmul.mubr.bf16.vlgmr.msra.gmra.mrb[72].mxu1 %v2785_v43 }
 0x270   : > { %3940 = vmatprep.mubr.msk.bf16.mxu1 %vm4235_vm7, %v4232_v59 }
 0x277   : > { %3941 = vmatmul.mubr.bf16.gmra.mrb[76].mxu1 %v2786_v46 }
 0x278   : > { %3944 = vmatprep.mubr.msk.bf16.mxu1 %vm4235_vm7, %v4232_v59 }
 0x27f   : > { %3945 = vmatmul.mubr.bf16.gmra.mrb[80].mxu1 %v2787_v48 }
 0x282   : > { %v1850_v49 = vpop.f32.mrb[0].mxu1 }
 0x283   : > { %v3714_v50 = vpop.f32.mrb[1].mxu1 }
 0x284   : > { %v1853_v51 = vpop.f32.mrb[2].mxu1 }
 0x285   : > { %v3715_v52 = vpop.f32.mrb[3].mxu1 }
 0x287   : > { %v4965_v3 = vpop.f32.mrb[8].mxu0 }
 0x288   : > { %v3854_v4 = vpop.f32.mrb[9].mxu0 }
 0x289   : > { %v4967_v6 = vpop.f32.mrb[10].mxu0 }
 0x28a   : > { %v1858_v53 = vpop.f32.mrb[4].mxu1  ;;  %v3855_v10 = vpop.f32.mrb[11].mxu0 }
 0x28b   : > { %v3718_v54 = vpop.f32.mrb[5].mxu1 }
 0x28c   : > { %v1861_v55 = vpop.f32.mrb[6].mxu1 }
 0x28d   : > { %v3719_v56 = vpop.f32.mrb[7].mxu1 }
 0x28f   : > { %v4969_v16 = vpop.f32.mrb[12].mxu0 }
 0x290   : > { %v3858_v17 = vpop.f32.mrb[13].mxu0 }
 0x291   : > { %v4971_v19 = vpop.f32.mrb[14].mxu0 }
 0x292   : > { %v1866_v57 = vpop.f32.mrb[8].mxu1  ;;  %v3859_v24 = vpop.f32.mrb[15].mxu0 }
 0x293   : > { %v3722_v58 = vpop.f32.mrb[9].mxu1 }
 0x294   : > { %v1869_v60 = vpop.f32.mrb[10].mxu1 }
 0x295   : > { %v3723_v61 = vpop.f32.mrb[11].mxu1 }
 0x297   : > { %v4973_v28 = vpop.f32.mrb[16].mxu0 }
 0x298   : > { %v3862_v29 = vpop.f32.mrb[17].mxu0 }
 0x299   : > { %v2504_v30 = vpop.f32.mrb[18].mxu0 }
 0x29a   : > { %v3863_v31 = vpop.f32.mrb[19].mxu0 }
 0x2a2   : > { %v1954_v62 = vpop.f32.mrb[12].mxu1 }
 0x2a3   : > { %v1955_v63 = vadd.f32 %v1954_v62, %v1850_v49  ;;  %v3742_v0 = vpop.f32.mrb[13].mxu1 }
 0x2a4   : > { %v1957_v1 = vpop.f32.mrb[14].mxu1 }
 0x2a5   : > { %v1958_v59 = vadd.f32 %v1957_v1, %v1853_v51  ;;  %v3743_v2 = vpop.f32.mrb[15].mxu1 }
 0x2a7   : > { %v4975_v38 = vpop.f32.mrb[20].mxu0 }
 0x2a8   : > { %v3910_v39 = vpop.f32.mrb[21].mxu0 }
 0x2a9   : > { %v4977_v11 = vpop.f32.mrb[22].mxu0 }
 0x2aa   : > { %v1962_v5 = vpop.f32.mrb[16].mxu1  ;;  %v3911_v21 = vpop.f32.mrb[23].mxu0 }
 0x2ab   : > { %v1963_v7 = vadd.f32 %v1962_v5, %v1858_v53  ;;  %v3746_v8 = vpop.f32.mrb[17].mxu1 }
 0x2ac   : > { %v1965_v12 = vpop.f32.mrb[18].mxu1 }
 0x2ad   : > { %v1966_v14 = vadd.f32 %v1965_v12, %v1861_v55  ;;  %v3747_v15 = vpop.f32.mrb[19].mxu1 }
 0x2af   : > { %v4979_v42 = vpop.f32.mrb[24].mxu0 }
 0x2b0   : > { %v3914_v43 = vpop.f32.mrb[25].mxu0 }
 0x2b1   : > { %v4981_v45 = vpop.f32.mrb[26].mxu0 }
 0x2b2   : > { %v1970_v18 = vpop.f32.mrb[20].mxu1  ;;  %v3915_v48 = vpop.f32.mrb[27].mxu0 }
 0x2b3   : > { %v1971_v20 = vadd.f32 %v1970_v18, %v1866_v57  ;;  %v3750_v22 = vpop.f32.mrb[21].mxu1 }
 0x2b4   : > { %v1973_v26 = vpop.f32.mrb[22].mxu1 }
 0x2b5   : > { %v3751_v27 = vpop.f32.mrb[23].mxu1 }
 0x2b7   : > { %v4983_v51 = vpop.f32.mrb[28].mxu0 }
 0x2b8   : > { %v3918_v52 = vpop.f32.mrb[29].mxu0 }
 0x2b9   : > { %v2772_v53 = vpop.f32.mrb[30].mxu0 }
 0x2ba   : > { %v3919_v54 = vpop.f32.mrb[31].mxu0 }
 0x2c2   : > { %v2083_v32 = vpop.f32.mrb[24].mxu1 }
 0x2c3   : > { %v2105_v33 = vadd.f32 %v2083_v32, %v1955_v63  ;;  %v3770_v34 = vpop.f32.mrb[25].mxu1 }
 0x2c4   : > { %v2086_v35 = vpop.f32.mrb[26].mxu1 }
 0x2c5   : > { %v2106_v36 = vadd.f32 %v2086_v35, %v1958_v59  ;;  %v3771_v37 = vpop.f32.mrb[27].mxu1 }
 0x2ca   : > { %v2091_v9 = vpop.f32.mrb[28].mxu1 }
 0x2cb   : > { %v2107_v13 = vadd.f32 %v2091_v9, %v1963_v7  ;;  %v3774_v40 = vpop.f32.mrb[29].mxu1 }
 0x2cc   : > { %v2094_v23 = vpop.f32.mrb[30].mxu1 }
 0x2cd   : > { %v2108_v25 = vadd.f32 %v2094_v23, %v1966_v14  ;;  %v3775_v41 = vpop.f32.mrb[31].mxu1 }
 0x2d2   : > { %v2099_v44 = vpop.f32.mrb[32].mxu1 }
 0x2d3   : > { %v2109_v46 = vadd.f32 %v2099_v44, %v1971_v20  ;;  %v3778_v47 = vpop.f32.mrb[33].mxu1 }
 0x2d4   : > { %v2102_v49 = vpop.f32.mrb[34].mxu1 }
 0x2d5   : > { %v3779_v50 = vpop.f32.mrb[35].mxu1 }
 0x2e2   : > { %v2217_v55 = vpop.f32.mrb[36].mxu1 }
 0x2e3   : > { %v2239_v56 = vadd.f32 %v2217_v55, %v2105_v33  ;;  %v3798_v57 = vpop.f32.mrb[37].mxu1 }
 0x2e4   : > { %v2220_v58 = vpop.f32.mrb[38].mxu1 }
 0x2e5   : > { %v2240_v60 = vadd.f32 %v2220_v58, %v2106_v36  ;;  %v3799_v61 = vpop.f32.mrb[39].mxu1 }
 0x2ea   : > { %v2225_v62 = vpop.f32.mrb[40].mxu1 }
 0x2eb   : > { %v2241_v63 = vadd.f32 %v2225_v62, %v2107_v13  ;;  %v3802_v0 = vpop.f32.mrb[41].mxu1 }
 0x2ec   : > { %v2228_v1 = vpop.f32.mrb[42].mxu1 }
 0x2ed   : > { %v2242_v59 = vadd.f32 %v2228_v1, %v2108_v25  ;;  %v3803_v2 = vpop.f32.mrb[43].mxu1 }
 0x2f2   : > { %v2233_v4 = vpop.f32.mrb[44].mxu1 }
 0x2f3   : > { %v2243_v5 = vadd.f32 %v2233_v4, %v2109_v46  ;;  %v3806_v7 = vpop.f32.mrb[45].mxu1 }
 0x2f4   : > { %v2236_v8 = vpop.f32.mrb[46].mxu1 }
 0x2f5   : > { %v3807_v10 = vpop.f32.mrb[47].mxu1 }
 0x302   : > { %v2351_v12 = vpop.f32.mrb[48].mxu1 }
 0x303   : > { %v2373_v14 = vadd.f32 %v2351_v12, %v2239_v56  ;;  %v3826_v15 = vpop.f32.mrb[49].mxu1  ;;  %v3378_v56 = vld [vmem:[%s5022_s4] ss:$0 sm:$0xff] }
 0x304   : > { %v2354_v17 = vpop.f32.mrb[50].mxu1 }
 0x305   : > { %v2374_v18 = vadd.f32 %v2354_v17, %v2240_v60  ;;  %v2507_v20 = vadd.f32 %v4965_v3, %v2373_v14  ;;  %v3827_v22 = vpop.f32.mrb[51].mxu1 }
 0x307   : > { %v2508_v24 = vadd.f32 %v4967_v6, %v2374_v18 }
 0x30a   : > { %v2359_v26 = vpop.f32.mrb[52].mxu1 }
 0x30b   : > { %v2375_v27 = vadd.f32 %v2359_v26, %v2241_v63  ;;  %v3830_v29 = vpop.f32.mrb[53].mxu1 }
 0x30c   : > { %v2362_v30 = vpop.f32.mrb[54].mxu1 }
 0x30d   : > { %v2376_v31 = vadd.f32 %v2362_v30, %v2242_v59  ;;  %v2509_v32 = vadd.f32 %v4969_v16, %v2375_v27  ;;  %v3831_v33 = vpop.f32.mrb[55].mxu1 }
 0x30f   : > { %v2510_v34 = vadd.f32 %v4971_v19, %v2376_v31 }
 0x312   : > { %v2367_v35 = vpop.f32.mrb[56].mxu1 }
 0x313   : > { %v2377_v36 = vadd.f32 %v2367_v35, %v2243_v5  ;;  %v3834_v37 = vpop.f32.mrb[57].mxu1 }
 0x314   : > { %v2370_v39 = vpop.f32.mrb[58].mxu1 }
 0x315   : > { %v2511_v9 = vadd.f32 %v4973_v28, %v2377_v36  ;;  %v3835_v3 = vpop.f32.mrb[59].mxu1 }
 0x322   : > { %v2619_v13 = vpop.f32.mrb[60].mxu1 }
 0x323   : > { %v2641_v40 = vadd.f32 %v2619_v13, %v2507_v20  ;;  %v3882_v6 = vpop.f32.mrb[61].mxu1 }
 0x324   : > { %v2622_v21 = vpop.f32.mrb[62].mxu1 }
 0x325   : > { %v2642_v23 = vadd.f32 %v2622_v21, %v2508_v24  ;;  %v2775_v25 = vadd.f32 %v4975_v38, %v2641_v40  ;;  %v3883_v41 = vpop.f32.mrb[63].mxu1 }
 0x327   : > { %v2776_v16 = vadd.f32 %v4977_v11, %v2642_v23 }
 0x32a   : > { %v2627_v43 = vpop.f32.mrb[64].mxu1 }
 0x32b   : > { %v2643_v44 = vadd.f32 %v2627_v43, %v2509_v32  ;;  %v3886_v19 = vpop.f32.mrb[65].mxu1 }
 0x32c   : > { %v2630_v46 = vpop.f32.mrb[66].mxu1 }
 0x32d   : > { %v2644_v47 = vadd.f32 %v2630_v46, %v2510_v34  ;;  %v2777_v48 = vadd.f32 %v4979_v42, %v2643_v44  ;;  %v3887_v49 = vpop.f32.mrb[67].mxu1 }
 0x32f   : > { %v2778_v28 = vadd.f32 %v4981_v45, %v2644_v47 }
 0x332   : > { %v2635_v50 = vpop.f32.mrb[68].mxu1 }
 0x333   : > { %v2645_v52 = vadd.f32 %v2635_v50, %v2511_v9  ;;  %v3890_v53 = vpop.f32.mrb[69].mxu1 }
 0x334   : > { %v2638_v54 = vpop.f32.mrb[70].mxu1 }
 0x335   : > { %v2779_v38 = vadd.f32 %v4983_v51, %v2645_v52  ;;  %v3891_v55 = vpop.f32.mrb[71].mxu1 }
 0x342   : > { %v2887_v11 = vpop.f32.mrb[72].mxu1 }
 0x343   : > { %v2909_v57 = vadd.f32 %v2887_v11, %v2775_v25  ;;  %v3938_v42 = vpop.f32.mrb[73].mxu1 }
 0x344   : > { %v2890_v58 = vpop.f32.mrb[74].mxu1 }
 0x345   : > { %v2921_v60 = vadd.f32 %v3378_v56, %v2909_v57  ;;  %v2910_v45 = vadd.f32 %v2890_v58, %v2776_v16  ;;  %v3939_v61 = vpop.f32.mrb[75].mxu1 }
 0x347   : > { %2926 = vst [vmem:[%s4324_s22] sm:$0xff] %v2921_v60  ;;  %v2922_v62 = vadd.f32 %v3378_v56, %v2910_v45 }
 0x349   : > { %2927 = vst [vmem:[%s4324_s22 + $0x8] sm:$0xff] %v2922_v62 }
 0x34a   : > { %v2895_v63 = vpop.f32.mrb[76].mxu1 }
 0x34b   : > { %v2911_v51 = vadd.f32 %v2895_v63, %v2777_v48  ;;  %v3942_v0 = vpop.f32.mrb[77].mxu1 }
 0x34c   : > { %v2898_v1 = vpop.f32.mrb[78].mxu1 }
 0x34d   : > { %v2923_v59 = vadd.f32 %v3378_v56, %v2911_v51  ;;  %v2912_v2 = vadd.f32 %v2898_v1, %v2778_v28  ;;  %v3943_v4 = vpop.f32.mrb[79].mxu1 }
 0x34f   : > { %2928 = vst [vmem:[%s4324_s22 + $0x10] sm:$0xff] %v2923_v59  ;;  %v2924_v5 = vadd.f32 %v3378_v56, %v2912_v2 }
 0x351   : > { %2929 = vst [vmem:[%s4324_s22 + $0x18] sm:$0xff] %v2924_v5 }
 0x352   : > { %v2903_v7 = vpop.f32.mrb[80].mxu1 }
 0x353   : > { %v2913_v8 = vadd.f32 %v2903_v7, %v2779_v38  ;;  %v3946_v10 = vpop.f32.mrb[81].mxu1 }
 0x354   : > { %v2906_v12 = vpop.f32.mrb[82].mxu1 }
 0x355   : > { %v2925_v14 = vadd.f32 %v3378_v56, %v2913_v8  ;;  %v3947_v15 = vpop.f32.mrb[83].mxu1 }
 0x357   : > { %2930 = vst [vmem:[%s4324_s22 + $0x20] sm:$0xff] %v2925_v14 }
 0x358 PF: > { %s16_s25 = sadd.s32 1, %s4229_s25   ;;  %s5025_s21 = smov %s4221_s23 }
 0x359   : > { %p13_p8 = scmp.ge.s32.totalorder %s16_s25, 6   ;;  %s5026_s22 = smov %s4225_s24 }
 0x35a   : > { %s5027_s23 = smov %s5030_s26  ;;  %s5028_s24 = smov %s5034_s27 }
 0x35b   :  { %15 = sbr.rel (!%p13_p8) target bundleno = 3 (0x3), region = 98 }

</bundles_post_ra>
